<compile_context>
chip_gen: v5e
topology: v5e:2x2
jax: 0.10.0
libtpu: 0.0.40
codegen_flags: <defaults>
</compile_context>

<pallas_src>
import functools
import math

import jax
import jax.numpy as jnp
from jax import lax
from jax.experimental import pallas as pl
from jax.experimental.pallas import tpu as pltpu


# ------------------------------- helpers ------------------------------------ #

def _round_up(x, m):
    return (x + m - 1) // m * m


def _device_kind():
    try:
        return jax.devices()[0].device_kind.lower()
    except Exception:
        return ""


def _vmem_budget_bytes(kind):
    """Usable VMEM budget (with headroom) per TPU generation."""
    if "v7" in kind:
        return int((64 << 20) * 0.75)        # v7x: 64 MiB physical per TensorCore
    if "v4" in kind or "v5" in kind or "v6" in kind:
        return int((128 << 20) * 0.78)       # v4/v5e/v5p/v6e: 128 MiB physical
    if "v2" in kind or "v3" in kind:
        return int((16 << 20) * 0.75)
    return 32 << 20                          # unknown generation: conservative


def _pick_row_tile(M, target):
    """Row tile: multiple of 8, <= target, preferring an exact divisor of M
    (avoids the full-activation pad copy) and keeping >= 2 row tiles when M
    allows it (v7x dual-TensorCore sharding of the 'parallel' axis)."""
    cap = max(8, min(target, _round_up(M, 8)))
    if M >= 16:
        cap = min(cap, _round_up((M + 1) // 2, 8))
    cap = max(8, (cap // 8) * 8)
    t = cap
    while t >= max(8, cap // 2):
        if M % t == 0:
            return t
        t -= 8
    return cap


def prepare_params(params, compute_dtype=jnp.bfloat16):
    """One-time parameter prep (call at load time, idempotent):
    cast weights to the MXU compute dtype, reshape biases to 2-D f32, and pad
    d_ff to a multiple of 128 (zero padding contributes exactly 0 to the output)."""
    w1, b1, w2, b2 = params["w1"], params["b1"], params["w2"], params["b2"]
    if b1.ndim == 1:
        b1 = b1.reshape(1, -1)
    if b2.ndim == 1:
        b2 = b2.reshape(1, -1)
    D, d_ff = w1.shape
    d_ffp = _round_up(d_ff, 128)
    if d_ffp != d_ff:
        pad = d_ffp - d_ff
        w1 = jnp.pad(w1, ((0, 0), (0, pad)))
        b1 = jnp.pad(b1, ((0, 0), (0, pad)))
        w2 = jnp.pad(w2, ((0, pad), (0, 0)))
    if w1.dtype != compute_dtype:
        w1 = w1.astype(compute_dtype)
    if w2.dtype != compute_dtype:
        w2 = w2.astype(compute_dtype)
    if b1.dtype != jnp.float32:
        b1 = b1.astype(jnp.float32)
    if b2.dtype != jnp.float32:
        b2 = b2.astype(jnp.float32)
    return {"w1": w1, "b1": b1, "w2": w2, "b2": b2}


# -------------------------------- kernel ------------------------------------ #

def _gelu_exact(t):
    # matches torch.nn.functional.gelu default (erf based); f32 math
    return 0.5 * t * (1.0 + lax.erf(t * (1.0 / math.sqrt(2.0))))


def _ffn_kernel(x_ref, w1_ref, b1_ref, w2_ref, b2_ref, o_ref, acc_ref, *,
                tf, resident):
    """One (row-tile i, d_ff-tile j) step of  y = gelu(x @ W1 + b1) @ W2 + b2."""
    j = pl.program_id(1)

    @pl.when(j == 0)
    def _init():
        acc_ref[...] = jnp.zeros_like(acc_ref)

    if resident:
        # Whole W1/W2/b1 are VMEM-resident (constant block index); slice the
        # current d_ff tile here. Offsets are tf-aligned.
        off = pl.multiple_of(j * tf, tf)
        w1 = w1_ref[:, pl.ds(off, tf)]
        b1 = b1_ref[:, pl.ds(off, tf)]
        w2 = w2_ref[pl.ds(off, tf), :]
    else:
        w1 = w1_ref[...]
        b1 = b1_ref[...]
        w2 = w2_ref[...]

    # linear1 tile on the MXU (bf16 operands, f32 accumulation); bias + exact
    # erf GELU in f32.
    h = jnp.dot(x_ref[...], w1, preferred_element_type=jnp.float32)
    h = _gelu_exact(h + b1)
    # TODO(synk): nn.Dropout is identity in eval mode; a training-mode variant
    # would need in-kernel RNG (pltpu.prng_seed / prng_random_bits).

    # linear2 partial sum over this d_ff tile into the f32 VMEM accumulator.
    acc_ref[...] += jnp.dot(h.astype(w2.dtype), w2,
                            preferred_element_type=jnp.float32)

    @pl.when(j == pl.num_programs(1) - 1)
    def _finalize():
        o_ref[...] = (acc_ref[...] + b2_ref[...]).astype(o_ref.dtype)


# ------------------------------- wrapper ------------------------------------ #

def feed_forward(x, params, *, row_tile=None, ff_tile=None,
                 compute_dtype=jnp.bfloat16, out_dtype=None):
    """FeedForward forward pass for x of shape [B, S, d_model]."""
    B, S, D = x.shape
    p = prepare_params(params, compute_dtype)     # no-op if already prepared
    w1c, b1r, w2c, b2r = p["w1"], p["b1"], p["w2"], p["b2"]
    d_ffp = w1c.shape[1]
    out_dtype = x.dtype if out_dtype is None else out_dtype

    kind = _device_kind()
    budget = _vmem_budget_bytes(kind)
    cbytes = jnp.dtype(compute_dtype).itemsize
    obytes = jnp.dtype(out_dtype).itemsize

    # d_ff reduction tile: 512 on v5e (4x128x128 MXUs), 256 on v6e/v7x (2x256x256).
    if ff_tile is None:
        ff_tile = 512 if "v5" in kind else 256
    tf = max(128, min((ff_tile // 128) * 128, d_ffp))
    while d_ffp % tf:
        tf -= 128            # d_ffp is a multiple of 128, so this terminates >=128

    M = B * S
    weight_bytes = (w1c.size + w2c.size) * cbytes

    def footprint(tm, resident):
        tile = (tm * D) * (2 * cbytes       # x tile, double-buffered
                           + 2 * obytes     # out tile, double-buffered
                           + 4)             # f32 accumulator scratch
        if resident:
            wb = 2 * weight_bytes                      # assume 2 buffers (conservative)
            bias = 2 * (d_ffp + D) * 4
        else:
            wb = (D * tf + tf * D) * cbytes * 2        # streamed W1+W2 tiles, 2 buffers
            bias = 2 * (tf + D) * 4
        return tile + wb + bias

    # Prefer VMEM-resident weights (each weight DMA'd exactly once); otherwise
    # stream weight tiles with a large row tile to raise arithmetic intensity.
    tm_resident = _pick_row_tile(M, row_tile or 512)
    if footprint(tm_resident, True) <= budget:
        resident = True
        tm = tm_resident
    else:
        resident = False
        target = row_tile or (1024 if "v6" in kind else 512)
        tm = _pick_row_tile(M, target)
        while tm > 8 and footprint(tm, False) > budget:
            tm = _pick_row_tile(M, max(8, tm // 2))

    Mp = _round_up(M, tm)
    x2d = x.reshape(M, D)
    if Mp != M:
        # TODO(synk): an in-kernel tail mask would avoid this pad copy; tile
        # selection above already prefers divisors of M so this is rare.
        x2d = jnp.pad(x2d, ((0, Mp - M), (0, 0)))
    xc = x2d if x2d.dtype == compute_dtype else x2d.astype(compute_dtype)

    grid = (Mp // tm, d_ffp // tf)

    if resident:
        w1_spec = pl.BlockSpec((D, d_ffp), lambda i, j: (0, 0))
        b1_spec = pl.BlockSpec((1, d_ffp), lambda i, j: (0, 0))
        w2_spec = pl.BlockSpec((d_ffp, D), lambda i, j: (0, 0))
    else:
        w1_spec = pl.BlockSpec((D, tf), lambda i, j: (0, j))
        b1_spec = pl.BlockSpec((1, tf), lambda i, j: (0, j))
        w2_spec = pl.BlockSpec((tf, D), lambda i, j: (j, 0))

    kernel = functools.partial(_ffn_kernel, tf=tf, resident=resident)

    weight_passes = 1 if resident else grid[0]
    cost = pl.CostEstimate(
        flops=4 * Mp * D * d_ffp,                 # two matmuls
        transcendentals=Mp * d_ffp,               # erf on the hidden activation
        bytes_accessed=int(xc.size * cbytes + weight_bytes * weight_passes
                           + (b1r.size + b2r.size) * 4 + Mp * D * obytes),
    )

    out2d = pl.pallas_call(
        kernel,
        out_shape=jax.ShapeDtypeStruct((Mp, D), out_dtype),
        grid=grid,
        in_specs=[
            pl.BlockSpec((tm, D), lambda i, j: (i, 0)),   # x row tile (resident over j)
            w1_spec,
            b1_spec,
            w2_spec,
            pl.BlockSpec((1, D), lambda i, j: (0, 0)),    # b2 (resident)
        ],
        out_specs=pl.BlockSpec((tm, D), lambda i, j: (i, 0)),
        scratch_shapes=[pltpu.VMEM((tm, D), jnp.float32)],
        compiler_params=pltpu.CompilerParams(
            dimension_semantics=("parallel", "arbitrary"),
            vmem_limit_bytes=int(budget),
        ),
        cost_estimate=cost,
    )(xc, w1c, b1r, w2c, b2r)

    return out2d[:M].reshape(B, S, D).astype(out_dtype)


# ------------------------------ references ---------------------------------- #

def feed_forward_ref_f32(x, params):
    # Pure f32, exact PyTorch semantics (erf GELU, eval-mode dropout).
    h = jax.nn.gelu(x @ params["w1"] + params["b1"], approximate=False)
    return h @ params["w2"] + params["b2"]


def feed_forward_ref_bf16(x, params):
    # Same math as the kernel (bf16 MXU operands, f32 accumulation / elementwise).
    cd = jnp.bfloat16
    M, D = x.shape[0] * x.shape[1], x.shape[2]
    x2d = x.reshape(M, D)
    h = jnp.dot(x2d.astype(cd), params["w1"].astype(cd),
                preferred_element_type=jnp.float32) + params["b1"]
    h = _gelu_exact(h)
    y = jnp.dot(h.astype(cd), params["w2"].astype(cd),
                preferred_element_type=jnp.float32) + params["b2"]
    return y.reshape(x.shape).astype(x.dtype)


# --------------------------------- main -------------------------------------- #

if __name__ == "__main__":
    B, S = 2, 128
    d_model, d_ff = 128, 512

    key = jax.random.PRNGKey(0)
    kx, kw1, kb1, kw2, kb2 = jax.random.split(key, 5)
    x = jax.random.normal(kx, (B, S, d_model), jnp.float32)

    # nn.Linear-style init, weights stored pre-transposed as (in, out)
    bound1 = 1.0 / math.sqrt(d_model)
    bound2 = 1.0 / math.sqrt(d_ff)
    params = {
        "w1": jax.random.uniform(kw1, (d_model, d_ff), jnp.float32, -bound1, bound1),
        "b1": jax.random.uniform(kb1, (d_ff,), jnp.float32, -bound1, bound1),
        "w2": jax.random.uniform(kw2, (d_ff, d_model), jnp.float32, -bound2, bound2),
        "b2": jax.random.uniform(kb2, (d_model,), jnp.float32, -bound2, bound2),
    }

    # One-time parameter prep (persistent bf16 weights; no per-call cast traffic).
    params_dev = prepare_params(params)

    out = feed_forward(x, params_dev)
    out = jax.block_until_ready(out)
    assert out.shape == (B, S, d_model)

    # Tight check vs a reference using identical bf16-operand / f32-accum math.
    ref_bf16 = feed_forward_ref_bf16(x, params)
    assert jnp.allclose(out, ref_bf16, rtol=2e-3, atol=2e-3), "mismatch vs bf16 reference"

    # Loose check vs the pure-f32 PyTorch-semantics reference (bf16 rounding budget).
    ref_f32 = feed_forward_ref_f32(x, params)
    assert jnp.allclose(out, ref_f32, rtol=3e-2, atol=3e-2), "mismatch vs f32 reference"

    print("KERNEL_OK")
</pallas_src>

<mosaic_0001>
module attributes {stable_mosaic.version = 11 : i64} {
  func.func @_ffn_kernel(%arg0: i32, %arg1: i32, %arg2: memref<128x128xbf16, #tpu.memory_space<vmem>>, %arg3: memref<128x512xbf16, #tpu.memory_space<vmem>>, %arg4: memref<1x512xf32, #tpu.memory_space<vmem>>, %arg5: memref<512x128xbf16, #tpu.memory_space<vmem>>, %arg6: memref<1x128xf32, #tpu.memory_space<vmem>>, %arg7: memref<128x128xf32, #tpu.memory_space<vmem>>, %arg8: memref<128x128xf32, #tpu.memory_space<vmem>>) attributes {dimension_semantics = [#tpu.dimension_semantics<parallel>, #tpu.dimension_semantics<arbitrary>], iteration_bounds = array<i64: 2, 2>, scalar_prefetch = 0 : i64, scratch_operands = 1 : i64, tpu.core_type = #tpu.core_type<tc>, window_params = [{transform_indices = @transform_0, window_bounds = array<i64: 128, 128>}, {pipeline_mode = #tpu.pipeline_mode<synchronous>, transform_indices = @transform_1, window_bounds = array<i64: 128, 512>}, {pipeline_mode = #tpu.pipeline_mode<synchronous>, transform_indices = @transform_2, window_bounds = array<i64: 1, 512>}, {pipeline_mode = #tpu.pipeline_mode<synchronous>, transform_indices = @transform_3, window_bounds = array<i64: 512, 128>}, {pipeline_mode = #tpu.pipeline_mode<synchronous>, transform_indices = @transform_4, window_bounds = array<i64: 1, 128>}, {transform_indices = @transform_5, window_bounds = array<i64: 128, 128>}]} {
    %c0_i32 = arith.constant 0 : i32
    %0 = arith.cmpi eq, %arg1, %c0_i32 : i32
    %1 = arith.extui %0 : i1 to i32
    %c0_i32_0 = arith.constant 0 : i32
    %2 = arith.cmpi ne, %1, %c0_i32_0 : i32
    scf.if %2 {
      %cst_14 = arith.constant 0.000000e+00 : f32
      %31 = vector.broadcast %cst_14 : f32 to vector<128x128xf32>
      %c0_15 = arith.constant 0 : index
      %c0_16 = arith.constant 0 : index
      %32 = vector.load %arg8[%c0_15, %c0_16] : memref<128x128xf32, #tpu.memory_space<vmem>>, vector<128x128xf32>
      tpu.vector_store %arg8[%c0_15, %c0_16], %31 {strides = array<i32>} : memref<128x128xf32, #tpu.memory_space<vmem>>, vector<128x128xf32>,
    } else {
    }
    %c256_i32 = arith.constant 256 : i32
    %3 = arith.muli %arg1, %c256_i32 : i32
    %4 = tpu.assume_multiple %3, 256 : i32
    %c0 = arith.constant 0 : index
    %5 = arith.index_cast %4 : i32 to index
    %6 = vector.load %arg3[%c0, %5] : memref<128x512xbf16, #tpu.memory_space<vmem>>, vector<128x256xbf16>
    %c0_1 = arith.constant 0 : index
    %7 = arith.index_cast %4 : i32 to index
    %8 = vector.load %arg4[%c0_1, %7] : memref<1x512xf32, #tpu.memory_space<vmem>>, vector<1x256xf32>
    %9 = arith.index_cast %4 : i32 to index
    %c0_2 = arith.constant 0 : index
    %10 = vector.load %arg5[%9, %c0_2] : memref<512x128xbf16, #tpu.memory_space<vmem>>, vector<256x128xbf16>
    %c0_3 = arith.constant 0 : index
    %c0_4 = arith.constant 0 : index
    %11 = vector.load %arg2[%c0_3, %c0_4] : memref<128x128xbf16, #tpu.memory_space<vmem>>, vector<128x128xbf16>
    %cst = arith.constant dense<0.000000e+00> : vector<128x256xf32>
    %12 = tpu.matmul %11, %6, %cst {dimension_numbers = #tpu.dot_dimension_numbers<[1], [0], [0], [1], [0, 0, 1, 1], [], []>} : vector<128x128xbf16>, vector<128x256xbf16>, vector<128x256xf32> -> vector<128x256xf32>
    %13 = vector.broadcast %8 : vector<1x256xf32> to vector<128x256xf32>
    %14 = arith.addf %12, %13 : vector<128x256xf32>
    %cst_5 = arith.constant 5.000000e-01 : f32
    %15 = vector.broadcast %cst_5 : f32 to vector<128x256xf32>
    %16 = arith.mulf %15, %14 : vector<128x256xf32>
    %cst_6 = arith.constant 0.707106769 : f32
    %17 = vector.broadcast %cst_6 : f32 to vector<128x256xf32>
    %18 = arith.mulf %14, %17 : vector<128x256xf32>
    %19 = math.erf %18 : vector<128x256xf32>
    %cst_7 = arith.constant 1.000000e+00 : f32
    %20 = vector.broadcast %cst_7 : f32 to vector<128x256xf32>
    %21 = arith.addf %20, %19 : vector<128x256xf32>
    %22 = arith.mulf %16, %21 : vector<128x256xf32>
    %c0_8 = arith.constant 0 : index
    %c0_9 = arith.constant 0 : index
    %23 = vector.load %arg8[%c0_8, %c0_9] : memref<128x128xf32, #tpu.memory_space<vmem>>, vector<128x128xf32>
    %24 = arith.truncf %22 : vector<128x256xf32> to vector<128x256xbf16>
    %cst_10 = arith.constant dense<0.000000e+00> : vector<128x128xf32>
    %25 = tpu.matmul %24, %10, %cst_10 {dimension_numbers = #tpu.dot_dimension_numbers<[1], [0], [0], [1], [0, 0, 1, 1], [], []>} : vector<128x256xbf16>, vector<256x128xbf16>, vector<128x128xf32> -> vector<128x128xf32>
    %26 = arith.addf %23, %25 : vector<128x128xf32>
    %c0_11 = arith.constant 0 : index
    %c0_12 = arith.constant 0 : index
    %27 = vector.load %arg8[%c0_11, %c0_12] : memref<128x128xf32, #tpu.memory_space<vmem>>, vector<128x128xf32>
    tpu.vector_store %arg8[%c0_11, %c0_12], %26 {strides = array<i32>} : memref<128x128xf32, #tpu.memory_space<vmem>>, vector<128x128xf32>,
    %c1_i32 = arith.constant 1 : i32
    %28 = arith.cmpi eq, %arg1, %c1_i32 : i32
    %29 = arith.extui %28 : i1 to i32
    %c0_i32_13 = arith.constant 0 : i32
    %30 = arith.cmpi ne, %29, %c0_i32_13 : i32
    scf.if %30 {
      %c0_14 = arith.constant 0 : index
      %c0_15 = arith.constant 0 : index
      %31 = vector.load %arg8[%c0_14, %c0_15] : memref<128x128xf32, #tpu.memory_space<vmem>>, vector<128x128xf32>
      %c0_16 = arith.constant 0 : index
      %c0_17 = arith.constant 0 : index
      %32 = vector.load %arg6[%c0_16, %c0_17] : memref<1x128xf32, #tpu.memory_space<vmem>>, vector<1x128xf32>
      %33 = vector.broadcast %32 : vector<1x128xf32> to vector<128x128xf32>
      %34 = arith.addf %31, %33 : vector<128x128xf32>
      %c0_18 = arith.constant 0 : index
      %c0_19 = arith.constant 0 : index
      %35 = vector.load %arg7[%c0_18, %c0_19] : memref<128x128xf32, #tpu.memory_space<vmem>>, vector<128x128xf32>
      tpu.vector_store %arg7[%c0_18, %c0_19], %34 {strides = array<i32>} : memref<128x128xf32, #tpu.memory_space<vmem>>, vector<128x128xf32>,
    } else {
    }
    return
  }
  func.func @transform_0(%arg0: i32, %arg1: i32) -> (i32, i32) {
    %c0_i32 = arith.constant 0 : i32
    %c0_i32_0 = arith.constant 0 : i32
    return %arg0, %c0_i32 : i32, i32
  }
  func.func @transform_1(%arg0: i32, %arg1: i32) -> (i32, i32) {
    %c0_i32 = arith.constant 0 : i32
    %c0_i32_0 = arith.constant 0 : i32
    %c0_i32_1 = arith.constant 0 : i32
    return %c0_i32, %c0_i32_0 : i32, i32
  }
  func.func @transform_2(%arg0: i32, %arg1: i32) -> (i32, i32) {
    %c0_i32 = arith.constant 0 : i32
    %c0_i32_0 = arith.constant 0 : i32
    %c0_i32_1 = arith.constant 0 : i32
    return %c0_i32, %c0_i32_0 : i32, i32
  }
  func.func @transform_3(%arg0: i32, %arg1: i32) -> (i32, i32) {
    %c0_i32 = arith.constant 0 : i32
    %c0_i32_0 = arith.constant 0 : i32
    %c0_i32_1 = arith.constant 0 : i32
    return %c0_i32, %c0_i32_0 : i32, i32
  }
  func.func @transform_4(%arg0: i32, %arg1: i32) -> (i32, i32) {
    %c0_i32 = arith.constant 0 : i32
    %c0_i32_0 = arith.constant 0 : i32
    %c0_i32_1 = arith.constant 0 : i32
    return %c0_i32, %c0_i32_0 : i32, i32
  }
  func.func @transform_5(%arg0: i32, %arg1: i32) -> (i32, i32) {
    %c0_i32 = arith.constant 0 : i32
    %c0_i32_0 = arith.constant 0 : i32
    return %arg0, %c0_i32 : i32, i32
  }
}

</mosaic_0001>

<bundles_post_ra>
// kernel: tpu_custom_call.1
= control target key start
LH: loop header
LB: loop body
LE: loop exit
PB: predicated region body
PF: predicated region fallthrough
CT: control target
= control target key end

     0   :  { %s4795_s0 = inlined_call_operand.hbm [shape: bf16[256,128], index: 0, kind: input, shape index: {}]   ;;  %s4796_s1 = inlined_call_operand.hbm [shape: bf16[128,512], index: 1, kind: input, shape index: {}]   ;;  %s4797_s2 = inlined_call_operand.hbm [shape: f32[1,512], index: 2, kind: input, shape index: {}]   ;;  %s4798_s3 = inlined_call_operand.hbm [shape: bf16[512,128], index: 3, kind: input, shape index: {}]   ;;  %s4799_s4 = inlined_call_operand.vmem [shape: f32[1,128], index: 4, kind: input, shape index: {}]   ;;  %s4800_s5 = inlined_call_operand.hbm [shape: f32[256,128], index: 5, kind: output, shape index: {}]  }
   0x1   :  { %4814 = sst [smem:[#allocation43_spill]] %s4796_s1 }
   0x2   :  { %4815 = sst [smem:[#allocation44_spill]] %s4797_s2 }
   0x3   :  { %4816 = sst [smem:[#allocation45_spill]] %s4798_s3 }
   0x4   :  { %10 = vsyncpa [#allocation4], 0 }
   0x5   :  { %12 = vsyncpa [#allocation4 + $0x1], 0 }
   0x6   :  { %13 = vsyncpa [#allocation7], 0 }
   0x7   :  { %14 = vsyncpa [#allocation10], 0 }
   0x8   :  { %15 = vsyncpa [#allocation5], 0 }
   0x9   :  { %17 = vsyncpa [#allocation5 + $0x1], 0  ;;  %s3198_s18 = smov 0   ;;  %s3200_s19 = smov 0  }
   0xa   :  { %s3202_s20 = smov 0   ;;  %s3204_s21 = smov 0  }
   0xb   :  { %s3206_s22 = smov 0   ;;  %s3208_s23 = smov 0  }
   0xc   :  { %s3210_s24 = smov 0   ;;  %s3212_s25 = smov 0  }
   0xd LB: > { %4817 = sst [smem:[#allocation16_spill]] %s3148_s23  ;;  %s2489_s26 = sadd.s32 4294967295, %s3156_s25   ;;  %s3156_s25 = sphi %s3212_s25, %s23_s25   ;;  %s3152_s24 = sphi %s3210_s24, %s4944_s24   ;;  %s3148_s23 = sphi %s3208_s23, %s4939_s23   ;;  %s3144_s22 = sphi %s3206_s22, %s4943_s22   ;;  %s3140_s21 = sphi %s3204_s21, %s4938_s21   ;;  %s3136_s20 = sphi %s3202_s20, %s4942_s20   ;;  %s3132_s19 = sphi %s3200_s19, %s4941_s19   ;;  %s3128_s18 = sphi %s3198_s18, %s4940_s18  }
   0xe   : > { %s2490_s27 = sadd.s32 4294967294, %s3156_s25   ;;  %p55_p0 = scmp.ne.s32.totalorder %s3132_s19, %s3128_s18 }
   0xf   : > { %p3242_p1 = scmp.eq.s32.totalorder %s2489_s26, 0  ;;  %p3246_p2 = scmp.eq.s32.totalorder %s2489_s26, 3 }
  0x10   : > { %p169_p3 = scmp.eq.s32.totalorder %s2490_s27, 3  ;;  %p2491_p5 = scmp.ge.s32.totalorder %s3156_s25, 1 }
  0x11   : > { %p3252_p4 = por %p3242_p1, %p55_p0  ;;  %p176_p7 = scmp.lt.s32.totalorder %s3156_s25, 5 }
  0x12   : > { %p3257_p6 = por %p169_p3, %p55_p0  ;;  %s4823_s1 = sld [smem:[#allocation43_spill]] }
  0x13   : > { %p3265_p8 = pnand %p2491_p5, %p176_p7  ;;  %s3158_s11 = smov [#allocation6]  }
  0x14   : > { %s4821_s6 = scalar_select %p3257_p6, 1, 0 }
  0x15   : > { %p2765_p9 = pneg %p3265_p8  ;;  %s189_s12 = sshll.u32 %s3158_s11, 4  ;;  %s190_s12 = int_to_ptr.vmem [resolvable:$true] %s189_s12 }
  0x16   : > { %4822 = sst [smem:[#allocation17_spill]] %s4821_s6  ;;  %s3159_s17 = smov 256  }
  0x17   : > { %p3273_p10 = pnand %p2765_p9, %p3242_p1  ;;  %s4826_s2 = sld [smem:[#allocation44_spill]] }
  0x18   : > { %s187_s9 = sshll.u32 %s4823_s1, 4  ;;  %s3160_s26 = smov 16   ;;  %s188_s9 = int_to_ptr.hbm [resolvable:$true] %s187_s9 }
  0x19   : > { %2768 = dma.hbm_to_vmem [thread:$0]  (!%p3273_p10), %s188_s9, 4096, %s190_s12, [#allocation7], %s3159_s17, %s3159_s17, %s3160_s26  }
  0x1a   : > { %s3161_s27 = smov [#allocation8]   ;;  %s4827_s3 = sld [smem:[#allocation45_spill]] }
  0x1b   : > { %s204_s7 = sshll.u32 %s3161_s27, 4  ;;  %s3162_s15 = smov [#allocation9]   ;;  %s205_s7 = int_to_ptr.vmem [resolvable:$true] %s204_s7 }
  0x1c   : > { %s215_s1 = sshll.u32 %s3162_s15, 4  ;;  %s4801_s9 = smov 64   ;;  %s216_s1 = int_to_ptr.vmem [resolvable:$true] %s215_s1 }
  0x1d   : > { %s202_s16 = sshll.u32 %s4826_s2, 4  ;;  %s4802_s12 = smov 4   ;;  %s203_s16 = int_to_ptr.hbm [resolvable:$true] %s202_s16 }
  0x1e   : > { %2771 = dma.hbm_to_vmem [thread:$0]  (!%p3273_p10), %s203_s16, 64, %s205_s7, [#allocation7]  }
  0x1f   : > { %s32_s17 = sadd.s32 1, %s3148_s23  ;;  %s35_s26 = sadd.s32 1, %s3152_s24 }
  0x20   : > { %s213_s14 = sshll.u32 %s4827_s3, 4  ;;  %p33_p11 = scmp.ge.s32.totalorder %s32_s17, 2  ;;  %s214_s14 = int_to_ptr.hbm [resolvable:$true] %s213_s14 }
  0x21   : > { %2774 = dma.hbm_to_vmem [thread:$0]  (!%p3273_p10), %s214_s14, 4096, %s216_s1, [#allocation10], %s4801_s9, %s4801_s9, %s4802_s12  }
  0x22   : > { %s42_s27 = sadd.s32 1, %s3136_s20  ;;  %p49_p12 = scmp.ne.s32.totalorder %s3136_s20, %s3132_s19 }
  0x23   : > { %s4946_s17 = smov (%p33_p11, %s32_s17), 0  ;;  %s4948_s26 = smov (!%p33_p11, %s35_s26), %s3152_s24 }
  0x24   : > { %4828 = sst [smem:[#allocation18_spill]] %s4946_s17  ;;  %p50_p13 = scmp.eq.s32.totalorder %s3156_s25, 0 }
  0x25   : > { %p3303_p0 = por %p3246_p2, %p49_p12  ;;  %p37_p3 = scmp.ge.s32.totalorder %s4948_s26, 2 }
  0x26   : > { %p2786_p5 = scmp.lt.s32.totalorder %s3156_s25, 4  ;;  %p3308_p7 = por %p50_p13, %p49_p12 }
  0x27   : > { %s232_s13 = sand.u32 1, %s3136_s20   ;;  %s4950_s26 = smov (%p37_p3, %s4948_s26), 0 }
  0x28   : > { %s2496_s7 = sshll.u32 %s232_s13, 6  ;;  %s39_s8 = ssub.s32 %s3152_s24, %s4950_s26 }
  0x29   : > { %p40_p9 = scmp.eq.s32.totalorder %s39_s8, 0  ;;  %s2707_s29 = sshll.u32 %s3152_s24, 6 }
  0x2a   : > { %s241_s15 = scalar_lea.hbm %s4795_s0, %s2707_s29  ;;  %s236_s9 = scalar_lea.vmem [#allocation3], %s2496_s7 }
  0x2b   : > { %s244_s12 = sshll.u32 %s236_s9, 4  ;;  %s242_s3 = sshll.u32 %s241_s15, 4  ;;  %s245_s12 = int_to_ptr.vmem [resolvable:$true] %s244_s12  ;;  %s243_s3 = int_to_ptr.hbm [resolvable:$true] %s242_s3 }
  0x2c   : > { %s3322_s2 = scalar_select %p40_p9, %s3136_s20, %s42_s27  }
  0x2d   : > { %p2776_p2 = pnand %p2786_p5, %p3308_p7  ;;  %s233_s17 = scalar_lea.sflag [#allocation4], %s232_s13 }
  0x2e   : > { %s4831_s23 = smov 4   ;;  %s4832_s6 = smov 64  }
  0x2f   : > { %2778 = dma.hbm_to_vmem [thread:$0]  (!%p2776_p2), %s243_s3, 1024, %s245_s12, %s233_s17, %s4832_s6, %s4832_s6, %s4831_s23  }
  0x30   : > { %256 = sbr.rel (%p3265_p8) target bundleno = 804 (0x324), region = 40 }
  0x35   : > { %s3334_s7 = sand.u32 1, %s3132_s19  }
  0x36   : > { %s2500_s9 = sshll.u32 %s3334_s7, 6  ;;  %s259_s27 = scalar_lea.sflag [#allocation4], %s3334_s7 }
  0x37   : > { %s3338_s8 = scalar_lea.vmem [#allocation3], %s2500_s9 }
  0x38   : > { %3111 = dma.done.wait (%p3252_p4), %s259_s27, 1024  }
  0x39   : > { %3113 = vsyncadd (%p3252_p4), %s259_s27, 4294966272 }
  0x3a   : > { %3115 = dma.done.wait (%p3242_p1), [#allocation7], 4160  }
  0x3b   : > { %3117 = vsyncadd (%p3242_p1), [#allocation7], 4294963136 }
  0x3c   : > { %3119 = dma.done.wait (%p3242_p1), [#allocation10], 4096  }
  0x3d   : > { %3121 = vsyncadd (%p3242_p1), [#allocation10], 4294963200  ;;  %s2504_s3 = sshll.u32 %s3334_s7, 7  ;;  %p2505_p8 = scmp.ne.s32.totalorder %s3140_s21, 0 }
  0x3e   : > { %s3353_s23 = scalar_lea.vmem [#allocation11], %s2504_s3 }
  0x3f   : > { %310 = sbr.rel (%p2505_p8) target bundleno = 85 (0x55), region = 60 }
  0x44   : > { %v3165_v0 = vmov 0.0  }
  0x45   : > { %311 = vst [vmem:[#allocation2 + $0x30] sm:$0xff] %v3165_v0 }
  0x46   : > { %312 = vst [vmem:[#allocation2] sm:$0xff] %v3165_v0 }
  0x47   : > { %313 = vst [vmem:[#allocation2 + $0x58] sm:$0xff] %v3165_v0 }
  0x48   : > { %314 = vst [vmem:[#allocation2 + $0x18] sm:$0xff] %v3165_v0 }
  0x49   : > { %315 = vst [vmem:[#allocation2 + $0x50] sm:$0xff] %v3165_v0 }
  0x4a   : > { %316 = vst [vmem:[#allocation2 + $0x68] sm:$0xff] %v3165_v0 }
  0x4b   : > { %317 = vst [vmem:[#allocation2 + $0x8] sm:$0xff] %v3165_v0 }
  0x4c   : > { %318 = vst [vmem:[#allocation2 + $0x48] sm:$0xff] %v3165_v0 }
  0x4d   : > { %319 = vst [vmem:[#allocation2 + $0x40] sm:$0xff] %v3165_v0 }
  0x4e   : > { %320 = vst [vmem:[#allocation2 + $0x20] sm:$0xff] %v3165_v0 }
  0x4f   : > { %321 = vst [vmem:[#allocation2 + $0x10] sm:$0xff] %v3165_v0 }
  0x50   : > { %322 = vst [vmem:[#allocation2 + $0x38] sm:$0xff] %v3165_v0 }
  0x51   : > { %323 = vst [vmem:[#allocation2 + $0x60] sm:$0xff] %v3165_v0 }
  0x52   : > { %324 = vst [vmem:[#allocation2 + $0x70] sm:$0xff] %v3165_v0 }
  0x53   : > { %325 = vst [vmem:[#allocation2 + $0x78] sm:$0xff] %v3165_v0 }
  0x54   : > { %326 = vst [vmem:[#allocation2 + $0x28] sm:$0xff] %v3165_v0 }
  0x55 PF: > { %s2506_s28 = sshll.u32 %s3140_s21, 8  ;;  %v2740_v49 = vld [vmem:[%s3338_s8] sm:$0xff]  ;;  %v2741_v50 = vld [vmem:[%s3338_s8 + $0x8] sm:$0xff]  ;;  %v2742_v51 = vld [vmem:[%s3338_s8 + $0x10] sm:$0xff]  ;;  %p2701_p1 = scmp.ne.s32.totalorder %s3140_s21, 1 }
  0x56   : > { %s3359_s30 = sshra.s32 %s2506_s28, 7  ;;  %v2743_v52 = vld [vmem:[%s3338_s8 + $0x18] sm:$0xff]  ;;  %v2744_v53 = vld [vmem:[%s3338_s8 + $0x20] sm:$0xff]  ;;  %v2745_v54 = vld [vmem:[%s3338_s8 + $0x28] sm:$0xff]  ;;  %s350_s12 = sshra.s32 %s2506_s28, 3 }
  0x57   : > { %s2507_s6 = sshll.u32 %s3359_s30, 2  ;;  %v2746_v55 = vld [vmem:[%s3338_s8 + $0x30] sm:$0xff]  ;;  %v2747_v56 = vld [vmem:[%s3338_s8 + $0x38] sm:$0xff]  ;;  %s348_s17 = scalar_lea.vmem [#allocation8], %s3359_s30 }
  0x58   : > { %s3362_s10 = scalar_lea.vmem [#allocation6], %s2507_s6  ;;  %v349_v57 = vld [vmem:[%s348_s17] sm:$0x3]  ;;  %s2508_s1 = sshll.u32 %s350_s12, 2 }
  0x59   : > { %v2599_v1 = vld [vmem:[%s3362_s10 + $0xe0] sm:$0xf]  ;;  %v2723_v2 = vld [vmem:[%s3362_s10 + $0xec] sm:$0xf0]  ;;  %v2722_v3 = vld [vmem:[%s3362_s10 + $0xe4] sm:$0xf] }
  0x5a   : > { %v2600_v4 = vor.u32 %v2723_v2, %v2599_v1  ;;  %v2601_v5 = vld [vmem:[%s3362_s10 + $0xf0] sm:$0xf0]  ;;  %v2591_v6 = vld [vmem:[%s3362_s10 + $0xc0] sm:$0xf]  ;;  %v2721_v7 = vld [vmem:[%s3362_s10 + $0xcc] sm:$0xf0] }
  0x5b   : > { %v2604_v8 = vor.u32 %v2722_v3, %v2601_v5  ;;  %v2720_v9 = vld [vmem:[%s3362_s10 + $0xc4] sm:$0xf]  ;;  %v2593_v10 = vld [vmem:[%s3362_s10 + $0xd0] sm:$0xf0]  ;;  %v2592_v11 = vor.u32 %v2721_v7, %v2591_v6  ;;  %v2583_v13 = vld [vmem:[%s3362_s10 + $0xa0] sm:$0xf] }
  0x5c   : > { %535 = vmatpush.bf16.msra.mxu0 %v2600_v4  ;;  %v2596_v12 = vor.u32 %v2720_v9, %v2593_v10  ;;  %v2719_v14 = vld [vmem:[%s3362_s10 + $0xac] sm:$0xf0]  ;;  %v2718_v15 = vld [vmem:[%s3362_s10 + $0xa4] sm:$0xf]  ;;  %v2585_v16 = vld [vmem:[%s3362_s10 + $0xb0] sm:$0xf0] }
  0x5d   : > { %584 = vmatpush.bf16.msra.mxu1 %v2604_v8  ;;  %v2584_v17 = vor.u32 %v2719_v14, %v2583_v13  ;;  %v2588_v18 = vor.u32 %v2718_v15, %v2585_v16  ;;  %v2575_v19 = vld [vmem:[%s3362_s10 + $0x80] sm:$0xf]  ;;  %v2717_v20 = vld [vmem:[%s3362_s10 + $0x8c] sm:$0xf0]  ;;  %v2716_v21 = vld [vmem:[%s3362_s10 + $0x84] sm:$0xf] }
  0x5e   : > { %v2577_v22 = vld [vmem:[%s3362_s10 + $0x90] sm:$0xf0]  ;;  %v2576_v23 = vor.u32 %v2717_v20, %v2575_v19  ;;  %v2567_v25 = vld [vmem:[%s3362_s10 + $0x60] sm:$0xf]  ;;  %v2715_v26 = vld [vmem:[%s3362_s10 + $0x6c] sm:$0xf0] }
  0x5f   : > { %v2580_v24 = vor.u32 %v2716_v21, %v2577_v22  ;;  %v2714_v27 = vld [vmem:[%s3362_s10 + $0x64] sm:$0xf]  ;;  %v2569_v28 = vld [vmem:[%s3362_s10 + $0x70] sm:$0xf0]  ;;  %v2568_v29 = vor.u32 %v2715_v26, %v2567_v25  ;;  %v2559_v31 = vld [vmem:[%s3362_s10 + $0x40] sm:$0xf] }
  0x60   : > { %536 = vmatpush.bf16.msra.mxu0 %v2592_v11  ;;  %v2572_v30 = vor.u32 %v2714_v27, %v2569_v28  ;;  %v2713_v32 = vld [vmem:[%s3362_s10 + $0x4c] sm:$0xf0]  ;;  %v2712_v33 = vld [vmem:[%s3362_s10 + $0x44] sm:$0xf]  ;;  %v2561_v34 = vld [vmem:[%s3362_s10 + $0x50] sm:$0xf0] }
  0x61   : > { %585 = vmatpush.bf16.msra.mxu1 %v2596_v12  ;;  %v2560_v35 = vor.u32 %v2713_v32, %v2559_v31  ;;  %v2564_v36 = vor.u32 %v2712_v33, %v2561_v34  ;;  %v2551_v37 = vld [vmem:[%s3362_s10 + $0x20] sm:$0xf]  ;;  %v2711_v38 = vld [vmem:[%s3362_s10 + $0x2c] sm:$0xf0]  ;;  %v2710_v39 = vld [vmem:[%s3362_s10 + $0x24] sm:$0xf] }
  0x62   : > { %v2553_v40 = vld [vmem:[%s3362_s10 + $0x30] sm:$0xf0]  ;;  %v2552_v41 = vor.u32 %v2711_v38, %v2551_v37  ;;  %v2543_v43 = vld [vmem:[%s3362_s10] sm:$0xf]  ;;  %v2709_v44 = vld [vmem:[%s3362_s10 + $0xc] sm:$0xf0] }
  0x63   : > { %v2556_v42 = vor.u32 %v2710_v39, %v2553_v40  ;;  %v2708_v45 = vld [vmem:[%s3362_s10 + $0x4] sm:$0xf]  ;;  %v2545_v46 = vld [vmem:[%s3362_s10 + $0x10] sm:$0xf0]  ;;  %v2544_v47 = vor.u32 %v2709_v44, %v2543_v43  ;;  %v3407_v58 = vperm.slane %v349_v57, 0  ;;  %v3409_v60 = vperm.slane %v349_v57, 1 }
  0x64   : > { %537 = vmatpush.bf16.msra.mxu0 %v2584_v17  ;;  %v2548_v48 = vor.u32 %v2708_v45, %v2545_v46  ;;  %s3411_s13 = scalar_lea.vmem [#allocation9], %s2508_s1 }
  0x65   : > { %586 = vmatpush.bf16.msra.mxu1 %v2588_v18  ;;  %v2731_v62 = vld [vmem:[%s3411_s13 + $0x38] sm:$0xff]  ;;  %v2730_v2 = vld [vmem:[%s3411_s13 + $0x30] sm:$0xff]  ;;  %v2729_v11 = vld [vmem:[%s3411_s13 + $0x28] sm:$0xff] }
  0x66   : > { %v2739_v63 = vld [vmem:[%s3411_s13 + $0x78] sm:$0xff]  ;;  %2169 = vmatpush.bf16.msra.mxu2 %v2731_v62  ;;  %v2738_v3 = vld [vmem:[%s3411_s13 + $0x70] sm:$0xff]  ;;  %v2737_v14 = vld [vmem:[%s3411_s13 + $0x68] sm:$0xff] }
  0x67   : > { %2218 = vmatpush.bf16.msra.mxu3 %v2739_v63  ;;  %v2728_v18 = vld [vmem:[%s3411_s13 + $0x20] sm:$0xff]  ;;  %v2726_v37 = vld [vmem:[%s3411_s13 + $0x10] sm:$0xff] }
  0x68   : > { %538 = vmatpush.bf16.msra.mxu0 %v2576_v23  ;;  %v2736_v19 = vld [vmem:[%s3411_s13 + $0x60] sm:$0xff] }
  0x69   : > { %587 = vmatpush.bf16.msra.mxu1 %v2580_v24 }
  0x6a   : > { %2170 = vmatpush.bf16.msra.mxu2 %v2730_v2 }
  0x6b   : > { %2219 = vmatpush.bf16.msra.mxu3 %v2738_v3 }
  0x6c   : > { %539 = vmatpush.bf16.msra.mxu0 %v2568_v29  ;;  %v2727_v29 = vld [vmem:[%s3411_s13 + $0x18] sm:$0xff] }
  0x6d   : > { %588 = vmatpush.bf16.msra.mxu1 %v2572_v30  ;;  %v2735_v30 = vld [vmem:[%s3411_s13 + $0x58] sm:$0xff] }
  0x6e   : > { %2171 = vmatpush.bf16.msra.mxu2 %v2729_v11 }
  0x6f   : > { %2220 = vmatpush.bf16.msra.mxu3 %v2737_v14 }
  0x70   : > { %540 = vmatpush.bf16.msra.mxu0 %v2560_v35 }
  0x71   : > { %589 = vmatpush.bf16.msra.mxu1 %v2564_v36 }
  0x72   : > { %2172 = vmatpush.bf16.msra.mxu2 %v2728_v18 }
  0x73   : > { %2221 = vmatpush.bf16.msra.mxu3 %v2736_v19 }
  0x74   : > { %541 = vmatpush.bf16.msra.mxu0 %v2552_v41  ;;  %v2734_v41 = vld [vmem:[%s3411_s13 + $0x50] sm:$0xff] }
  0x75   : > { %590 = vmatpush.bf16.msra.mxu1 %v2556_v42 }
  0x76   : > { %2173 = vmatpush.bf16.msra.mxu2 %v2727_v29 }
  0x77   : > { %2222 = vmatpush.bf16.msra.mxu3 %v2735_v30 }
  0x78   : > { %542 = vmatpush.bf16.msra.mxu0 %v2544_v47 }
  0x79   : > { %591 = vmatpush.bf16.msra.mxu1 %v2548_v48 }
  0x7a   : > { %2174 = vmatpush.bf16.msra.mxu2 %v2726_v37 }
  0x7b   : > { %543 = vmatmul.bf16.vlgmr.msra.gmra.mxu0 %v2740_v49  ;;  %2223 = vmatpush.bf16.msra.mxu3 %v2734_v41 }
  0x7c   : > { %592 = vmatmul.bf16.vlgmr.msra.gmra.mxu1 %v2740_v49 }
  0x8b   : > { %548 = vmatmul.bf16.gmra.mxu0 %v2741_v50 }
  0x8c   : > { %597 = vmatmul.bf16.gmra.mxu1 %v2741_v50  ;;  %v2725_v50 = vld [vmem:[%s3411_s13 + $0x8] sm:$0xff] }
  0x8d   : > { %2175 = vmatpush.bf16.msra.mxu2 %v2725_v50 }
  0x9b   : > { %553 = vmatmul.bf16.gmra.mxu0 %v2742_v51 }
  0x9c   : > { %602 = vmatmul.bf16.gmra.mxu1 %v2742_v51  ;;  %v2733_v51 = vld [vmem:[%s3411_s13 + $0x48] sm:$0xff] }
  0x9d   : > { %2224 = vmatpush.bf16.msra.mxu3 %v2733_v51 }
  0xab   : > { %558 = vmatmul.bf16.gmra.mxu0 %v2743_v52 }
  0xac   : > { %607 = vmatmul.bf16.gmra.mxu1 %v2743_v52 }
  0xbb   : > { %563 = vmatmul.bf16.gmra.mxu0 %v2744_v53 }
  0xbc   : > { %612 = vmatmul.bf16.gmra.mxu1 %v2744_v53 }
  0xcb   : > { %568 = vmatmul.bf16.gmra.mxu0 %v2745_v54 }
  0xcc   : > { %617 = vmatmul.bf16.gmra.mxu1 %v2745_v54 }
  0xdb   : > { %573 = vmatmul.bf16.gmra.mxu0 %v2746_v55 }
  0xdc   : > { %622 = vmatmul.bf16.gmra.mxu1 %v2746_v55 }
  0xeb   : > { %578 = vmatmul.bf16.gmra.mxu0 %v2747_v56 }
  0xec   : > { %627 = vmatmul.bf16.gmra.mxu1 %v2747_v56 }
  0xf8   : > { %v544_v59 = vpop.f32.mrf.mxu0 }
  0xf9   : > { %v593_v61 = vpop.f32.mrf.mxu1  ;;  %v3416_v0 = vadd.f32 %v544_v59, %v3407_v58 }
  0xfa   : > { %v3419_v1 = vadd.f32 %v593_v61, %v3409_v60 }
  0xfb   : > { %v3424_v4 = vmul.f32 0.70710677, %v3416_v0 }
  0xfc   : > { %v3427_v6 = vmul.f32 0.70710677, %v3419_v1 }
  0xfd   : > { %v697_v10 = vmul.f32 %v3424_v4, %v3424_v4 }
  0xfe   : > { %v737_v12 = vmul.f32 %v3427_v6, %v3427_v6 }
  0xff   : > { %v3447_v16 = vmin.f32 %v697_v10, 16.0  ;;  %v2732_v10 = vld [vmem:[%s3411_s13 + $0x40] sm:$0xff] }
 0x100   : > { %v546_v5 = vpop.f32.mrf.mxu0  ;;  %v3451_v20 = vmin.f32 %v737_v12, 16.0  ;;  %2225 = vmatpush.bf16.msra.mxu3 %v2732_v10  ;;  %v3559_v10 = vmul.f32 0.5, %v3416_v0 }
 0x101   : > { %v3430_v7 = vadd.f32 %v546_v5, %v3407_v58  ;;  %v595_v8 = vpop.f32.mrf.mxu1  ;;  %v699_v25 = vmul.f32 2.1237322e-06, %v3447_v16  ;;  %v710_v33 = vmul.f32 3.8918573e-05, %v3447_v16 }
 0x102   : > { %v3433_v9 = vadd.f32 %v595_v8, %v3409_v60  ;;  %v739_v27 = vmul.f32 2.1237322e-06, %v3451_v20  ;;  %v2724_v8 = vld [vmem:[%s3411_s13] sm:$0xff] }
 0x103   : > { %v3441_v13 = vmul.f32 0.70710677, %v3430_v7  ;;  %v700_v34 = vadd.f32 0.00028619796, %v699_v25  ;;  %v711_v52 = vadd.f32 0.001143296, %v710_v33  ;;  %2176 = vmatpush.bf16.msra.mxu2 %v2724_v8 }
 0x104   : > { %v3445_v15 = vmul.f32 0.70710677, %v3433_v9  ;;  %v740_v38 = vadd.f32 0.00028619796, %v739_v27 }
 0x105   : > { %v777_v21 = vmul.f32 %v3441_v13, %v3441_v13  ;;  %v701_v46 = vmul.f32 %v700_v34, %v3447_v16  ;;  %v712_v11 = vmul.f32 %v711_v52, %v3447_v16 }
 0x106   : > { %v817_v23 = vmul.f32 %v3445_v15, %v3445_v15  ;;  %v741_v48 = vmul.f32 %v740_v38, %v3451_v20 }
 0x107   : > { %v3465_v28 = vmin.f32 %v777_v21, 16.0  ;;  %v702_v57 = vadd.f32 0.0036580483, %v701_v46  ;;  %v713_v29 = vadd.f32 0.014752088, %v712_v11 }
 0x108   : > { %v549_v17 = vpop.f32.mrf.mxu0  ;;  %v3469_v31 = vmin.f32 %v817_v23, 16.0  ;;  %v742_v63 = vadd.f32 0.0036580483, %v741_v48 }
 0x109   : > { %v598_v22 = vpop.f32.mrf.mxu1  ;;  %v3458_v24 = vadd.f32 %v549_v17, %v3407_v58  ;;  %v779_v39 = vmul.f32 2.1237322e-06, %v3465_v28  ;;  %v714_v52 = vmul.f32 %v713_v29, %v3447_v16 }
 0x10a   : > { %v3462_v26 = vadd.f32 %v598_v22, %v3409_v60  ;;  %v819_v42 = vmul.f32 2.1237322e-06, %v3469_v31  ;;  %v703_v22 = vmul.f32 %v702_v57, %v3447_v16  ;;  %v743_v25 = vmul.f32 %v742_v63, %v3451_v20 }
 0x10b   : > { %v3472_v32 = vmul.f32 0.70710677, %v3458_v24  ;;  %v780_v49 = vadd.f32 0.00028619796, %v779_v39 }
 0x10c   : > { %v3476_v35 = vmul.f32 0.70710677, %v3462_v26  ;;  %v820_v53 = vadd.f32 0.00028619796, %v819_v42 }
 0x10d   : > { %v857_v43 = vmul.f32 %v3472_v32, %v3472_v32  ;;  %v781_v12 = vmul.f32 %v780_v49, %v3465_v28 }
 0x10e   : > { %v897_v47 = vmul.f32 %v3476_v35, %v3476_v35  ;;  %v821_v14 = vmul.f32 %v820_v53, %v3469_v31 }
 0x10f   : > { %v3496_v54 = vmin.f32 %v857_v43, 16.0  ;;  %v782_v30 = vadd.f32 0.0036580483, %v781_v12  ;;  %v744_v43 = vadd.f32 0.05243302, %v743_v25 }
 0x110   : > { %v551_v36 = vpop.f32.mrf.mxu0  ;;  %v3504_v59 = vmin.f32 %v897_v47, 16.0  ;;  %v822_v33 = vadd.f32 0.0036580483, %v821_v14  ;;  %v715_v25 = vadd.f32 0.112945676, %v714_v52 }
 0x111   : > { %v600_v40 = vpop.f32.mrf.mxu1  ;;  %v3485_v44 = vadd.f32 %v551_v36, %v3407_v58  ;;  %v859_v17 = vmul.f32 2.1237322e-06, %v3496_v54  ;;  %v783_v49 = vmul.f32 %v782_v30, %v3465_v28  ;;  %v745_v11 = vmul.f32 %v744_v43, %v3451_v20 }
 0x112   : > { %v3488_v45 = vadd.f32 %v600_v40, %v3409_v60  ;;  %v899_v23 = vmul.f32 2.1237322e-06, %v3504_v59  ;;  %v704_v40 = vadd.f32 0.05243302, %v703_v22  ;;  %v823_v53 = vmul.f32 %v822_v33, %v3469_v31 }
 0x113   : > { %v3499_v55 = vmul.f32 0.70710677, %v3485_v44  ;;  %v860_v34 = vadd.f32 0.00028619796, %v859_v17  ;;  %v3567_v17 = vmul.f32 0.5, %v3419_v1  ;;  %v3570_v22 = vmul.f32 0.5, %v3430_v7 }
 0x114   : > { %v3502_v56 = vmul.f32 0.70710677, %v3488_v45  ;;  %v900_v41 = vadd.f32 0.00028619796, %v899_v23  ;;  %v705_v63 = vmul.f32 %v704_v40, %v3447_v16  ;;  %v784_v29 = vadd.f32 0.05243302, %v783_v49 }
 0x115   : > { %v937_v61 = vmul.f32 %v3499_v55, %v3499_v55  ;;  %v861_v50 = vmul.f32 %v860_v34, %v3496_v54  ;;  %v824_v30 = vadd.f32 0.05243302, %v823_v53  ;;  %v746_v1 = vadd.f32 0.18741608, %v745_v11 }
 0x116   : > { %v977_v2 = vmul.f32 %v3502_v56, %v3502_v56  ;;  %v706_v34 = vadd.f32 0.18741608, %v705_v63  ;;  %v785_v49 = vmul.f32 %v784_v29, %v3465_v28 }
 0x117   : > { %v3519_v18 = vmin.f32 %v937_v61, 16.0  ;;  %v862_v23 = vadd.f32 0.0036580483, %v861_v50  ;;  %v825_v50 = vmul.f32 %v824_v30, %v3469_v31  ;;  %v747_v11 = vmul.f32 %v746_v1, %v3451_v20 }
 0x118   : > { %v554_v62 = vpop.f32.mrf.mxu0  ;;  %v3521_v19 = vmin.f32 %v977_v2, 16.0  ;;  %v901_v2 = vmul.f32 %v900_v41, %v3504_v59 }
 0x119   : > { %v3511_v3 = vadd.f32 %v554_v62, %v3407_v58  ;;  %v603_v5 = vpop.f32.mrf.mxu1  ;;  %v939_v36 = vmul.f32 2.1237322e-06, %v3519_v18  ;;  %v863_v43 = vmul.f32 %v862_v23, %v3496_v54 }
 0x11a   : > { %v3524_v21 = vadd.f32 %v603_v5, %v3409_v60  ;;  %v979_v37 = vmul.f32 2.1237322e-06, %v3521_v19 }
 0x11b   : > { %v3530_v27 = vmul.f32 0.70710677, %v3511_v3  ;;  %v940_v57 = vadd.f32 0.00028619796, %v939_v36  ;;  %v902_v36 = vadd.f32 0.0036580483, %v901_v2 }
 0x11c   : > { %v3537_v39 = vmul.f32 0.70710677, %v3524_v21  ;;  %v980_v61 = vadd.f32 0.00028619796, %v979_v37 }
 0x11d   : > { %v1017_v38 = vmul.f32 %v3530_v27, %v3530_v27  ;;  %v941_v0 = vmul.f32 %v940_v57, %v3519_v18 }
 0x11e   : > { %v1057_v47 = vmul.f32 %v3537_v39, %v3537_v39  ;;  %v981_v33 = vmul.f32 %v980_v61, %v3521_v19  ;;  %v3590_v61 = vmul.f32 0.5, %v3458_v24 }
 0x11f   : > { %v3539_v46 = vmin.f32 %v1017_v38, 16.0  ;;  %v942_v52 = vadd.f32 0.0036580483, %v941_v0  ;;  %v786_v0 = vadd.f32 0.18741608, %v785_v49 }
 0x120   : > { %v556_v42 = vpop.f32.mrf.mxu0  ;;  %v3550_v62 = vmin.f32 %v1057_v47, 16.0  ;;  %v982_v53 = vadd.f32 0.0036580483, %v981_v33  ;;  %4835 = vst [vmem:[#allocation21_spill] sm:$0xff] %v3590_v61  ;;  %v826_v33 = vadd.f32 0.18741608, %v825_v50 }
 0x121   : > { %v605_v48 = vpop.f32.mrf.mxu1  ;;  %v3546_v51 = vadd.f32 %v556_v42, %v3407_v58  ;;  %v1019_v5 = vmul.f32 2.1237322e-06, %v3539_v46  ;;  %v3580_v42 = vmul.f32 0.5, %v3433_v9  ;;  %v903_v9 = vmul.f32 %v902_v36, %v3504_v59 }
 0x122   : > { %4833 = vst [vmem:[#allocation19_spill] sm:$0xff] %v3550_v62  ;;  %v1059_v12 = vmul.f32 2.1237322e-06, %v3550_v62  ;;  %v3564_v14 = vadd.f32 %v605_v48, %v3409_v60  ;;  %v716_v48 = vmul.f32 %v715_v25, %v3447_v16  ;;  %v864_v25 = vadd.f32 0.05243302, %v863_v43 }
 0x123   : > { %v3556_v8 = vmul.f32 0.70710677, %v3546_v51  ;;  %v1020_v37 = vadd.f32 0.00028619796, %v1019_v5  ;;  %v707_v5 = vmul.f32 %v706_v34, %v3447_v16  ;;  %v943_v36 = vmul.f32 %v942_v52, %v3519_v18 }
 0x124   : > { %v1060_v41 = vadd.f32 0.00028619796, %v1059_v12  ;;  %v3577_v7 = vmul.f32 0.70710677, %v3564_v14  ;;  %v717_v30 = vadd.f32 0.4994258, %v716_v48  ;;  %v983_v34 = vmul.f32 %v982_v53, %v3521_v19 }
 0x125   : > { %v1097_v38 = vmul.f32 %v3556_v8, %v3556_v8  ;;  %v1021_v63 = vmul.f32 %v1020_v37, %v3539_v46  ;;  %v904_v37 = vadd.f32 0.05243302, %v903_v9  ;;  %v708_v1 = vadd.f32 1.1283791, %v707_v5 }
 0x126   : > { %4834 = vst [vmem:[#allocation20_spill] sm:$0xff] %v3577_v7  ;;  %v1061_v12 = vmul.f32 %v1060_v41, %v3550_v62  ;;  %v1137_v23 = vmul.f32 %v3577_v7, %v3577_v7  ;;  %v3611_v41 = vmul.f32 0.5, %v3462_v26  ;;  %v718_v52 = vmul.f32 %v717_v30, %v3447_v16 }
 0x127   : > { %v3594_v2 = vmin.f32 %v1097_v38, 16.0  ;;  %v1022_v38 = vadd.f32 0.0036580483, %v1021_v63  ;;  %v748_v53 = vadd.f32 1.1283791, %v747_v11  ;;  %v787_v9 = vmul.f32 %v786_v0, %v3465_v28 }
 0x128   : > { %v559_v40 = vpop.f32.mrf.mxu0  ;;  %4837 = vst [vmem:[#allocation23_spill] sm:$0xff] %v3611_v41  ;;  %v1062_v43 = vadd.f32 0.0036580483, %v1061_v12  ;;  %v3613_v61 = vmin.f32 %v1137_v23, 16.0  ;;  %v944_v63 = vadd.f32 0.05243302, %v943_v36  ;;  %v827_v5 = vmul.f32 %v826_v33, %v3469_v31 }
 0x129   : > { %v3584_v47 = vadd.f32 %v559_v40, %v3407_v58  ;;  %v608_v57 = vpop.f32.mrf.mxu1  ;;  %v1099_v40 = vmul.f32 2.1237322e-06, %v3594_v2  ;;  %v984_v26 = vadd.f32 0.05243302, %v983_v34  ;;  %v905_v12 = vmul.f32 %v904_v37, %v3504_v59 }
 0x12a   : > { %v3605_v24 = vadd.f32 %v608_v57, %v3409_v60  ;;  %v865_v57 = vmul.f32 %v864_v25, %v3496_v54  ;;  %v1023_v23 = vmul.f32 %v1022_v38, %v3539_v46  ;;  %v3627_v41 = vmul.f32 %v708_v1, %v3424_v4 }
 0x12b   : > { %v3602_v29 = vmul.f32 0.70710677, %v3584_v47  ;;  %v1100_v25 = vadd.f32 0.00028619796, %v1099_v40  ;;  %v1139_v7 = vmul.f32 2.1237322e-06, %v3613_v61  ;;  %v945_v4 = vmul.f32 %v944_v63, %v3519_v18 }
 0x12c   : > { %v3619_v49 = vmul.f32 0.70710677, %v3605_v24  ;;  %v866_v11 = vadd.f32 0.18741608, %v865_v57  ;;  %v3638_v33 = vadd.f32 1.0, %v718_v52  ;;  %v3641_v34 = vmul.f32 0.5, %v3485_v44 }
 0x12d   : > { %4836 = vst [vmem:[#allocation22_spill] sm:$0xff] %v3602_v29  ;;  %v1177_v48 = vmul.f32 %v3602_v29, %v3602_v29  ;;  %v1063_v29 = vmul.f32 %v1062_v43, %v3550_v62  ;;  %v788_v36 = vadd.f32 1.1283791, %v787_v9  ;;  %v985_v37 = vmul.f32 %v984_v26, %v3521_v19 }
 0x12e   : > { %v1217_v0 = vmul.f32 %v3619_v49, %v3619_v49  ;;  %4838 = vst [vmem:[#allocation24_spill] sm:$0xff] %v3641_v34  ;;  %v828_v38 = vadd.f32 1.1283791, %v827_v5  ;;  %v906_v40 = vadd.f32 0.18741608, %v905_v12  ;;  %v1101_v43 = vmul.f32 %v1100_v25, %v3594_v2 }
 0x12f   : > { %v3634_v30 = vmin.f32 %v1177_v48, 16.0  ;;  %v1024_v1 = vadd.f32 0.05243302, %v1023_v23  ;;  %v3647_v48 = vmul.f32 %v748_v53, %v3427_v6  ;;  %v1140_v52 = vadd.f32 0.00028619796, %v1139_v7 }
 0x130   : > { %v561_v50 = vpop.f32.mrf.mxu0  ;;  %v867_v44 = vmul.f32 %v866_v11, %v3496_v54  ;;  %v3654_v34 = vmin.f32 %v1217_v0, 16.0  ;;  %2865 = vrcp.f32 %v3638_v33  ;;  %v946_v26 = vadd.f32 0.18741608, %v945_v4 }
 0x131   : > { %v3632_v16 = vadd.f32 %v561_v50, %v3407_v58  ;;  %v610_v57 = vpop.f32.mrf.mxu1  ;;  %v1064_v50 = vadd.f32 0.05243302, %v1063_v29  ;;  %v1179_v63 = vmul.f32 2.1237322e-06, %v3634_v30  ;;  %v3658_v5 = vmul.f32 0.5, %v3488_v45 }
 0x132   : > { %v986_v12 = vadd.f32 0.18741608, %v985_v37  ;;  %v3661_v6 = vadd.f32 %v610_v57, %v3409_v60  ;;  %v907_v7 = vmul.f32 %v906_v40, %v3504_v59  ;;  %v3665_v29 = vmul.f32 0.5, %v3511_v3 }
 0x133   : > { %v3650_v9 = vmul.f32 0.70710677, %v3632_v16  ;;  %4839 = vst [vmem:[#allocation25_spill] sm:$0xff] %v3658_v5  ;;  %v1025_v53 = vmul.f32 %v1024_v1, %v3539_v46  ;;  %v1102_v23 = vadd.f32 0.0036580483, %v1101_v43  ;;  %v3669_v25 = vmul.f32 %v788_v36, %v3441_v13 }
 0x134   : > { %4840 = vst [vmem:[#allocation26_spill] sm:$0xff] %v3665_v29  ;;  %v1065_v11 = vmul.f32 %v1064_v50, %v3550_v62  ;;  %v1141_v45 = vmul.f32 %v1140_v52, %v3613_v61  ;;  %v3676_v4 = vmul.f32 %v828_v38, %v3445_v15  ;;  %v868_v37 = vadd.f32 1.1283791, %v867_v44 }
 0x135   : > { %v1257_v0 = vmul.f32 %v3650_v9, %v3650_v9  ;;  %v1180_v40 = vadd.f32 0.00028619796, %v1179_v63  ;;  %v1219_v3 = vmul.f32 2.1237322e-06, %v3654_v34  ;;  %v947_v1 = vmul.f32 %v946_v26, %v3519_v18 }
 0x136   : > { %v987_v13 = vmul.f32 %v986_v12, %v3521_v19  ;;  %v3682_v36 = vmul.f32 0.5, %v3524_v21  ;;  %v3685_v43 = vmul.f32 0.70710677, %v3661_v6  ;;  %v3687_v50 = vpop.eup %2865  ;;  %v908_v52 = vadd.f32 1.1283791, %v907_v7 }
 0x137   : > { %v1026_v15 = vadd.f32 0.18741608, %v1025_v53  ;;  %v1103_v38 = vmul.f32 %v1102_v23, %v3594_v2  ;;  %v790_v44 = vmul.f32 3.8918573e-05, %v3465_v28  ;;  %v1066_v63 = vadd.f32 0.18741608, %v1065_v11 }
 0x138   : > { %v564_v57 = vpop.f32.mrf.mxu0  ;;  %4841 = vst [vmem:[#allocation27_spill] sm:$0xff] %v3682_v36  ;;  %v1142_v29 = vadd.f32 0.0036580483, %v1141_v45  ;;  %v3691_v5 = vmin.f32 %v1257_v0, 16.0  ;;  %v3697_v21 = vmul.f32 %v868_v37, %v3472_v32  ;;  %v3700_v12 = vmul.f32 0.5, %v3546_v51 }
 0x139   : > { %v3694_v26 = vadd.f32 %v564_v57, %v3407_v58  ;;  %v1181_v7 = vmul.f32 %v1180_v40, %v3634_v30  ;;  %v1220_v53 = vadd.f32 0.00028619796, %v1219_v3  ;;  %v948_v36 = vadd.f32 1.1283791, %v947_v1 }
 0x13a   : > { %4842 = vst [vmem:[#allocation28_spill] sm:$0xff] %v3697_v21  ;;  %v988_v23 = vadd.f32 1.1283791, %v987_v13  ;;  %v1297_v11 = vmul.f32 %v3685_v43, %v3685_v43  ;;  %v721_v45 = vmul.f32 %v3687_v50, %v3638_v33  ;;  %v3708_v0 = vmul.f32 %v908_v52, %v3476_v35 }
 0x13b   : > { %4843 = vst [vmem:[#allocation29_spill] sm:$0xff] %v3700_v12  ;;  %v1027_v32 = vmul.f32 %v1026_v15, %v3539_v46  ;;  %v1104_v37 = vadd.f32 0.05243302, %v1103_v38  ;;  %v3712_v51 = vmul.f32 0.5, %v3564_v14  ;;  %v1067_v40 = vmul.f32 %v1066_v63, %v3550_v62 }
 0x13c   : > { %4844 = vst [vmem:[#allocation30_spill] sm:$0xff] %v3708_v0  ;;  %v1143_v3 = vmul.f32 %v1142_v29, %v3613_v61  ;;  %v1259_v57 = vmul.f32 2.1237322e-06, %v3691_v5  ;;  %v3718_v1 = vmul.f32 0.70710677, %v3694_v26  ;;  %v3721_v13 = vmul.f32 0.5, %v3584_v47 }
 0x13d   : > { %4845 = vst [vmem:[#allocation31_spill] sm:$0xff] %v3712_v51  ;;  %v1182_v35 = vadd.f32 0.0036580483, %v1181_v7  ;;  %v3724_v52 = vmul.f32 0.5, %v3605_v24  ;;  %v1221_v15 = vmul.f32 %v1220_v53, %v3654_v34  ;;  %v3728_v14 = vmul.f32 %v948_v36, %v3499_v55  ;;  %v613_v7 = vpop.f32.mrf.mxu1 }
 0x13e   : > { %4846 = vst [vmem:[#allocation32_spill] sm:$0xff] %v3718_v1  ;;  %v3731_v38 = vmul.f32 %v988_v23, %v3502_v56  ;;  %v3733_v29 = vmin.f32 %v1297_v11, 16.0  ;;  %v722_v63 = vsub.f32 1.0, %v721_v45  ;;  %v1028_v51 = vadd.f32 1.1283791, %v1027_v32 }
 0x13f   : > { %4847 = vst [vmem:[#allocation33_spill] sm:$0xff] %v3721_v13  ;;  %v1105_v12 = vmul.f32 %v1104_v37, %v3594_v2  ;;  %v3737_v47 = vmul.f32 0.5, %v3632_v16  ;;  %v791_v24 = vadd.f32 0.001143296, %v790_v44  ;;  %v1144_v53 = vadd.f32 0.05243302, %v1143_v3 }
 0x140   : > { %4848 = vst [vmem:[#allocation34_spill] sm:$0xff] %v3724_v52  ;;  %v3739_v52 = vadd.f32 1.1283791, %v1067_v40  ;;  %v1260_v13 = vadd.f32 0.00028619796, %v1259_v57  ;;  %v1337_v55 = vmul.f32 %v3718_v1, %v3718_v1  ;;  %v1183_v56 = vmul.f32 %v1182_v35, %v3634_v30 }
 0x141   : > { %4849 = vst [vmem:[#allocation35_spill] sm:$0xff] %v3728_v14  ;;  %v1222_v36 = vadd.f32 0.0036580483, %v1221_v15  ;;  %v792_v23 = vmul.f32 %v791_v24, %v3465_v28  ;;  %v750_v11 = vmul.f32 3.8918573e-05, %v3451_v20  ;;  %v3748_v16 = vadd.f32 %v613_v7, %v3409_v60 }
 0x142   : > { %4850 = vst [vmem:[#allocation36_spill] sm:$0xff] %v3731_v38  ;;  %v1299_v45 = vmul.f32 2.1237322e-06, %v3733_v29  ;;  %v723_v44 = vmul.f32 %v3687_v50, %v722_v63  ;;  %v830_v32 = vmul.f32 3.8918573e-05, %v3469_v31  ;;  %v3753_v37 = vmul.f32 %v1028_v51, %v3530_v27 }
 0x143   : > { %4851 = vst [vmem:[#allocation37_spill] sm:$0xff] %v3737_v47  ;;  %v3756_v40 = vmul.f32 0.5, %v3661_v6  ;;  %v793_v3 = vadd.f32 0.014752088, %v792_v23  ;;  %v751_v57 = vadd.f32 0.001143296, %v750_v11  ;;  %v1145_v15 = vmul.f32 %v1144_v53, %v3613_v61 }
 0x144   : > { %4852 = vst [vmem:[#allocation38_spill] sm:$0xff] %v3753_v37  ;;  %v1106_v35 = vadd.f32 0.18741608, %v1105_v12  ;;  %v1261_v24 = vmul.f32 %v1260_v13, %v3691_v5  ;;  %v3760_v47 = vmin.f32 %v1337_v55, 16.0  ;;  %v1184_v7 = vadd.f32 0.05243302, %v1183_v56 }
 0x145   : > { %4853 = vst [vmem:[#allocation39_spill] sm:$0xff] %v3756_v40  ;;  %v794_v63 = vmul.f32 %v793_v3, %v3465_v28  ;;  %v752_v38 = vmul.f32 %v751_v57, %v3451_v20  ;;  %v831_v62 = vadd.f32 0.001143296, %v830_v32  ;;  %v1223_v27 = vmul.f32 %v1222_v36, %v3654_v34 }
 0x146   : > { %v1300_v51 = vadd.f32 0.00028619796, %v1299_v45  ;;  %v3766_v6 = vmul.f32 0.70710677, %v3748_v16  ;;  %v724_v12 = vadd.f32 %v3687_v50, %v723_v44  ;;  %vm726_vm0 = vweird.f32 %v3687_v50 }
 0x147   : > { %v795_v53 = vadd.f32 0.112945676, %v794_v63  ;;  %v753_v13 = vadd.f32 0.014752088, %v752_v38  ;;  %v832_v55 = vmul.f32 %v831_v62, %v3469_v31  ;;  %v1262_v56 = vadd.f32 0.0036580483, %v1261_v24 }
 0x148   : > { %4854 = vst [vmem:[#allocation40_spill] sm:$0xff] %v3766_v6  ;;  %v1339_v23 = vmul.f32 2.1237322e-06, %v3760_v47  ;;  %vm725_vm1 = vweird.f32 %v3638_v33  ;;  %v731_v11 = vand.u32 2147483648, %v3638_v33  ;;  %v729_v36 = vand.u32 2147483647, %v3638_v33 }
 0x149   : > { %v796_v45 = vmul.f32 %v795_v53, %v3465_v28  ;;  %v754_v32 = vmul.f32 %v753_v13, %v3451_v20  ;;  %v833_v44 = vadd.f32 0.014752088, %v832_v55  ;;  %v1224_v3 = vadd.f32 0.05243302, %v1223_v27  ;;  %vm3782_vm2 = vmor %vm725_vm1, %vm726_vm0 }
 0x14a   : > { %v1301_v57 = vmul.f32 %v1300_v51, %v3733_v29  ;;  %v1377_v62 = vmul.f32 %v3766_v6, %v3766_v6  ;;  %v870_v24 = vmul.f32 3.8918573e-05, %v3496_v54  ;;  %v728_v33 = vsel %vm3782_vm2, %v3687_v50, %v724_v12 }
 0x14b   : > { %v797_v63 = vadd.f32 0.4994258, %v796_v45  ;;  %v755_v53 = vadd.f32 0.112945676, %v754_v32  ;;  %v834_v27 = vmul.f32 %v833_v44, %v3469_v31  ;;  %v1263_v51 = vmul.f32 %v1262_v56, %v3691_v5 }
 0x14c   : > { %v1340_v13 = vadd.f32 0.00028619796, %v1339_v23  ;;  %v732_v55 = vor.u32 1.1754944e-38, %v731_v11  ;;  %v871_v40 = vadd.f32 0.001143296, %v870_v24  ;;  %vm730_vm3 = vcmp.eq.f32.partialorder %v729_v36, 8.507059e+37 }
 0x14d   : > { %v798_v37 = vmul.f32 %v797_v63, %v3465_v28  ;;  %v756_v0 = vmul.f32 %v755_v53, %v3451_v20  ;;  %v835_v6 = vadd.f32 0.112945676, %v834_v27  ;;  %v1146_v14 = vadd.f32 0.18741608, %v1145_v15 }
 0x14e   : > { %v1302_v21 = vadd.f32 0.0036580483, %v1301_v57  ;;  %v733_v1 = vsel %vm730_vm3, %v732_v55, %v728_v33  ;;  %v872_v50 = vmul.f32 %v871_v40, %v3496_v54  ;;  %v3795_v12 = vmin.f32 %v1377_v62, 16.0 }
 0x14f   : > { %v3797_v45 = vadd.f32 1.0, %v798_v37  ;;  %v757_v32 = vadd.f32 0.4994258, %v756_v0  ;;  %v836_v56 = vmul.f32 %v835_v6, %v3469_v31  ;;  %v1107_v23 = vmul.f32 %v1106_v35, %v3594_v2 }
 0x150   : > { %v1185_v11 = vmul.f32 %v1184_v7, %v3634_v30  ;;  %v1225_v28 = vmul.f32 %v1224_v3, %v3654_v34  ;;  %v873_v36 = vadd.f32 0.014752088, %v872_v50  ;;  %v1264_v44 = vadd.f32 0.05243302, %v1263_v51 }
 0x151   : > { %v1341_v15 = vmul.f32 %v1340_v13, %v3760_v47  ;;  %v734_v57 = vmul.f32 %v733_v1, %v3627_v41  ;;  %2867 = vrcp.f32 %v3797_v45  ;;  %v1303_v37 = vmul.f32 %v1302_v21, %v3733_v29 }
 0x152   : > { %v758_v0 = vmul.f32 %v757_v32, %v3451_v20  ;;  %v837_v40 = vadd.f32 0.4994258, %v836_v56  ;;  %v874_v6 = vmul.f32 %v873_v36, %v3496_v54  ;;  %v3811_v35 = vmul.f32 %v3739_v52, %v3537_v39  ;;  %v566_v56 = vpop.f32.mrf.mxu0 }
 0x153   : > { %v1147_v7 = vmul.f32 %v1146_v14, %v3613_v61  ;;  %v1379_v3 = vmul.f32 2.1237322e-06, %v3795_v12  ;;  %v950_v62 = vmul.f32 3.8918573e-05, %v3519_v18  ;;  %v1186_v41 = vadd.f32 0.18741608, %v1185_v11 }
 0x154   : > { %v1226_v1 = vadd.f32 0.18741608, %v1225_v28  ;;  %v3816_v38 = vadd.f32 1.0, %v758_v0  ;;  %v838_v21 = vmul.f32 %v837_v40, %v3469_v31  ;;  %v3819_v20 = vadd.f32 1.1283791, %v1107_v23 }
 0x155   : > { %v3822_v24 = vmul.f32 0.5, %v3694_v26  ;;  %v1342_v33 = vadd.f32 0.0036580483, %v1341_v15  ;;  %v2605_v39 = vclamps-f32 %v734_v57, 1.0  ;;  %v1265_v52 = vmul.f32 %v1264_v44, %v3691_v5 }
 0x156   : > { %v1304_v14 = vadd.f32 0.05243302, %v1303_v37  ;;  %2869 = vrcp.f32 %v3816_v38  ;;  %v875_v63 = vadd.f32 0.112945676, %v874_v6  ;;  %v3827_v27 = vmul.f32 0.5, %v3748_v16 }
 0x157   : > { %4857 = vst [vmem:[#allocation41_spill] sm:$0xff] %v3822_v24  ;;  %v2868_v53 = vpop.eup %2867  ;;  %v1380_v51 = vadd.f32 0.00028619796, %v1379_v3  ;;  %v3829_v13 = vadd.f32 1.0, %v838_v21  ;;  %v951_v31 = vadd.f32 0.001143296, %v950_v62  ;;  %v3834_v26 = vmul.f32 %v1186_v41, %v3634_v30  ;;  %v615_v21 = vpop.f32.mrf.mxu1 }
 0x158   : > { %4858 = vst [vmem:[#allocation42_spill] sm:$0xff] %v3827_v27  ;;  %v3831_v55 = vadd.f32 1.1283791, %v1147_v7  ;;  %v3837_v50 = vmul.f32 %v1226_v1, %v3654_v34  ;;  %v801_v32 = vmul.f32 %v2868_v53, %v3797_v45  ;;  %v3841_v23 = vmul.f32 %v1342_v33, %v3760_v47 }
 0x159   : > { %v1977_v16 = vadd.f32 1.0, %v2605_v39  ;;  %2871 = vrcp.f32 %v3829_v13  ;;  %v910_v11 = vmul.f32 3.8918573e-05, %v3504_v59  ;;  %v3845_v28 = vadd.f32 0.18741608, %v1265_v52 }
 0x15a   : > { %v802_v36 = vsub.f32 1.0, %v801_v32  ;;  %v809_v44 = vand.u32 2147483647, %v3797_v45  ;;  %v876_v15 = vmul.f32 %v875_v63, %v3496_v54  ;;  %v3850_v57 = vmul.f32 %v1304_v14, %v3733_v29 }
 0x15b   : > { %v3853_v37 = vmul.f32 %v1380_v51, %v3795_v12  ;;  %v811_v0 = vand.u32 2147483648, %v3797_v45  ;;  %v952_v40 = vmul.f32 %v951_v31, %v3519_v18  ;;  %vm806_vm4 = vweird.f32 %v2868_v53 }
 0x15c   : > { %v2870_v6 = vpop.eup %2869  ;;  %v803_v7 = vmul.f32 %v2868_v53, %v802_v36  ;;  %v3858_v3 = vadd.f32 %v566_v56, %v3407_v58  ;;  %v877_v62 = vadd.f32 0.4994258, %v876_v15  ;;  %vm805_vm5 = vweird.f32 %v3797_v45 }
 0x15d   : > { %v3862_v41 = vmul.f32 %v1977_v16, %v3559_v10  ;;  %v761_v1 = vmul.f32 %v2870_v6, %v3816_v38  ;;  %v911_v33 = vadd.f32 0.001143296, %v910_v11  ;;  %vm810_vm6 = vcmp.eq.f32.partialorder %v809_v44, 8.507059e+37  ;;  %vm807_vm7 = vmor %vm805_vm5, %vm806_vm4 }
 0x15e   : > { %v804_v39 = vadd.f32 %v2868_v53, %v803_v7  ;;  %v769_v52 = vand.u32 2147483647, %v3816_v38  ;;  %v771_v14 = vand.u32 2147483648, %v3816_v38  ;;  %v812_v51 = vor.u32 1.1754944e-38, %v811_v0 }
 0x15f   : > { %v2872_v63 = vpop.eup %2871  ;;  %v762_v31 = vsub.f32 1.0, %v761_v1  ;;  %v878_v32 = vmul.f32 %v877_v62, %v3496_v54  ;;  %v953_v45 = vadd.f32 0.014752088, %v952_v40  ;;  %v3870_v16 = vmul.f32 0.70710677, %v3858_v3  ;;  %v569_v40 = vpop.f32.mrf.mxu0 }
 0x160   : > { %v808_v56 = vsel %vm807_vm7, %v2868_v53, %v804_v39  ;;  %v841_v10 = vmul.f32 %v2872_v63, %v3829_v13  ;;  %v3873_v11 = vadd.f32 %v615_v21, %v3409_v60  ;;  %vm765_vm8 = vweird.f32 %v3816_v38 }
 0x161   : > { %v813_v36 = vsel %vm810_vm6, %v812_v51, %v808_v56  ;;  %v763_v44 = vmul.f32 %v2870_v6, %v762_v31  ;;  %vm766_vm9 = vweird.f32 %v2870_v6  ;;  %vm3877_vm10 = vcmp.eq.f32.partialorder %v769_v52, 8.507059e+37 }
 0x162   : > { %v814_v15 = vmul.f32 %v813_v36, %v3669_v25  ;;  %v772_v54 = vor.u32 1.1754944e-38, %v771_v14  ;;  %v842_v53 = vsub.f32 1.0, %v841_v10  ;;  %v849_v62 = vand.u32 2147483647, %v3829_v13  ;;  %vm767_vm11 = vmor %vm765_vm8, %vm766_vm9 }
 0x163   : > { %v764_v7 = vadd.f32 %v2870_v6, %v763_v44  ;;  %v851_v1 = vand.u32 2147483648, %v3829_v13  ;;  %v3883_v21 = vadd.f32 1.0, %v878_v32  ;;  %vm846_vm12 = vweird.f32 %v2872_v63 }
 0x164   : > { %v2607_v39 = vclamps-f32 %v814_v15, 1.0  ;;  %v843_v38 = vmul.f32 %v2872_v63, %v842_v53  ;;  %v1417_v25 = vmul.f32 %v3870_v16, %v3870_v16  ;;  %vm845_vm13 = vweird.f32 %v3829_v13 }
 0x165   : > { %v768_v52 = vsel %vm767_vm11, %v2870_v6, %v764_v7  ;;  %v3889_v14 = vadd.f32 %v569_v40, %v3407_v58  ;;  %2873 = vrcp.f32 %v3883_v21  ;;  %v3895_v56 = vmul.f32 0.70710677, %v3873_v11  ;;  %vm847_vm14 = vmor %vm845_vm13, %vm846_vm12 }
 0x166   : > { %v1979_v51 = vadd.f32 1.0, %v2607_v39  ;;  %v773_v31 = vsel %vm3877_vm10, %v772_v54, %v768_v52  ;;  %v844_v32 = vadd.f32 %v2872_v63, %v843_v38  ;;  %v852_v36 = vor.u32 1.1754944e-38, %v851_v1 }
 0x167   : > { %v774_v10 = vmul.f32 %v773_v31, %v3647_v48  ;;  %v954_v6 = vmul.f32 %v953_v45, %v3519_v18  ;;  %v912_v13 = vmul.f32 %v911_v33, %v3504_v59  ;;  %vm850_vm15 = vcmp.eq.f32.partialorder %v849_v62, 8.507059e+37 }
 0x168   : > { %v2011_v44 = vmul.f32 %v1979_v51, %v3570_v22  ;;  %v848_v15 = vsel %vm847_vm14, %v2872_v63, %v844_v32  ;;  %v3901_v53 = vmin.f32 %v1417_v25, 16.0  ;;  %v1344_v0 = vadd.f32 0.05243302, %v3841_v23 }
 0x169   : > { %v2606_v54 = vclamps-f32 %v774_v10, 1.0  ;;  %v853_v40 = vsel %vm850_vm15, %v852_v36, %v848_v15  ;;  %v3905_v7 = vmul.f32 0.70710677, %v3889_v14  ;;  %v1382_v48 = vadd.f32 0.0036580483, %v3853_v37 }
 0x16a   : > { %v2057_v1 = vpack.c.bf16 %v2011_v44, %v3862_v41  ;;  %v854_v45 = vmul.f32 %v853_v40, %v3676_v4  ;;  %v1457_v22 = vmul.f32 %v3895_v56, %v3895_v56  ;;  %v3916_v63 = vmul.f32 %v3819_v20, %v3556_v8 }
 0x16b   : > { %v3912_v33 = vpop.eup %2873  ;;  %v1188_v23 = vadd.f32 1.1283791, %v3834_v26  ;;  %v955_v62 = vadd.f32 0.112945676, %v954_v6  ;;  %v913_v39 = vadd.f32 0.014752088, %v912_v13  ;;  %v1267_v52 = vmul.f32 %v3845_v28, %v3691_v5  ;;  %v618_v26 = vpop.f32.mrf.mxu1 }
 0x16c   : > { %2177 = vmatmul.bf16.vlgmr.msra.gmra.mxu2 %v2057_v1  ;;  %v2608_v38 = vclamps-f32 %v854_v45, 1.0  ;;  %v1978_v37 = vadd.f32 1.0, %v2606_v54  ;;  %v1419_v41 = vmul.f32 2.1237322e-06, %v3901_v53  ;;  %v881_v4 = vmul.f32 %v3912_v33, %v3883_v21  ;;  %v4862_v45 = vld [vmem:[#allocation22_spill] sm:$0xff] }
 0x16d   : > { %v1228_v25 = vadd.f32 1.1283791, %v3837_v50  ;;  %v1345_v8 = vmul.f32 %v1344_v0, %v3760_v47  ;;  %v1497_v20 = vmul.f32 %v3905_v7, %v3905_v7  ;;  %v1306_v51 = vadd.f32 0.18741608, %v3850_v57  ;;  %v4861_v57 = vld [vmem:[#allocation20_spill] sm:$0xff] }
 0x16e   : > { %v1383_v31 = vmul.f32 %v1382_v48, %v3795_v12  ;;  %v1980_v32 = vadd.f32 1.0, %v2608_v38  ;;  %v3930_v10 = vmin.f32 %v1457_v22, 16.0  ;;  %v882_v36 = vsub.f32 1.0, %v881_v4 }
 0x16f   : > { %v956_v6 = vmul.f32 %v955_v62, %v3519_v18  ;;  %v914_v50 = vmul.f32 %v913_v39, %v3504_v59  ;;  %v990_v28 = vmul.f32 3.8918573e-05, %v3521_v19  ;;  %v2010_v13 = vmul.f32 %v1978_v37, %v3567_v17 }
 0x170   : > { %v2012_v44 = vmul.f32 %v1980_v32, %v3580_v42  ;;  %v1420_v15 = vadd.f32 0.00028619796, %v1419_v41  ;;  %v3938_v0 = vadd.f32 %v618_v26, %v3409_v60  ;;  %v3942_v54 = vmul.f32 %v3831_v55, %v4861_v57 }
 0x171   : > { %v1268_v40 = vadd.f32 1.1283791, %v1267_v52  ;;  %v1346_v48 = vadd.f32 0.18741608, %v1345_v8  ;;  %v3944_v1 = vmin.f32 %v1497_v20, 16.0  ;;  %v3947_v22 = vmul.f32 %v1188_v23, %v4862_v45 }
 0x172   : > { %v1384_v62 = vadd.f32 0.05243302, %v1383_v31  ;;  %v2058_v39 = vpack.c.bf16 %v2012_v44, %v2010_v13  ;;  %v1459_v17 = vmul.f32 2.1237322e-06, %v3930_v10  ;;  %v3951_v42 = vmul.f32 %v1228_v25, %v3619_v49 }
 0x173   : > { %v1307_v38 = vmul.f32 %v1306_v51, %v3733_v29  ;;  %v883_v37 = vmul.f32 %v3912_v33, %v882_v36  ;;  %v957_v55 = vadd.f32 0.4994258, %v956_v6  ;;  %v1421_v41 = vmul.f32 %v1420_v15, %v3901_v53 }
 0x174   : > { %2226 = vmatmul.bf16.vlgmr.msra.gmra.mxu3 %v2058_v39  ;;  %v3957_v4 = vmul.f32 0.70710677, %v3938_v0  ;;  %v915_v23 = vadd.f32 0.112945676, %v914_v50  ;;  %v991_v52 = vadd.f32 0.001143296, %v990_v28  ;;  %v3960_v8 = vmul.f32 %v1268_v40, %v3650_v9 }
 0x175   : > { %v1347_v20 = vmul.f32 %v1346_v48, %v3760_v47  ;;  %v1499_v49 = vmul.f32 2.1237322e-06, %v3944_v1  ;;  %v958_v25 = vmul.f32 %v957_v55, %v3519_v18  ;;  %v1385_v26 = vmul.f32 %v1384_v62, %v3795_v12 }
 0x176   : > { %v1460_v51 = vadd.f32 0.00028619796, %v1459_v17  ;;  %vm886_vm0 = vweird.f32 %v3912_v33  ;;  %v916_v31 = vmul.f32 %v915_v23, %v3504_v59  ;;  %v884_v32 = vadd.f32 %v3912_v33, %v883_v37 }
 0x177   : > { %v3969_v36 = vadd.f32 1.0, %v958_v25  ;;  %v992_v9 = vmul.f32 %v991_v52, %v3521_v19  ;;  %v1030_v6 = vmul.f32 3.8918573e-05, %v3539_v46  ;;  %v1422_v50 = vadd.f32 0.0036580483, %v1421_v41 }
 0x178   : > { %v1537_v28 = vmul.f32 %v3957_v4, %v3957_v4  ;;  %v891_v18 = vand.u32 2147483648, %v3883_v21  ;;  %v917_v13 = vadd.f32 0.4994258, %v916_v31  ;;  %v1500_v44 = vadd.f32 0.00028619796, %v1499_v49 }
 0x179   : > { %vm885_vm1 = vweird.f32 %v3883_v21  ;;  %v889_v15 = vand.u32 2147483647, %v3883_v21  ;;  %2875 = vrcp.f32 %v3969_v36  ;;  %v1308_v57 = vadd.f32 1.1283791, %v1307_v38 }
 0x17a   : > { %v1386_v40 = vadd.f32 0.18741608, %v1385_v26  ;;  %v1461_v48 = vmul.f32 %v1460_v51, %v3930_v10  ;;  %vm3982_vm2 = vmor %vm885_vm1, %vm886_vm0  ;;  %v918_v62 = vmul.f32 %v917_v13, %v3504_v59  ;;  %v1348_v39 = vadd.f32 1.1283791, %v1347_v20 }
 0x17b   : > { %v888_v17 = vsel %vm3982_vm2, %v3912_v33, %v884_v32  ;;  %v993_v21 = vadd.f32 0.014752088, %v992_v9  ;;  %v1031_v37 = vadd.f32 0.001143296, %v1030_v6  ;;  %v1423_v38 = vmul.f32 %v1422_v50, %v3901_v53  ;;  %v4866_v6 = vld [vmem:[#allocation32_spill] sm:$0xff] }
 0x17c   : > { %v3991_v55 = vmin.f32 %v1537_v28, 16.0  ;;  %v892_v41 = vor.u32 1.1754944e-38, %v891_v18  ;;  %v3993_v23 = vadd.f32 1.0, %v918_v62  ;;  %v1501_v52 = vmul.f32 %v1500_v44, %v3944_v1 }
 0x17d   : > { %vm890_vm3 = vcmp.eq.f32.partialorder %v889_v15, 8.507059e+37  ;;  %v994_v49 = vmul.f32 %v993_v21, %v3521_v19  ;;  %v1032_v59 = vmul.f32 %v1031_v37, %v3539_v46  ;;  %v1387_v20 = vmul.f32 %v1386_v40, %v3795_v12  ;;  %v4868_v15 = vld [vmem:[#allocation28_spill] sm:$0xff] }
 0x17e   : > { %v1462_v25 = vadd.f32 0.0036580483, %v1461_v48  ;;  %v893_v33 = vsel %vm890_vm3, %v892_v41, %v888_v17  ;;  %2877 = vrcp.f32 %v3993_v23  ;;  %v4001_v51 = vmul.f32 %v1308_v57, %v3685_v43 }
 0x17f   : > { %v2876_v26 = vpop.eup %2875  ;;  %v995_v31 = vadd.f32 0.112945676, %v994_v49  ;;  %v1033_v32 = vadd.f32 0.014752088, %v1032_v59  ;;  %v1110_v9 = vmul.f32 3.8918573e-05, %v3594_v2  ;;  %v4005_v50 = vmul.f32 %v1348_v39, %v4866_v6  ;;  %v571_v6 = vpop.f32.mrf.mxu0 }
 0x180   : > { %4865 = vst [vmem:[#allocation20_spill] sm:$0xff] %v4001_v51  ;;  %v1424_v28 = vadd.f32 0.05243302, %v1423_v38  ;;  %v1539_v18 = vmul.f32 2.1237322e-06, %v3991_v55  ;;  %v961_v13 = vmul.f32 %v2876_v26, %v3969_v36  ;;  %v894_v40 = vmul.f32 %v893_v33, %v4868_v15 }
 0x181   : > { %4867 = vst [vmem:[#allocation22_spill] sm:$0xff] %v4005_v50  ;;  %v1502_v44 = vadd.f32 0.0036580483, %v1501_v52  ;;  %v996_v48 = vmul.f32 %v995_v31, %v3521_v19  ;;  %v1034_v43 = vmul.f32 %v1033_v32, %v3539_v46  ;;  %v1388_v57 = vadd.f32 1.1283791, %v1387_v20 }
 0x182   : > { %v962_v45 = vsub.f32 1.0, %v961_v13  ;;  %v969_v62 = vand.u32 2147483647, %v3969_v36  ;;  %v971_v17 = vand.u32 2147483648, %v3969_v36  ;;  %v1463_v39 = vmul.f32 %v1462_v25, %v3930_v10  ;;  %v620_v25 = vpop.f32.mrf.mxu1 }
 0x183   : > { %v997_v21 = vadd.f32 0.4994258, %v996_v48  ;;  %v1035_v37 = vadd.f32 0.112945676, %v1034_v43  ;;  %v1111_v38 = vadd.f32 0.001143296, %v1110_v9  ;;  %v1425_v52 = vmul.f32 %v1424_v28, %v3901_v53 }
 0x184   : > { %v2878_v41 = vpop.eup %2877  ;;  %v1540_v49 = vadd.f32 0.00028619796, %v1539_v18  ;;  %v963_v59 = vmul.f32 %v2876_v26, %v962_v45  ;;  %vm966_vm4 = vweird.f32 %v2876_v26  ;;  %v1503_v33 = vmul.f32 %v1502_v44, %v3944_v1 }
 0x185   : > { %v2609_v31 = vclamps-f32 %v894_v40, 1.0  ;;  %v921_v20 = vmul.f32 %v2878_v41, %v3993_v23  ;;  %v998_v32 = vmul.f32 %v997_v21, %v3521_v19  ;;  %vm965_vm5 = vweird.f32 %v3969_v36 }
 0x186   : > { %v964_v13 = vadd.f32 %v2876_v26, %v963_v59  ;;  %vm970_vm6 = vcmp.eq.f32.partialorder %v969_v62, 8.507059e+37  ;;  %v1036_v9 = vmul.f32 %v1035_v37, %v3539_v46  ;;  %vm967_vm7 = vmor %vm965_vm5, %vm966_vm4  ;;  %v972_v28 = vor.u32 1.1754944e-38, %v971_v17  ;;  %v4869_v17 = vld [vmem:[#allocation35_spill] sm:$0xff] }
 0x187   : > { %v922_v18 = vsub.f32 1.0, %v921_v20  ;;  %v4021_v15 = vadd.f32 1.0, %v998_v32  ;;  %v1112_v44 = vmul.f32 %v1111_v38, %v3594_v2  ;;  %vm926_vm8 = vweird.f32 %v2878_v41  ;;  %v4870_v32 = vld [vmem:[#allocation40_spill] sm:$0xff] }
 0x188   : > { %v968_v40 = vsel %vm967_vm7, %v2876_v26, %v964_v13  ;;  %v4025_v48 = vadd.f32 %v571_v6, %v3407_v58  ;;  %v1037_v19 = vadd.f32 0.4994258, %v1036_v9  ;;  %v4029_v36 = vadd.f32 %v620_v25, %v3409_v60 }
 0x189   : > { %v973_v43 = vsel %vm970_vm6, %v972_v28, %v968_v40  ;;  %v923_v45 = vmul.f32 %v2878_v41, %v922_v18  ;;  %2879 = vrcp.f32 %v4021_v15  ;;  %v1541_v62 = vmul.f32 %v1540_v49, %v3991_v55 }
 0x18a   : > { %v974_v21 = vmul.f32 %v973_v43, %v4869_v17  ;;  %vm925_vm9 = vweird.f32 %v3993_v23  ;;  %v931_v26 = vand.u32 2147483648, %v3993_v23  ;;  %v929_v38 = vand.u32 2147483647, %v3993_v23  ;;  %v574_v43 = vpop.f32.mrf.mxu0  ;;  %v623_v27 = vpop.f32.mrf.mxu1 }
 0x18b   : > { %v924_v37 = vadd.f32 %v2878_v41, %v923_v45  ;;  %v1038_v59 = vmul.f32 %v1037_v19, %v3539_v46  ;;  %v1113_v20 = vadd.f32 0.014752088, %v1112_v44  ;;  %v4038_v6 = vmul.f32 %v1388_v57, %v4870_v32  ;;  %vm4041_vm10 = vmor %vm925_vm9, %vm926_vm8  ;;  %v4875_v45 = vld [vmem:[#allocation21_spill] sm:$0xff] }
 0x18c   : > { %v1464_v13 = vadd.f32 0.05243302, %v1463_v39  ;;  %v2611_v25 = vclamps-f32 %v974_v21, 1.0  ;;  %v1981_v9 = vadd.f32 1.0, %v2609_v31  ;;  %v1504_v28 = vadd.f32 0.05243302, %v1503_v33 }
 0x18d   : > { %4871 = vst [vmem:[#allocation32_spill] sm:$0xff] %v4038_v6  ;;  %v928_v18 = vsel %vm4041_vm10, %v2878_v41, %v924_v37  ;;  %v4048_v23 = vmul.f32 0.70710677, %v4025_v48  ;;  %v4051_v46 = vmul.f32 0.70710677, %v4029_v36  ;;  %v4054_v57 = vmul.f32 0.5, %v3858_v3 }
 0x18e   : > { %v1542_v39 = vadd.f32 0.0036580483, %v1541_v62  ;;  %v1983_v31 = vadd.f32 1.0, %v2611_v25  ;;  %v932_v44 = vor.u32 1.1754944e-38, %v931_v26  ;;  %v1426_v19 = vadd.f32 0.18741608, %v1425_v52 }
 0x18f   : > { %4874 = vst [vmem:[#allocation28_spill] sm:$0xff] %v4054_v57  ;;  %v2880_v40 = vpop.eup %2879  ;;  %vm930_vm11 = vcmp.eq.f32.partialorder %v929_v38, 8.507059e+37  ;;  %v4056_v33 = vadd.f32 1.0, %v1038_v59  ;;  %v1114_v41 = vmul.f32 %v1113_v20, %v3594_v2  ;;  %v2013_v17 = vmul.f32 %v1981_v9, %v4875_v45  ;;  %v4876_v21 = vld [vmem:[#allocation24_spill] sm:$0xff]  ;;  %v4877_v9 = vld [vmem:[#allocation30_spill] sm:$0xff]  ;;  %v4878_v45 = vld [vmem:[#allocation19_spill] sm:$0xff] }
 0x190   : > { %v2015_v37 = vmul.f32 %v1983_v31, %v4876_v21  ;;  %v933_v32 = vsel %vm930_vm11, %v932_v44, %v928_v18  ;;  %v1001_v49 = vmul.f32 %v2880_v40, %v4021_v15  ;;  %v1465_v3 = vmul.f32 %v1464_v13, %v3930_v10  ;;  %v4880_v57 = vld [vmem:[#allocation36_spill] sm:$0xff] }
 0x191   : > { %v1505_v62 = vmul.f32 %v1504_v28, %v3944_v1  ;;  %v1577_v52 = vmul.f32 %v4048_v23, %v4048_v23  ;;  %v1617_v26 = vmul.f32 %v4051_v46, %v4051_v46  ;;  %v1543_v38 = vmul.f32 %v1542_v39, %v3991_v55 }
 0x192   : > { %v2059_v59 = vpack.c.bf16 %v2015_v37, %v2013_v17  ;;  %v1002_v20 = vsub.f32 1.0, %v1001_v49  ;;  %v4070_v25 = vadd.f32 %v574_v43, %v3407_v58  ;;  %v934_v18 = vmul.f32 %v933_v32, %v4877_v9 }
 0x193   : > { %v1011_v31 = vand.u32 2147483648, %v4021_v15  ;;  %2881 = vrcp.f32 %v4056_v33  ;;  %v1115_v13 = vadd.f32 0.112945676, %v1114_v41  ;;  %vm1006_vm12 = vweird.f32 %v2880_v40 }
 0x194   : > { %2182 = vmatmul.bf16.gmra.mxu2 %v2059_v59  ;;  %v1003_v28 = vmul.f32 %v2880_v40, %v1002_v20  ;;  %v1009_v44 = vand.u32 2147483647, %v4021_v15  ;;  %v1070_v21 = vmul.f32 3.8918573e-05, %v4878_v45  ;;  %v1427_v39 = vmul.f32 %v1426_v19, %v3901_v53 }
 0x195   : > { %v4079_v17 = vmul.f32 0.5, %v3873_v11  ;;  %v4081_v43 = vmin.f32 %v1577_v52, 16.0  ;;  %v4083_v37 = vmin.f32 %v1617_v26, 16.0  ;;  %v1466_v32 = vadd.f32 0.18741608, %v1465_v3 }
 0x196   : > { %v1004_v49 = vadd.f32 %v2880_v40, %v1003_v28  ;;  %vm1005_vm13 = vweird.f32 %v4021_v15  ;;  %v4087_v41 = vmul.f32 0.70710677, %v4070_v25  ;;  %v1506_v59 = vadd.f32 0.18741608, %v1505_v62 }
 0x197   : > { %4879 = vst [vmem:[#allocation35_spill] sm:$0xff] %v4079_v17  ;;  %v2610_v20 = vclamps-f32 %v934_v18, 1.0  ;;  %vm1007_vm14 = vmor %vm1005_vm13, %vm1006_vm12  ;;  %v1012_v9 = vor.u32 1.1754944e-38, %v1011_v31  ;;  %v1116_v19 = vmul.f32 %v1115_v13, %v3594_v2  ;;  %v1544_v11 = vadd.f32 0.05243302, %v1543_v38 }
 0x198   : > { %v1008_v17 = vsel %vm1007_vm14, %v2880_v40, %v1004_v49  ;;  %vm1010_vm15 = vcmp.eq.f32.partialorder %v1009_v44, 8.507059e+37  ;;  %v1071_v52 = vadd.f32 0.001143296, %v1070_v21  ;;  %v1579_v3 = vmul.f32 2.1237322e-06, %v4081_v43 }
 0x199   : > { %v2882_v26 = vpop.eup %2881  ;;  %v1013_v6 = vsel %vm1010_vm15, %v1012_v9, %v1008_v17  ;;  %v1619_v15 = vmul.f32 2.1237322e-06, %v4083_v37  ;;  %v1117_v28 = vadd.f32 0.4994258, %v1116_v19  ;;  %v1657_v62 = vmul.f32 %v4087_v41, %v4087_v41 }
 0x19a   : > { %v1014_v24 = vmul.f32 %v1013_v6, %v4880_v57  ;;  %v4096_v18 = vadd.f32 %v623_v27, %v3409_v60  ;;  %v1041_v38 = vmul.f32 %v2882_v26, %v4056_v33  ;;  %v1428_v40 = vadd.f32 1.1283791, %v1427_v39 }
 0x19b   : > { %v1467_v31 = vmul.f32 %v1466_v32, %v3930_v10  ;;  %v1982_v13 = vadd.f32 1.0, %v2610_v20  ;;  %v1118_v44 = vmul.f32 %v1117_v28, %v3594_v2  ;;  %v1507_v21 = vmul.f32 %v1506_v59, %v3944_v1  ;;  %v4881_v2 = vld [vmem:[#allocation23_spill] sm:$0xff]  ;;  %v4882_v59 = vld [vmem:[#allocation25_spill] sm:$0xff] }
 0x19c   : > { %v2612_v17 = vclamps-f32 %v1014_v24, 1.0  ;;  %v1042_v49 = vsub.f32 1.0, %v1041_v38  ;;  %v1072_v6 = vmul.f32 %v1071_v52, %v4878_v45  ;;  %v1545_v57 = vmul.f32 %v1544_v11, %v3991_v55 }
 0x19d   : > { %v1580_v9 = vadd.f32 0.00028619796, %v1579_v3  ;;  %v1620_v19 = vadd.f32 0.00028619796, %v1619_v15  ;;  %v4104_v27 = vadd.f32 1.0, %v1118_v44  ;;  %v4106_v51 = vmin.f32 %v1657_v62, 16.0 }
 0x19e   : > { %v1984_v50 = vadd.f32 1.0, %v2612_v17  ;;  %v4109_v39 = vmul.f32 0.70710677, %v4096_v18  ;;  %v1043_v32 = vmul.f32 %v2882_v26, %v1042_v49  ;;  %v2014_v20 = vmul.f32 %v1982_v13, %v4881_v2  ;;  %v4887_v49 = vld [vmem:[#allocation38_spill] sm:$0xff] }
 0x19f   : > { %vm1046_vm0 = vweird.f32 %v2882_v26  ;;  %v1049_v24 = vand.u32 2147483647, %v4056_v33  ;;  %2883 = vrcp.f32 %v4104_v27  ;;  %v1051_v3 = vand.u32 2147483648, %v4056_v33 }
 0x1a0   : > { %v2016_v11 = vmul.f32 %v1984_v50, %v4882_v59  ;;  %v1044_v52 = vadd.f32 %v2882_v26, %v1043_v32  ;;  %v1073_v15 = vadd.f32 0.014752088, %v1072_v6  ;;  %v1468_v28 = vadd.f32 1.1283791, %v1467_v31 }
 0x1a1   : > { %v4117_v62 = vmul.f32 0.5, %v3889_v14  ;;  %v4120_v38 = vmul.f32 0.5, %v3938_v0  ;;  %vm1045_vm1 = vweird.f32 %v4056_v33  ;;  %v4124_v13 = vmul.f32 %v1428_v40, %v3870_v16 }
 0x1a2   : > { %v2060_v44 = vpack.c.bf16 %v2016_v11, %v2014_v20  ;;  %v1581_v17 = vmul.f32 %v1580_v9, %v4081_v43  ;;  %v1621_v50 = vmul.f32 %v1620_v19, %v4083_v37  ;;  %vm4129_vm2 = vmor %vm1045_vm1, %vm1046_vm0  ;;  %v1508_v14 = vadd.f32 1.1283791, %v1507_v21 }
 0x1a3   : > { %4883 = vst [vmem:[#allocation40_spill] sm:$0xff] %v4117_v62  ;;  %v1546_v31 = vadd.f32 0.18741608, %v1545_v57  ;;  %v1697_v0 = vmul.f32 %v4109_v39, %v4109_v39  ;;  %v1048_v33 = vsel %vm4129_vm2, %v2882_v26, %v1044_v52  ;;  %v1659_v16 = vmul.f32 2.1237322e-06, %v4106_v51 }
 0x1a4   : > { %4884 = vst [vmem:[#allocation21_spill] sm:$0xff] %v4120_v38  ;;  %2231 = vmatmul.bf16.gmra.mxu3 %v2060_v44  ;;  %vm1050_vm3 = vcmp.eq.f32.partialorder %v1049_v24, 8.507059e+37  ;;  %v1052_v40 = vor.u32 1.1754944e-38, %v1051_v3  ;;  %v1074_v6 = vmul.f32 %v1073_v15, %v4878_v45  ;;  %v4140_v19 = vmul.f32 %v1468_v28, %v3895_v56 }
 0x1a5   : > { %v2884_v9 = vpop.eup %2883  ;;  %v1150_v21 = vmul.f32 3.8918573e-05, %v3613_v61  ;;  %v1190_v57 = vmul.f32 3.8918573e-05, %v3634_v30  ;;  %v1270_v32 = vmul.f32 3.8918573e-05, %v3691_v5  ;;  %v1547_v24 = vmul.f32 %v1546_v31, %v3991_v55 }
 0x1a6   : > { %v1582_v2 = vadd.f32 0.0036580483, %v1581_v17  ;;  %v1622_v20 = vadd.f32 0.0036580483, %v1621_v50  ;;  %v1053_v26 = vsel %vm1050_vm3, %v1052_v40, %v1048_v33  ;;  %v1121_v59 = vmul.f32 %v2884_v9, %v4104_v27 }
 0x1a7   : > { %v4147_v11 = vmin.f32 %v1697_v0, 16.0  ;;  %v1075_v52 = vadd.f32 0.112945676, %v1074_v6  ;;  %v1151_v3 = vadd.f32 0.001143296, %v1150_v21  ;;  %v1131_v28 = vand.u32 2147483648, %v4104_v27 }
 0x1a8   : > { %v1660_v15 = vadd.f32 0.00028619796, %v1659_v16  ;;  %v1122_v56 = vsub.f32 1.0, %v1121_v59  ;;  %v1191_v44 = vadd.f32 0.001143296, %v1190_v57  ;;  %v1054_v38 = vmul.f32 %v1053_v26, %v4887_v49 }
 0x1a9   : > { %v1076_v62 = vmul.f32 %v1075_v52, %v4878_v45  ;;  %v1152_v17 = vmul.f32 %v1151_v3, %v3613_v61  ;;  %v1271_v50 = vadd.f32 0.001143296, %v1270_v32  ;;  %vm1126_vm4 = vweird.f32 %v2884_v9 }
 0x1aa   : > { %v1123_v33 = vmul.f32 %v2884_v9, %v1122_v56  ;;  %v1129_v31 = vand.u32 2147483647, %v4104_v27  ;;  %v1192_v0 = vmul.f32 %v1191_v44, %v3634_v30  ;;  %v4156_v40 = vmul.f32 %v1508_v14, %v3905_v7 }
 0x1ab   : > { %v1699_v16 = vmul.f32 2.1237322e-06, %v4147_v11  ;;  %v1077_v6 = vadd.f32 0.4994258, %v1076_v62  ;;  %v1153_v21 = vadd.f32 0.014752088, %v1152_v17  ;;  %vm1125_vm5 = vweird.f32 %v4104_v27 }
 0x1ac   : > { %v1124_v57 = vadd.f32 %v2884_v9, %v1123_v33  ;;  %v1193_v26 = vadd.f32 0.014752088, %v1192_v0  ;;  %v1272_v59 = vmul.f32 %v1271_v50, %v3691_v5  ;;  %v2613_v32 = vclamps-f32 %v1054_v38, 1.0  ;;  %vm1127_vm6 = vmor %vm1125_vm5, %vm1126_vm4 }
 0x1ad   : > { %v1132_v52 = vor.u32 1.1754944e-38, %v1131_v28  ;;  %v1078_v3 = vmul.f32 %v1077_v6, %v4878_v45  ;;  %v1154_v56 = vmul.f32 %v1153_v21, %v3613_v61  ;;  %v1548_v44 = vadd.f32 1.1283791, %v1547_v24 }
 0x1ae   : > { %v1128_v7 = vsel %vm1127_vm6, %v2884_v9, %v1124_v57  ;;  %vm1130_vm7 = vcmp.eq.f32.partialorder %v1129_v31, 8.507059e+37  ;;  %v1194_v14 = vmul.f32 %v1193_v26, %v3634_v30  ;;  %v1661_v62 = vmul.f32 %v1660_v15, %v4106_v51 }
 0x1af   : > { %v1133_v49 = vsel %vm1130_vm7, %v1132_v52, %v1128_v7  ;;  %v4165_v17 = vadd.f32 1.0, %v1078_v3  ;;  %v1155_v27 = vadd.f32 0.112945676, %v1154_v56  ;;  %v1583_v50 = vmul.f32 %v1582_v2, %v4081_v43  ;;  %v4889_v3 = vld [vmem:[#allocation26_spill] sm:$0xff]  ;;  %v4890_v7 = vld [vmem:[#allocation29_spill] sm:$0xff] }
 0x1b0   : > { %v1134_v38 = vmul.f32 %v1133_v49, %v3916_v63  ;;  %v1195_v28 = vadd.f32 0.112945676, %v1194_v14  ;;  %v1273_v33 = vadd.f32 0.014752088, %v1272_v59  ;;  %v1623_v45 = vmul.f32 %v1622_v20, %v4083_v37 }
 0x1b1   : > { %v1700_v0 = vadd.f32 0.00028619796, %v1699_v16  ;;  %v1985_v24 = vadd.f32 1.0, %v2613_v32  ;;  %2885 = vrcp.f32 %v4165_v17  ;;  %v4172_v9 = vmul.f32 %v1548_v44, %v3957_v4  ;;  %v576_v44 = vpop.f32.mrf.mxu0 }
 0x1b2   : > { %v2615_v15 = vclamps-f32 %v1134_v38, 1.0  ;;  %v1156_v31 = vmul.f32 %v1155_v27, %v3613_v61  ;;  %v1196_v6 = vmul.f32 %v1195_v28, %v3634_v30  ;;  %v4177_v2 = vmul.f32 0.5, %v4025_v48  ;;  %v625_v48 = vpop.f32.mrf.mxu1 }
 0x1b3   : > { %v4180_v63 = vmul.f32 0.5, %v4029_v36  ;;  %v1662_v21 = vadd.f32 0.0036580483, %v1661_v62  ;;  %v1230_v20 = vmul.f32 3.8918573e-05, %v3654_v34  ;;  %v1274_v4 = vmul.f32 %v1273_v33, %v3691_v5 }
 0x1b4   : > { %v1987_v16 = vadd.f32 1.0, %v2615_v15  ;;  %v1157_v57 = vadd.f32 0.4994258, %v1156_v31  ;;  %v1197_v26 = vadd.f32 0.4994258, %v1196_v6  ;;  %v1701_v52 = vmul.f32 %v1700_v0, %v4147_v11 }
 0x1b5   : > { %4888 = vst [vmem:[#allocation24_spill] sm:$0xff] %v4180_v63  ;;  %v1584_v59 = vadd.f32 0.05243302, %v1583_v50  ;;  %v1624_v32 = vadd.f32 0.05243302, %v1623_v45  ;;  %v2017_v56 = vmul.f32 %v1985_v24, %v4889_v3  ;;  %v4189_v62 = vadd.f32 %v576_v44, %v3407_v58 }
 0x1b6   : > { %v2019_v14 = vmul.f32 %v1987_v16, %v4890_v7  ;;  %v1158_v36 = vmul.f32 %v1157_v57, %v3613_v61  ;;  %v4192_v49 = vadd.f32 %v625_v48, %v3409_v60  ;;  %v4195_v50 = vmul.f32 0.5, %v4070_v25 }
 0x1b7   : > { %v2886_v27 = vpop.eup %2885  ;;  %v1663_v38 = vmul.f32 %v1662_v21, %v4106_v51  ;;  %v1198_v28 = vmul.f32 %v1197_v26, %v3634_v30  ;;  %v1231_v33 = vadd.f32 0.001143296, %v1230_v20  ;;  %v1275_v61 = vadd.f32 0.112945676, %v1274_v4 }
 0x1b8   : > { %4891 = vst [vmem:[#allocation30_spill] sm:$0xff] %v4195_v50  ;;  %v2061_v45 = vpack.c.bf16 %v2019_v14, %v2017_v56  ;;  %v1081_v0 = vmul.f32 %v2886_v27, %v4165_v17  ;;  %v4200_v24 = vadd.f32 1.0, %v1158_v36  ;;  %v1585_v15 = vmul.f32 %v1584_v59, %v4081_v43 }
 0x1b9   : > { %v1625_v31 = vmul.f32 %v1624_v32, %v4083_v37  ;;  %v1702_v6 = vadd.f32 0.0036580483, %v1701_v52  ;;  %v4205_v16 = vmul.f32 0.70710677, %v4189_v62  ;;  %v4209_v30 = vmul.f32 0.70710677, %v4192_v49 }
 0x1ba   : > { %2187 = vmatmul.bf16.gmra.mxu2 %v2061_v45  ;;  %v1082_v25 = vsub.f32 1.0, %v1081_v0  ;;  %2887 = vrcp.f32 %v4200_v24  ;;  %v1310_v21 = vmul.f32 3.8918573e-05, %v3733_v29  ;;  %v1664_v20 = vadd.f32 0.05243302, %v1663_v38 }
 0x1bb   : > { %4892 = vst [vmem:[#allocation19_spill] sm:$0xff] %v4209_v30  ;;  %v1091_v57 = vand.u32 2147483648, %v4165_v17  ;;  %v4213_v26 = vadd.f32 1.0, %v1198_v28  ;;  %v1232_v4 = vmul.f32 %v1231_v33, %v3654_v34  ;;  %vm1086_vm8 = vweird.f32 %v2886_v27  ;;  %v579_v33 = vpop.f32.mrf.mxu0 }
 0x1bc   : > { %v1083_v59 = vmul.f32 %v2886_v27, %v1082_v25  ;;  %v1737_v32 = vmul.f32 %v4205_v16, %v4205_v16  ;;  %v1276_v52 = vmul.f32 %v1275_v61, %v3691_v5  ;;  %v1586_v3 = vadd.f32 0.18741608, %v1585_v15 }
 0x1bd   : > { %v1703_v56 = vmul.f32 %v1702_v6, %v4147_v11  ;;  %v1089_v44 = vand.u32 2147483647, %v4165_v17  ;;  %2889 = vrcp.f32 %v4213_v26  ;;  %vm1085_vm9 = vweird.f32 %v4165_v17 }
 0x1be   : > { %v1084_v48 = vadd.f32 %v2886_v27, %v1083_v59  ;;  %v1777_v7 = vmul.f32 %v4209_v30, %v4209_v30  ;;  %v1311_v14 = vadd.f32 0.001143296, %v1310_v21  ;;  %v1626_v36 = vadd.f32 0.18741608, %v1625_v31  ;;  %vm1087_vm10 = vmor %vm1085_vm9, %vm1086_vm8 }
 0x1bf   : > { %v1665_v38 = vmul.f32 %v1664_v20, %v4106_v51  ;;  %v4227_v28 = vmul.f32 0.5, %v4096_v18  ;;  %v1233_v45 = vadd.f32 0.014752088, %v1232_v4  ;;  %v1092_v15 = vor.u32 1.1754944e-38, %v1091_v57 }
 0x1c0   : > { %v2888_v0 = vpop.eup %2887  ;;  %v1088_v61 = vsel %vm1087_vm10, %v2886_v27, %v1084_v48  ;;  %v4229_v6 = vmin.f32 %v1737_v32, 16.0  ;;  %v1277_v25 = vadd.f32 0.4994258, %v1276_v52  ;;  %v1587_v17 = vmul.f32 %v1586_v3, %v4081_v43 }
 0x1c1   : > { %4893 = vst [vmem:[#allocation36_spill] sm:$0xff] %v4227_v28  ;;  %v1704_v59 = vadd.f32 0.05243302, %v1703_v56  ;;  %vm1090_vm11 = vcmp.eq.f32.partialorder %v1089_v44, 8.507059e+37  ;;  %v1161_v31 = vmul.f32 %v2888_v0, %v4200_v24  ;;  %v4233_v20 = vmin.f32 %v1777_v7, 16.0 }
 0x1c2   : > { %v1093_v21 = vsel %vm1090_vm11, %v1092_v15, %v1088_v61  ;;  %v4236_v18 = vadd.f32 %v579_v33, %v3407_v58  ;;  %v1312_v4 = vmul.f32 %v1311_v14, %v3733_v29  ;;  %v4242_v27 = vmul.f32 %v1626_v36, %v4083_v37  ;;  %v628_v33 = vpop.f32.mrf.mxu1 }
 0x1c3   : > { %v4239_v28 = vpop.eup %2889  ;;  %v1666_v57 = vadd.f32 0.18741608, %v1665_v38  ;;  %v1162_v32 = vsub.f32 1.0, %v1161_v31  ;;  %v1234_v52 = vmul.f32 %v1233_v45, %v3654_v34  ;;  %v1169_v3 = vand.u32 2147483647, %v4200_v24 }
 0x1c4   : > { %4894 = vst [vmem:[#allocation23_spill] sm:$0xff] %v4236_v18  ;;  %v1171_v56 = vand.u32 2147483648, %v4200_v24  ;;  %v1739_v44 = vmul.f32 2.1237322e-06, %v4229_v6  ;;  %v1278_v48 = vmul.f32 %v1277_v25, %v3691_v5  ;;  %v1094_v7 = vmul.f32 %v1093_v21, %v3811_v35 }
 0x1c5   : > { %v1163_v14 = vmul.f32 %v2888_v0, %v1162_v32  ;;  %vm1166_vm12 = vweird.f32 %v2888_v0  ;;  %v1201_v36 = vmul.f32 %v4239_v28, %v4213_v26  ;;  %v1705_v38 = vmul.f32 %v1704_v59, %v4147_v11 }
 0x1c6   : > { %v1779_v45 = vmul.f32 2.1237322e-06, %v4233_v20  ;;  %v4255_v61 = vmul.f32 0.70710677, %v4236_v18  ;;  %v1313_v15 = vadd.f32 0.014752088, %v1312_v4  ;;  %vm1165_vm13 = vweird.f32 %v4200_v24 }
 0x1c7   : > { %v1164_v31 = vadd.f32 %v2888_v0, %v1163_v14  ;;  %v1202_v5 = vsub.f32 1.0, %v1201_v36  ;;  %v1235_v25 = vadd.f32 0.112945676, %v1234_v52  ;;  %vm1167_vm14 = vmor %vm1165_vm13, %vm1166_vm12  ;;  %vm1170_vm15 = vcmp.eq.f32.partialorder %v1169_v3, 8.507059e+37 }
 0x1c8   : > { %v1172_v35 = vor.u32 1.1754944e-38, %v1171_v56  ;;  %v1740_v21 = vadd.f32 0.00028619796, %v1739_v44  ;;  %v4259_v32 = vadd.f32 %v628_v33, %v3409_v60  ;;  %v2614_v50 = vclamps-f32 %v1094_v7, 1.0 }
 0x1c9   : > { %v1168_v59 = vsel %vm1167_vm14, %v2888_v0, %v1164_v31  ;;  %v1203_v63 = vmul.f32 %v4239_v28, %v1202_v5  ;;  %v4262_v30 = vadd.f32 1.0, %v1278_v48  ;;  %v1780_v4 = vadd.f32 0.00028619796, %v1779_v45 }
 0x1ca   : > { %4895 = vst [vmem:[#allocation25_spill] sm:$0xff] %v4259_v32  ;;  %v1173_v18 = vsel %vm1170_vm15, %v1172_v35, %v1168_v59  ;;  %v1817_v24 = vmul.f32 %v4255_v61, %v4255_v61  ;;  %vm1206_vm0 = vweird.f32 %v4239_v28  ;;  %v1211_v56 = vand.u32 2147483648, %v4213_v26 }
 0x1cb   : > { %v1174_v52 = vmul.f32 %v1173_v18, %v3942_v54  ;;  %v1204_v3 = vadd.f32 %v4239_v28, %v1203_v63  ;;  %2891 = vrcp.f32 %v4262_v30  ;;  %v1741_v0 = vmul.f32 %v1740_v21, %v4229_v6 }
 0x1cc   : > { %v4273_v44 = vmul.f32 0.70710677, %v4259_v32  ;;  %vm1205_vm1 = vweird.f32 %v4213_v26  ;;  %v1209_v48 = vand.u32 2147483647, %v4213_v26  ;;  %v1588_v7 = vadd.f32 1.1283791, %v1587_v17 }
 0x1cd   : > { %v2616_v14 = vclamps-f32 %v1174_v52, 1.0  ;;  %v1986_v33 = vadd.f32 1.0, %v2614_v50  ;;  %vm4277_vm2 = vmor %vm1205_vm1, %vm1206_vm0  ;;  %v1236_v63 = vmul.f32 %v1235_v25, %v3654_v34  ;;  %v1667_v18 = vmul.f32 %v1666_v57, %v4106_v51  ;;  %v4898_v25 = vld [vmem:[#allocation27_spill] sm:$0xff] }
 0x1ce   : > { %v1706_v36 = vadd.f32 0.18741608, %v1705_v38  ;;  %v1781_v45 = vmul.f32 %v1780_v4, %v4233_v20  ;;  %v1208_v31 = vsel %vm4277_vm2, %v4239_v28, %v1204_v3  ;;  %v4287_v26 = vmin.f32 %v1817_v24, 16.0  ;;  %v4899_v4 = vld [vmem:[#allocation31_spill] sm:$0xff] }
 0x1cf   : > { %v1988_v5 = vadd.f32 1.0, %v2616_v14  ;;  %v1212_v17 = vor.u32 1.1754944e-38, %v1211_v56  ;;  %v1350_v50 = vmul.f32 3.8918573e-05, %v3760_v47  ;;  %v1742_v35 = vadd.f32 0.0036580483, %v1741_v0 }
 0x1d0   : > { %v1857_v21 = vmul.f32 %v4273_v44, %v4273_v44  ;;  %vm1210_vm3 = vcmp.eq.f32.partialorder %v1209_v48, 8.507059e+37  ;;  %v1314_v57 = vmul.f32 %v1313_v15, %v3733_v29  ;;  %v2018_v59 = vmul.f32 %v1986_v33, %v4898_v25 }
 0x1d1   : > { %v2892_v38 = vpop.eup %2891  ;;  %v2020_v52 = vmul.f32 %v1988_v5, %v4899_v4  ;;  %v1213_v54 = vsel %vm1210_vm3, %v1212_v17, %v1208_v31  ;;  %v1237_v28 = vadd.f32 0.4994258, %v1236_v63  ;;  %v4296_v24 = vmul.f32 %v1588_v7, %v4048_v23 }
 0x1d2   : > { %v1628_v3 = vadd.f32 1.1283791, %v4242_v27  ;;  %v1782_v56 = vadd.f32 0.0036580483, %v1781_v45  ;;  %v1281_v0 = vmul.f32 %v2892_v38, %v4262_v30  ;;  %v1668_v14 = vadd.f32 1.1283791, %v1667_v18 }
 0x1d3   : > { %v1707_v48 = vmul.f32 %v1706_v36, %v4147_v11  ;;  %v2062_v32 = vpack.c.bf16 %v2020_v52, %v2018_v59  ;;  %v1819_v15 = vmul.f32 2.1237322e-06, %v4287_v26  ;;  %v1743_v33 = vmul.f32 %v1742_v35, %v4229_v6 }
 0x1d4   : > { %v4303_v25 = vmin.f32 %v1857_v21, 16.0  ;;  %v1214_v63 = vmul.f32 %v1213_v54, %v3947_v22  ;;  %v1282_v31 = vsub.f32 1.0, %v1281_v0  ;;  %v1291_v23 = vand.u32 2147483648, %v4262_v30 }
 0x1d5   : > { %2236 = vmatmul.bf16.gmra.mxu3 %v2062_v32  ;;  %v1238_v27 = vmul.f32 %v1237_v28, %v3654_v34  ;;  %v1315_v7 = vadd.f32 0.112945676, %v1314_v57  ;;  %v1351_v45 = vadd.f32 0.001143296, %v1350_v50  ;;  %v1783_v18 = vmul.f32 %v1782_v56, %v4233_v20 }
 0x1d6   : > { %v1283_v36 = vmul.f32 %v2892_v38, %v1282_v31  ;;  %vm1286_vm4 = vweird.f32 %v2892_v38  ;;  %v1289_v5 = vand.u32 2147483647, %v4262_v30  ;;  %v1430_v32 = vmul.f32 3.8918573e-05, %v3901_v53 }
 0x1d7   : > { %v4310_v17 = vadd.f32 1.0, %v1238_v27  ;;  %v1316_v35 = vmul.f32 %v1315_v7, %v3733_v29  ;;  %v1352_v22 = vmul.f32 %v1351_v45, %v3760_v47  ;;  %v1820_v21 = vadd.f32 0.00028619796, %v1819_v15 }
 0x1d8   : > { %v1859_v59 = vmul.f32 2.1237322e-06, %v4303_v25  ;;  %v1284_v34 = vadd.f32 %v2892_v38, %v1283_v36  ;;  %vm1285_vm5 = vweird.f32 %v4262_v30  ;;  %v1744_v50 = vadd.f32 0.05243302, %v1743_v33 }
 0x1d9   : > { %v2617_v57 = vclamps-f32 %v1214_v63, 1.0  ;;  %vm1287_vm6 = vmor %vm1285_vm5, %vm1286_vm4  ;;  %v1292_v4 = vor.u32 1.1754944e-38, %v1291_v23  ;;  %2893 = vrcp.f32 %v4310_v17  ;;  %v1708_v52 = vadd.f32 1.1283791, %v1707_v48 }
 0x1da   : > { %v1288_v54 = vsel %vm1287_vm6, %v2892_v38, %v1284_v34  ;;  %vm1290_vm7 = vcmp.eq.f32.partialorder %v1289_v5, 8.507059e+37  ;;  %v1317_v28 = vadd.f32 0.4994258, %v1316_v35  ;;  %v4319_v56 = vmul.f32 %v1628_v3, %v4051_v46 }
 0x1db   : > { %v1293_v0 = vsel %vm1290_vm7, %v1292_v4, %v1288_v54  ;;  %v1353_v15 = vadd.f32 0.014752088, %v1352_v22  ;;  %v1431_v31 = vadd.f32 0.001143296, %v1430_v32  ;;  %v1784_v27 = vadd.f32 0.05243302, %v1783_v18 }
 0x1dc   : > { %v1821_v7 = vmul.f32 %v1820_v21, %v4287_v26  ;;  %v1294_v30 = vmul.f32 %v1293_v0, %v3960_v8  ;;  %v1318_v33 = vmul.f32 %v1317_v28, %v3733_v29  ;;  %v1745_v63 = vmul.f32 %v1744_v50, %v4229_v6  ;;  %v4901_v50 = vld [vmem:[#allocation37_spill] sm:$0xff]  ;;  %v630_v0 = vpop.f32.mrf.mxu1 }
 0x1dd   : > { %v1860_v23 = vadd.f32 0.00028619796, %v1859_v59  ;;  %v1989_v48 = vadd.f32 1.0, %v2617_v57  ;;  %v1354_v38 = vmul.f32 %v1353_v15, %v3760_v47  ;;  %v4327_v45 = vmul.f32 %v1668_v14, %v4087_v41 }
 0x1de   : > { %v4330_v46 = vmul.f32 %v1708_v52, %v4109_v39  ;;  %v2619_v3 = vclamps-f32 %v1294_v30, 1.0  ;;  %v4332_v18 = vadd.f32 1.0, %v1318_v33  ;;  %v4335_v8 = vmul.f32 0.5, %v4189_v62  ;;  %v581_v39 = vpop.f32.mrf.mxu0  ;;  %v4900_v62 = vld [vmem:[#allocation33_spill] sm:$0xff] }
 0x1df   : > { %v2894_v36 = vpop.eup %2893  ;;  %v4338_v29 = vmul.f32 0.5, %v4192_v49  ;;  %v1355_v5 = vadd.f32 0.112945676, %v1354_v38  ;;  %v1432_v35 = vmul.f32 %v1431_v31, %v3901_v53  ;;  %v1785_v22 = vmul.f32 %v1784_v27, %v4233_v20 }
 0x1e0   : > { %v1991_v41 = vadd.f32 1.0, %v2619_v3  ;;  %v1241_v14 = vmul.f32 %v2894_v36, %v4310_v17  ;;  %2895 = vrcp.f32 %v4332_v18  ;;  %v1746_v32 = vadd.f32 0.18741608, %v1745_v63 }
 0x1e1   : > { %v1822_v21 = vadd.f32 0.0036580483, %v1821_v7  ;;  %v1861_v59 = vmul.f32 %v1860_v23, %v4303_v25  ;;  %v2021_v34 = vmul.f32 %v1989_v48, %v4900_v62  ;;  %v1249_v4 = vand.u32 2147483647, %v4310_v17 }
 0x1e2   : > { %v2023_v49 = vmul.f32 %v1991_v41, %v4901_v50  ;;  %v1242_v57 = vsub.f32 1.0, %v1241_v14  ;;  %v1356_v52 = vmul.f32 %v1355_v5, %v3760_v47  ;;  %v1251_v54 = vand.u32 2147483648, %v4310_v17 }
 0x1e3   : > { %v4351_v28 = vadd.f32 %v581_v39, %v3407_v58  ;;  %v1433_v15 = vadd.f32 0.014752088, %v1432_v35  ;;  %v1390_v31 = vmul.f32 3.8918573e-05, %v3795_v12  ;;  %vm1246_vm8 = vweird.f32 %v2894_v36 }
 0x1e4   : > { %v2063_v27 = vpack.c.bf16 %v2023_v49, %v2021_v34  ;;  %v1243_v7 = vmul.f32 %v2894_v36, %v1242_v57  ;;  %v1357_v30 = vadd.f32 0.4994258, %v1356_v52  ;;  %v1786_v33 = vadd.f32 0.18741608, %v1785_v22 }
 0x1e5   : > { %v1823_v63 = vmul.f32 %v1822_v21, %v4287_v26  ;;  %v1862_v23 = vadd.f32 0.0036580483, %v1861_v59  ;;  %v1434_v48 = vmul.f32 %v1433_v15, %v3901_v53  ;;  %vm1245_vm9 = vweird.f32 %v4310_v17 }
 0x1e6   : > { %v2896_v38 = vpop.eup %2895  ;;  %2192 = vmatmul.bf16.gmra.mxu2 %v2063_v27  ;;  %v1244_v3 = vadd.f32 %v2894_v36, %v1243_v7  ;;  %v4358_v58 = vadd.f32 %v630_v0, %v3409_v60  ;;  %v1358_v5 = vmul.f32 %v1357_v30, %v3760_v47  ;;  %vm1247_vm10 = vmor %vm1245_vm9, %vm1246_vm8  ;;  %v1252_v35 = vor.u32 1.1754944e-38, %v1251_v54 }
 0x1e7   : > { %v1321_v41 = vmul.f32 %v2896_v38, %v4332_v18  ;;  %v4363_v22 = vmul.f32 0.70710677, %v4351_v28  ;;  %v1435_v14 = vadd.f32 0.112945676, %v1434_v48  ;;  %vm1250_vm11 = vcmp.eq.f32.partialorder %v1249_v4, 8.507059e+37 }
 0x1e8   : > { %v1248_v39 = vsel %vm1247_vm10, %v2894_v36, %v1244_v3  ;;  %v4365_v21 = vadd.f32 1.0, %v1358_v5  ;;  %v1391_v59 = vadd.f32 0.001143296, %v1390_v31  ;;  %v1747_v17 = vmul.f32 %v1746_v32, %v4229_v6 }
 0x1e9   : > { %v1253_v62 = vsel %vm1250_vm11, %v1252_v35, %v1248_v39  ;;  %v1322_v60 = vsub.f32 1.0, %v1321_v41  ;;  %v1436_v34 = vmul.f32 %v1435_v14, %v3901_v53  ;;  %v1329_v47 = vand.u32 2147483647, %v4332_v18 }
 0x1ea   : > { %v1331_v50 = vand.u32 2147483648, %v4332_v18  ;;  %v4372_v49 = vmul.f32 0.70710677, %v4358_v58  ;;  %2897 = vrcp.f32 %v4365_v21  ;;  %v1254_v36 = vmul.f32 %v1253_v62, %v3951_v42 }
 0x1eb   : > { %v1323_v57 = vmul.f32 %v2896_v38, %v1322_v60  ;;  %vm1326_vm12 = vweird.f32 %v2896_v38  ;;  %v1897_v32 = vmul.f32 %v4363_v22, %v4363_v22  ;;  %v1787_v4 = vmul.f32 %v1786_v33, %v4233_v20 }
 0x1ec   : > { %v1437_v52 = vadd.f32 0.4994258, %v1436_v34  ;;  %v1392_v54 = vmul.f32 %v1391_v59, %v3795_v12  ;;  %v1470_v0 = vmul.f32 3.8918573e-05, %v3930_v10  ;;  %v1824_v15 = vadd.f32 0.05243302, %v1823_v63 }
 0x1ed   : > { %v1863_v31 = vmul.f32 %v1862_v23, %v4303_v25  ;;  %v1324_v27 = vadd.f32 %v2896_v38, %v1323_v57  ;;  %vm1325_vm13 = vweird.f32 %v4332_v18  ;;  %v1332_v42 = vor.u32 1.1754944e-38, %v1331_v50  ;;  %v4902_v59 = vld [vmem:[#allocation20_spill] sm:$0xff] }
 0x1ee   : > { %vm1327_vm14 = vmor %vm1325_vm13, %vm1326_vm12  ;;  %v1937_v7 = vmul.f32 %v4372_v49, %v4372_v49  ;;  %v1438_v30 = vmul.f32 %v1437_v52, %v3901_v53  ;;  %v1510_v33 = vmul.f32 3.8918573e-05, %v3944_v1  ;;  %v2618_v48 = vclamps-f32 %v1254_v36, 1.0 }
 0x1ef   : > { %v1328_v3 = vsel %vm1327_vm14, %v2896_v38, %v1324_v27  ;;  %vm1330_vm15 = vcmp.eq.f32.partialorder %v1329_v47, 8.507059e+37  ;;  %v4387_v5 = vmin.f32 %v1897_v32, 16.0  ;;  %v1393_v41 = vadd.f32 0.014752088, %v1392_v54 }
 0x1f0   : > { %v2898_v63 = vpop.eup %2897  ;;  %v1333_v35 = vsel %vm1330_vm15, %v1332_v42, %v1328_v3  ;;  %v4389_v23 = vadd.f32 1.0, %v1438_v30  ;;  %v1471_v18 = vadd.f32 0.001143296, %v1470_v0  ;;  %v4391_v14 = vadd.f32 1.1283791, %v1747_v17  ;;  %v4903_v30 = vld [vmem:[#allocation34_spill] sm:$0xff] }
 0x1f1   : > { %v4393_v39 = vadd.f32 1.1283791, %v1787_v4  ;;  %v1334_v62 = vmul.f32 %v1333_v35, %v4902_v59  ;;  %v1361_v53 = vmul.f32 %v2898_v63, %v4365_v21  ;;  %v4398_v60 = vmul.f32 %v1824_v15, %v4287_v26 }
 0x1f2   : > { %v4400_v38 = vadd.f32 0.05243302, %v1863_v31  ;;  %2899 = vrcp.f32 %v4389_v23  ;;  %v1511_v34 = vadd.f32 0.001143296, %v1510_v33  ;;  %v1990_v50 = vadd.f32 1.0, %v2618_v48  ;;  %v4904_v48 = vld [vmem:[#allocation39_spill] sm:$0xff] }
 0x1f3   : > { %v2620_v47 = vclamps-f32 %v1334_v62, 1.0  ;;  %v1362_v36 = vsub.f32 1.0, %v1361_v53  ;;  %v1371_v17 = vand.u32 2147483648, %v4365_v21  ;;  %v4405_v57 = vmul.f32 2.1237322e-06, %v4387_v5 }
 0x1f4   : > { %v4407_v32 = vmin.f32 %v1937_v7, 16.0  ;;  %v1394_v4 = vmul.f32 %v1393_v41, %v3795_v12  ;;  %v1472_v52 = vmul.f32 %v1471_v18, %v3930_v10  ;;  %vm1366_vm0 = vweird.f32 %v2898_v63 }
 0x1f5   : > { %v1992_v54 = vadd.f32 1.0, %v2620_v47  ;;  %v1363_v0 = vmul.f32 %v2898_v63, %v1362_v36  ;;  %v1369_v15 = vand.u32 2147483647, %v4365_v21  ;;  %vm1365_vm1 = vweird.f32 %v4365_v21 }
 0x1f6   : > { %v1395_v31 = vadd.f32 0.112945676, %v1394_v4  ;;  %v1473_v27 = vadd.f32 0.014752088, %v1472_v52  ;;  %v1512_v42 = vmul.f32 %v1511_v34, %v3944_v1  ;;  %v2022_v33 = vmul.f32 %v1990_v50, %v4903_v30  ;;  %vm1367_vm2 = vmor %vm1365_vm1, %vm1366_vm0  ;;  %v4905_v52 = vld [vmem:[#allocation22_spill] sm:$0xff] }
 0x1f7   : > { %v2024_v7 = vmul.f32 %v1992_v54, %v4904_v48  ;;  %v1364_v3 = vadd.f32 %v2898_v63, %v1363_v0  ;;  %v1372_v35 = vor.u32 1.1754944e-38, %v1371_v17  ;;  %v1590_v53 = vmul.f32 3.8918573e-05, %v4081_v43 }
 0x1f8   : > { %v2900_v41 = vpop.eup %2899  ;;  %v1396_v18 = vmul.f32 %v1395_v31, %v3795_v12  ;;  %v1474_v59 = vmul.f32 %v1473_v27, %v3930_v10  ;;  %v1513_v62 = vadd.f32 0.014752088, %v1512_v42  ;;  %vm1370_vm3 = vcmp.eq.f32.partialorder %v1369_v15, 8.507059e+37 }
 0x1f9   : > { %v2064_v21 = vpack.c.bf16 %v2024_v7, %v2022_v33  ;;  %v1368_v47 = vsel %vm1367_vm2, %v2898_v63, %v1364_v3  ;;  %v1441_v34 = vmul.f32 %v2900_v41, %v4389_v23  ;;  %v1449_v50 = vand.u32 2147483647, %v4389_v23 }
 0x1fa   : > { %v1373_v36 = vsel %vm1370_vm3, %v1372_v35, %v1368_v47  ;;  %v1451_v4 = vand.u32 2147483648, %v4389_v23  ;;  %v1397_v17 = vadd.f32 0.4994258, %v1396_v18  ;;  %v1475_v31 = vadd.f32 0.112945676, %v1474_v59 }
 0x1fb   : > { %2241 = vmatmul.bf16.gmra.mxu3 %v2064_v21  ;;  %v1374_v54 = vmul.f32 %v1373_v36, %v4905_v52  ;;  %v1442_v0 = vsub.f32 1.0, %v1441_v34  ;;  %v1514_v27 = vmul.f32 %v1513_v62, %v3944_v1  ;;  %vm1446_vm4 = vweird.f32 %v2900_v41 }
 0x1fc   : > { %v1398_v42 = vmul.f32 %v1397_v17, %v3795_v12  ;;  %v1591_v63 = vadd.f32 0.001143296, %v1590_v53  ;;  %v1550_v15 = vmul.f32 3.8918573e-05, %v3991_v55  ;;  %v1476_v33 = vmul.f32 %v1475_v31, %v3930_v10 }
 0x1fd   : > { %v1443_v30 = vmul.f32 %v2900_v41, %v1442_v0  ;;  %v1515_v48 = vadd.f32 0.112945676, %v1514_v27  ;;  %v1630_v7 = vmul.f32 3.8918573e-05, %v4083_v37  ;;  %v2621_v3 = vclamps-f32 %v1374_v54, 1.0 }
 0x1fe   : > { %vm1445_vm5 = vweird.f32 %v4389_v23  ;;  %v4429_v35 = vadd.f32 1.0, %v1398_v42  ;;  %v1592_v18 = vmul.f32 %v1591_v63, %v4081_v43  ;;  %v1477_v62 = vadd.f32 0.4994258, %v1476_v33 }
 0x1ff   : > { %v1444_v59 = vadd.f32 %v2900_v41, %v1443_v30  ;;  %v1516_v12 = vmul.f32 %v1515_v48, %v3944_v1  ;;  %v1551_v53 = vadd.f32 0.001143296, %v1550_v15  ;;  %v1939_v21 = vmul.f32 2.1237322e-06, %v4407_v32  ;;  %vm1447_vm6 = vmor %vm1445_vm5, %vm1446_vm4 }
 0x200   : > { %vm1450_vm7 = vcmp.eq.f32.partialorder %v1449_v50, 8.507059e+37  ;;  %v1452_v47 = vor.u32 1.1754944e-38, %v1451_v4  ;;  %2901 = vrcp.f32 %v4429_v35  ;;  %v1478_v23 = vmul.f32 %v1477_v62, %v3930_v10 }
 0x201   : > { %v1448_v34 = vsel %vm1447_vm6, %v2900_v41, %v1444_v59  ;;  %v1517_v36 = vadd.f32 0.4994258, %v1516_v12  ;;  %v1631_v17 = vadd.f32 0.001143296, %v1630_v7  ;;  %v1993_v54 = vadd.f32 1.0, %v2621_v3  ;;  %v4906_v7 = vld [vmem:[#allocation41_spill] sm:$0xff] }
 0x202   : > { %v1453_v52 = vsel %vm1450_vm7, %v1452_v47, %v1448_v34  ;;  %v1409_v0 = vand.u32 2147483647, %v4429_v35  ;;  %v1593_v31 = vadd.f32 0.014752088, %v1592_v18  ;;  %v4439_v42 = vadd.f32 1.0, %v1478_v23 }
 0x203   : > { %v1454_v27 = vmul.f32 %v1453_v52, %v4124_v13  ;;  %v1518_v63 = vmul.f32 %v1517_v36, %v3944_v1  ;;  %v1552_v50 = vmul.f32 %v1551_v53, %v3991_v55  ;;  %v4445_v41 = vmul.f32 %v4391_v14, %v4205_v16 }
 0x204   : > { %v4448_v10 = vadd.f32 0.00028619796, %v4405_v57  ;;  %v1411_v4 = vand.u32 2147483648, %v4429_v35  ;;  %v1594_v15 = vmul.f32 %v1593_v31, %v4081_v43  ;;  %v4452_v30 = vadd.f32 0.00028619796, %v1939_v21  ;;  %v4909_v21 = vld [vmem:[#allocation28_spill] sm:$0xff] }
 0x205   : > { %v2623_v13 = vclamps-f32 %v1454_v27, 1.0  ;;  %vm1405_vm8 = vweird.f32 %v4429_v35  ;;  %2903 = vrcp.f32 %v4439_v42  ;;  %v4456_v33 = vadd.f32 1.0, %v1518_v63 }
 0x206   : > { %v2902_v1 = vpop.eup %2901  ;;  %v1595_v48 = vadd.f32 0.112945676, %v1594_v15  ;;  %v1553_v16 = vadd.f32 0.014752088, %v1552_v50  ;;  %v1632_v14 = vmul.f32 %v1631_v17, %v4083_v37  ;;  %v2025_v3 = vmul.f32 %v1993_v54, %v4906_v7 }
 0x207   : > { %v1995_v57 = vadd.f32 1.0, %v2623_v13  ;;  %v1401_v18 = vmul.f32 %v2902_v1, %v4429_v35  ;;  %vm4461_vm9 = vcmp.eq.f32.partialorder %v1409_v0, 8.507059e+37  ;;  %v1412_v62 = vor.u32 1.1754944e-38, %v1411_v4  ;;  %v4912_v35 = vld [vmem:[#allocation32_spill] sm:$0xff] }
 0x208   : > { %v1489_v12 = vand.u32 2147483647, %v4439_v42  ;;  %v1491_v53 = vand.u32 2147483648, %v4439_v42  ;;  %2905 = vrcp.f32 %v4456_v33  ;;  %v1596_v23 = vmul.f32 %v1595_v48, %v4081_v43 }
 0x209   : > { %v2027_v47 = vmul.f32 %v1995_v57, %v4909_v21  ;;  %v1402_v34 = vsub.f32 1.0, %v1401_v18  ;;  %v1670_v36 = vmul.f32 3.8918573e-05, %v4106_v51  ;;  %vm1485_vm10 = vweird.f32 %v4439_v42 }
 0x20a   : > { %v1554_v17 = vmul.f32 %v1553_v16, %v3991_v55  ;;  %v1633_v52 = vadd.f32 0.014752088, %v1632_v14  ;;  %v1750_v54 = vmul.f32 3.8918573e-05, %v4229_v6  ;;  %vm1406_vm11 = vweird.f32 %v2902_v1 }
 0x20b   : > { %v2904_v0 = vpop.eup %2903  ;;  %v2065_v31 = vpack.c.bf16 %v2027_v47, %v2025_v3  ;;  %v1403_v27 = vmul.f32 %v2902_v1, %v1402_v34  ;;  %v1597_v63 = vadd.f32 0.4994258, %v1596_v23  ;;  %vm4475_vm12 = vcmp.eq.f32.partialorder %v1489_v12, 8.507059e+37  ;;  %vm1407_vm14 = vmor %vm1405_vm8, %vm1406_vm11 }
 0x20c   : > { %v1481_v50 = vmul.f32 %v2904_v0, %v4439_v42  ;;  %v1492_v15 = vor.u32 1.1754944e-38, %v1491_v53  ;;  %v1555_v13 = vadd.f32 0.112945676, %v1554_v17  ;;  %v1634_v48 = vmul.f32 %v1633_v52, %v4083_v37 }
 0x20d   : > { %2197 = vmatmul.bf16.gmra.mxu2 %v2065_v31  ;;  %v1404_v16 = vadd.f32 %v2902_v1, %v1403_v27  ;;  %vm1525_vm13 = vweird.f32 %v4456_v33  ;;  %v1529_v14 = vand.u32 2147483647, %v4456_v33  ;;  %v1531_v57 = vand.u32 2147483648, %v4456_v33 }
 0x20e   : > { %v1598_v7 = vmul.f32 %v1597_v63, %v4081_v43  ;;  %v2906_v3 = vpop.eup %2905  ;;  %v1482_v18 = vsub.f32 1.0, %v1481_v50  ;;  %v1556_v12 = vmul.f32 %v1555_v13, %v3991_v55  ;;  %v1635_v53 = vadd.f32 0.112945676, %v1634_v48 }
 0x20f   : > { %v1671_v21 = vadd.f32 0.001143296, %v1670_v36  ;;  %v1408_v47 = vsel %vm1407_vm14, %v2902_v1, %v1404_v16  ;;  %vm1486_vm15 = vweird.f32 %v2904_v0  ;;  %v1521_v34 = vmul.f32 %v2906_v3, %v4456_v33 }
 0x210   : > { %v4488_v23 = vadd.f32 1.0, %v1598_v7  ;;  %v1413_v17 = vsel %vm4461_vm9, %v1412_v62, %v1408_v47  ;;  %v1483_v52 = vmul.f32 %v2904_v0, %v1482_v18  ;;  %v1557_v43 = vadd.f32 0.4994258, %v1556_v12  ;;  %vm1487_vm1 = vmor %vm1485_vm10, %vm1486_vm15 }
 0x211   : > { %v1636_v31 = vmul.f32 %v1635_v53, %v4083_v37  ;;  %v1414_v27 = vmul.f32 %v1413_v17, %v4912_v35  ;;  %v1522_v63 = vsub.f32 1.0, %v1521_v34  ;;  %vm4494_vm0 = vcmp.eq.f32.partialorder %v1529_v14, 8.507059e+37 }
 0x212   : > { %2907 = vrcp.f32 %v4488_v23  ;;  %v1484_v1 = vadd.f32 %v2904_v0, %v1483_v52  ;;  %v1532_v36 = vor.u32 1.1754944e-38, %v1531_v57  ;;  %v1558_v13 = vmul.f32 %v1557_v43, %v3991_v55 }
 0x213   : > { %v1672_v59 = vmul.f32 %v1671_v21, %v4106_v51  ;;  %v2622_v62 = vclamps-f32 %v1414_v27, 1.0  ;;  %v1523_v48 = vmul.f32 %v2906_v3, %v1522_v63  ;;  %vm1526_vm2 = vweird.f32 %v2906_v3  ;;  %v4917_v27 = vld [vmem:[#allocation42_spill] sm:$0xff] }
 0x214   : > { %v1637_v16 = vadd.f32 0.4994258, %v1636_v31  ;;  %v1488_v14 = vsel %vm1487_vm1, %v2904_v0, %v1484_v1  ;;  %v1609_v7 = vand.u32 2147483647, %v4488_v23  ;;  %v1611_v18 = vand.u32 2147483648, %v4488_v23  ;;  %vm1527_vm3 = vmor %vm1525_vm13, %vm1526_vm2 }
 0x215   : > { %v4506_v12 = vadd.f32 1.0, %v1558_v13  ;;  %v1493_v55 = vsel %vm4475_vm12, %v1492_v15, %v1488_v14  ;;  %v1524_v57 = vadd.f32 %v2906_v3, %v1523_v48  ;;  %v1751_v21 = vadd.f32 0.001143296, %v1750_v54 }
 0x216   : > { %v1638_v53 = vmul.f32 %v1637_v16, %v4083_v37  ;;  %v1494_v42 = vmul.f32 %v1493_v55, %v4140_v19  ;;  %v1994_v47 = vadd.f32 1.0, %v2622_v62  ;;  %v1710_v0 = vmul.f32 3.8918573e-05, %v4147_v11  ;;  %v4918_v62 = vld [vmem:[#allocation35_spill] sm:$0xff] }
 0x217   : > { %2909 = vrcp.f32 %v4506_v12  ;;  %v1528_v17 = vsel %vm1527_vm3, %v2906_v3, %v1524_v57  ;;  %vm1605_vm4 = vweird.f32 %v4488_v23  ;;  %v1673_v15 = vadd.f32 0.014752088, %v1672_v59 }
 0x218   : > { %v2908_v34 = vpop.eup %2907  ;;  %v4517_v4 = vadd.f32 1.0, %v1638_v53  ;;  %v2624_v52 = vclamps-f32 %v1494_v42, 1.0  ;;  %v1533_v37 = vsel %vm4494_vm0, %v1532_v36, %v1528_v17  ;;  %vm4522_vm5 = vcmp.eq.f32.partialorder %v1609_v7, 8.507059e+37 }
 0x219   : > { %v1601_v19 = vmul.f32 %v2908_v34, %v4488_v23  ;;  %v1612_v54 = vor.u32 1.1754944e-38, %v1611_v18  ;;  %v1534_v43 = vmul.f32 %v1533_v37, %v4156_v40  ;;  %v1569_v3 = vand.u32 2147483647, %v4506_v12 }
 0x21a   : > { %v1571_v31 = vand.u32 2147483648, %v4506_v12  ;;  %2911 = vrcp.f32 %v4517_v4  ;;  %v1996_v35 = vadd.f32 1.0, %v2624_v52  ;;  %v2026_v63 = vmul.f32 %v1994_v47, %v4917_v27 }
 0x21b   : > { %v1602_v50 = vsub.f32 1.0, %v1601_v19  ;;  %vm1606_vm6 = vweird.f32 %v2908_v34  ;;  %v2625_v1 = vclamps-f32 %v1534_v43, 1.0  ;;  %vm1565_vm7 = vweird.f32 %v4506_v12 }
 0x21c   : > { %v1651_v36 = vand.u32 2147483648, %v4517_v4  ;;  %v1674_v13 = vmul.f32 %v1673_v15, %v4106_v51  ;;  %v1752_v40 = vmul.f32 %v1751_v21, %v4229_v6  ;;  %v2028_v48 = vmul.f32 %v1996_v35, %v4918_v62  ;;  %vm1607_vm11 = vmor %vm1605_vm4, %vm1606_vm6 }
 0x21d   : > { %v2910_v59 = vpop.eup %2909  ;;  %v1603_v16 = vmul.f32 %v2908_v34, %v1602_v50  ;;  %v1649_v14 = vand.u32 2147483647, %v4517_v4  ;;  %v1711_v7 = vadd.f32 0.001143296, %v1710_v0  ;;  %v1997_v18 = vadd.f32 1.0, %v2625_v1 }
 0x21e   : > { %v1561_v55 = vmul.f32 %v2910_v59, %v4506_v12  ;;  %vm1566_vm8 = vweird.f32 %v2910_v59  ;;  %vm4538_vm9 = vcmp.eq.f32.partialorder %v1569_v3, 8.507059e+37  ;;  %v1572_v53 = vor.u32 1.1754944e-38, %v1571_v31 }
 0x21f   : > { %v2066_v42 = vpack.c.bf16 %v2028_v48, %v2026_v63  ;;  %v1604_v47 = vadd.f32 %v2908_v34, %v1603_v16  ;;  %vm1645_vm10 = vweird.f32 %v4517_v4  ;;  %v1675_v21 = vadd.f32 0.112945676, %v1674_v13  ;;  %vm1567_vm14 = vmor %vm1565_vm7, %vm1566_vm8 }
 0x220   : > { %v1753_v17 = vadd.f32 0.014752088, %v1752_v40  ;;  %v2912_v15 = vpop.eup %2911  ;;  %v1562_v0 = vsub.f32 1.0, %v1561_v55  ;;  %v1652_v52 = vor.u32 1.1754944e-38, %v1651_v36  ;;  %v1712_v37 = vmul.f32 %v1711_v7, %v4147_v11 }
 0x221   : > { %v1790_v19 = vmul.f32 3.8918573e-05, %v4233_v20  ;;  %2246 = vmatmul.bf16.gmra.mxu3 %v2066_v42  ;;  %v1608_v43 = vsel %vm1607_vm11, %v2908_v34, %v1604_v47  ;;  %v1641_v3 = vmul.f32 %v2912_v15, %v4517_v4  ;;  %vm1646_vm12 = vweird.f32 %v2912_v15 }
 0x222   : > { %vm4549_vm13 = vcmp.eq.f32.partialorder %v1649_v14, 8.507059e+37  ;;  %v1676_v35 = vmul.f32 %v1675_v21, %v4106_v51  ;;  %v1613_v23 = vsel %vm4522_vm5, %v1612_v54, %v1608_v43  ;;  %v1563_v27 = vmul.f32 %v2910_v59, %v1562_v0  ;;  %vm1647_vm15 = vmor %vm1645_vm10, %vm1646_vm12 }
 0x223   : > { %v1754_v63 = vmul.f32 %v1753_v17, %v4229_v6  ;;  %v1713_v50 = vadd.f32 0.014752088, %v1712_v37  ;;  %v1614_v1 = vmul.f32 %v1613_v23, %v4296_v24  ;;  %v1642_v36 = vsub.f32 1.0, %v1641_v3  ;;  %v4923_v24 = vld [vmem:[#allocation40_spill] sm:$0xff] }
 0x224   : > { %v1677_v34 = vadd.f32 0.4994258, %v1676_v35  ;;  %v1791_v13 = vadd.f32 0.001143296, %v1790_v19  ;;  %v1564_v40 = vadd.f32 %v2910_v59, %v1563_v27  ;;  %v1830_v16 = vmul.f32 3.8918573e-05, %v4287_v26 }
 0x225   : > { %v1755_v62 = vadd.f32 0.112945676, %v1754_v63  ;;  %v1714_v48 = vmul.f32 %v1713_v50, %v4147_v11  ;;  %v2627_v14 = vclamps-f32 %v1614_v1, 1.0  ;;  %v1643_v33 = vmul.f32 %v2912_v15, %v1642_v36 }
 0x226   : > { %v1678_v54 = vmul.f32 %v1677_v34, %v4106_v51  ;;  %v1792_v7 = vmul.f32 %v1791_v13, %v4233_v20  ;;  %v2029_v55 = vmul.f32 %v1997_v18, %v4923_v24  ;;  %v1568_v42 = vsel %vm1567_vm14, %v2910_v59, %v1564_v40 }
 0x227   : > { %v1756_v47 = vmul.f32 %v1755_v62, %v4229_v6  ;;  %v1715_v21 = vadd.f32 0.112945676, %v1714_v48  ;;  %v1999_v17 = vadd.f32 1.0, %v2627_v14  ;;  %v1573_v0 = vsel %vm4538_vm9, %v1572_v53, %v1568_v42 }
 0x228   : > { %v1644_v37 = vadd.f32 %v2912_v15, %v1643_v33  ;;  %v4569_v19 = vadd.f32 1.0, %v1678_v54  ;;  %v1574_v12 = vmul.f32 %v1573_v0, %v4172_v9  ;;  %v1793_v59 = vadd.f32 0.014752088, %v1792_v7  ;;  %v4925_v33 = vld [vmem:[#allocation21_spill] sm:$0xff]  ;;  %v4926_v7 = vld [vmem:[#allocation24_spill] sm:$0xff] }
 0x229   : > { %v1757_v51 = vadd.f32 0.4994258, %v1756_v47  ;;  %v1716_v18 = vmul.f32 %v1715_v21, %v4147_v11  ;;  %v2031_v43 = vmul.f32 %v1999_v17, %v4177_v2  ;;  %v1831_v57 = vadd.f32 0.001143296, %v1830_v16 }
 0x22a   : > { %v1648_v3 = vsel %vm1647_vm15, %v2912_v15, %v1644_v37  ;;  %2913 = vrcp.f32 %v4569_v19  ;;  %v1901_v53 = vmul.f32 %v4448_v10, %v4387_v5  ;;  %v1941_v9 = vmul.f32 %v4452_v30, %v4407_v32  ;;  %v4924_v15 = vld [vmem:[#allocation19_spill] sm:$0xff] }
 0x22b   : > { %v2626_v35 = vclamps-f32 %v1574_v12, 1.0  ;;  %v1653_v4 = vsel %vm4549_vm13, %v1652_v52, %v1648_v3  ;;  %v2067_v23 = vpack.c.bf16 %v2031_v43, %v2029_v55  ;;  %v1758_v63 = vmul.f32 %v1757_v51, %v4229_v6 }
 0x22c   : > { %v1654_v27 = vmul.f32 %v1653_v4, %v4319_v56  ;;  %v1717_v2 = vadd.f32 0.4994258, %v1716_v18  ;;  %v4588_v50 = vmul.f32 %v4393_v39, %v4924_v15  ;;  %v4591_v1 = vadd.f32 0.18741608, %v4398_v60 }
 0x22d   : > { %v1998_v10 = vadd.f32 1.0, %v2626_v35  ;;  %v1794_v30 = vmul.f32 %v1793_v59, %v4233_v20  ;;  %2202 = vmatmul.bf16.gmra.mxu2 %v2067_v23  ;;  %v4594_v31 = vadd.f32 1.0, %v1758_v63  ;;  %v1832_v56 = vmul.f32 %v1831_v57, %v4287_v26 }
 0x22e   : > { %v2628_v36 = vclamps-f32 %v1654_v27, 1.0  ;;  %v1718_v52 = vmul.f32 %v1717_v2, %v4147_v11  ;;  %v4600_v6 = vmul.f32 %v4400_v38, %v4303_v25  ;;  %v1902_v39 = vadd.f32 0.0036580483, %v1901_v53 }
 0x22f   : > { %v1942_v34 = vadd.f32 0.0036580483, %v1941_v9  ;;  %v1795_v13 = vadd.f32 0.112945676, %v1794_v30  ;;  %v1689_v62 = vand.u32 2147483647, %v4569_v19  ;;  %2915 = vrcp.f32 %v4594_v31 }
 0x230   : > { %v2914_v60 = vpop.eup %2913  ;;  %v2000_v40 = vadd.f32 1.0, %v2628_v36  ;;  %v1691_v48 = vand.u32 2147483648, %v4569_v19  ;;  %v4606_v11 = vadd.f32 1.0, %v1718_v52  ;;  %v1910_v14 = vmul.f32 3.8918573e-05, %v4387_v5 }
 0x231   : > { %v1681_v16 = vmul.f32 %v2914_v60, %v4569_v19  ;;  %v1870_v38 = vmul.f32 3.8918573e-05, %v4303_v25  ;;  %v2030_v54 = vmul.f32 %v1998_v10, %v4925_v33  ;;  %v1796_v55 = vmul.f32 %v1795_v13, %v4233_v20 }
 0x232   : > { %v2032_v24 = vmul.f32 %v2000_v40, %v4926_v7  ;;  %v1833_v42 = vadd.f32 0.014752088, %v1832_v56  ;;  %v4614_v47 = vmul.f32 %v1902_v39, %v4387_v5  ;;  %v4617_v21 = vmul.f32 %v1942_v34, %v4407_v32 }
 0x233   : > { %v1682_v17 = vsub.f32 1.0, %v1681_v16  ;;  %2917 = vrcp.f32 %v4606_v11  ;;  %vm1685_vm0 = vweird.f32 %v4569_v19  ;;  %vm1686_vm1 = vweird.f32 %v2914_v60 }
 0x234   : > { %v2068_v0 = vpack.c.bf16 %v2032_v24, %v2030_v54  ;;  %v1797_v37 = vadd.f32 0.4994258, %v1796_v55  ;;  %v1834_v51 = vmul.f32 %v1833_v42, %v4287_v26  ;;  %v1911_v18 = vadd.f32 0.001143296, %v1910_v14  ;;  %vm1687_vm4 = vmor %vm1685_vm0, %vm1686_vm1 }
 0x235   : > { %v1683_v12 = vmul.f32 %v2914_v60, %v1682_v17  ;;  %v1871_v59 = vadd.f32 0.001143296, %v1870_v38  ;;  %v2916_v43 = vpop.eup %2915  ;;  %vm4622_vm2 = vcmp.eq.f32.partialorder %v1689_v62, 8.507059e+37  ;;  %v1692_v57 = vor.u32 1.1754944e-38, %v1691_v48 }
 0x236   : > { %2251 = vmatmul.bf16.gmra.mxu3 %v2068_v0  ;;  %v1769_v53 = vand.u32 2147483647, %v4594_v31  ;;  %v1798_v9 = vmul.f32 %v1797_v37, %v4233_v20  ;;  %v1761_v4 = vmul.f32 %v2916_v43, %v4594_v31  ;;  %vm1765_vm3 = vweird.f32 %v4594_v31 }
 0x237   : > { %v1684_v35 = vadd.f32 %v2914_v60, %v1683_v12  ;;  %v1835_v23 = vadd.f32 0.112945676, %v1834_v51  ;;  %v1771_v27 = vand.u32 2147483648, %v4594_v31  ;;  %v1912_v2 = vmul.f32 %v1911_v18, %v4387_v5 }
 0x238   : > { %v4634_v63 = vadd.f32 1.0, %v1798_v9  ;;  %v1950_v15 = vmul.f32 3.8918573e-05, %v4407_v32  ;;  %v1762_v30 = vsub.f32 1.0, %v1761_v4  ;;  %v1872_v52 = vmul.f32 %v1871_v59, %v4303_v25 }
 0x239   : > { %v2918_v10 = vpop.eup %2917  ;;  %v1688_v20 = vsel %vm1687_vm4, %v2914_v60, %v1684_v35  ;;  %v1836_v36 = vmul.f32 %v1835_v23, %v4287_v26  ;;  %vm4642_vm5 = vcmp.eq.f32.partialorder %v1769_v53, 8.507059e+37  ;;  %vm1766_vm6 = vweird.f32 %v2916_v43 }
 0x23a   : > { %v1693_v56 = vsel %vm4622_vm2, %v1692_v57, %v1688_v20  ;;  %v1721_v39 = vmul.f32 %v2918_v10, %v4606_v11  ;;  %2919 = vrcp.f32 %v4634_v63  ;;  %v1763_v13 = vmul.f32 %v2916_v43, %v1762_v30  ;;  %vm1767_vm7 = vmor %vm1765_vm3, %vm1766_vm6 }
 0x23b   : > { %v1694_v34 = vmul.f32 %v1693_v56, %v4327_v45  ;;  %v1729_v60 = vand.u32 2147483647, %v4606_v11  ;;  %v1772_v40 = vor.u32 1.1754944e-38, %v1771_v27  ;;  %v1837_v48 = vadd.f32 0.4994258, %v1836_v36  ;;  %v4931_v56 = vld [vmem:[#allocation30_spill] sm:$0xff] }
 0x23c   : > { %v1722_v62 = vsub.f32 1.0, %v1721_v39  ;;  %v1913_v16 = vadd.f32 0.014752088, %v1912_v2  ;;  %v1764_v14 = vadd.f32 %v2916_v43, %v1763_v13  ;;  %v1731_v38 = vand.u32 2147483648, %v4606_v11 }
 0x23d   : > { %v1873_v33 = vadd.f32 0.014752088, %v1872_v52  ;;  %v1951_v54 = vadd.f32 0.001143296, %v1950_v15  ;;  %vm1726_vm8 = vweird.f32 %v2918_v10  ;;  %v1838_v45 = vmul.f32 %v1837_v48, %v4287_v26 }
 0x23e   : > { %v1723_v7 = vmul.f32 %v2918_v10, %v1722_v62  ;;  %v1914_v24 = vmul.f32 %v1913_v16, %v4387_v5  ;;  %v2629_v55 = vclamps-f32 %v1694_v34, 1.0  ;;  %v1768_v42 = vsel %vm1767_vm7, %v2916_v43, %v1764_v14 }
 0x23f   : > { %vm1725_vm9 = vweird.f32 %v4606_v11  ;;  %v1874_v17 = vmul.f32 %v1873_v33, %v4303_v25  ;;  %v1773_v37 = vsel %vm4642_vm5, %v1772_v40, %v1768_v42  ;;  %v4659_v51 = vadd.f32 1.0, %v1838_v45 }
 0x240   : > { %v2920_v0 = vpop.eup %2919  ;;  %v1724_v12 = vadd.f32 %v2918_v10, %v1723_v7  ;;  %v1915_v31 = vadd.f32 0.112945676, %v1914_v24  ;;  %v1774_v18 = vmul.f32 %v1773_v37, %v4445_v41  ;;  %vm1727_vm10 = vmor %vm1725_vm9, %vm1726_vm8  ;;  %v1732_v59 = vor.u32 1.1754944e-38, %v1731_v38 }
 0x241   : > { %v1801_v3 = vmul.f32 %v2920_v0, %v4634_v63  ;;  %v1952_v43 = vmul.f32 %v1951_v54, %v4407_v32  ;;  %vm1730_vm11 = vcmp.eq.f32.partialorder %v1729_v60, 8.507059e+37  ;;  %v1809_v11 = vand.u32 2147483647, %v4634_v63 }
 0x242   : > { %v1728_v57 = vsel %vm1727_vm10, %v2918_v10, %v1724_v12  ;;  %2921 = vrcp.f32 %v4659_v51  ;;  %v2631_v53 = vclamps-f32 %v1774_v18, 1.0  ;;  %v2001_v9 = vadd.f32 1.0, %v2629_v55 }
 0x243   : > { %v1733_v35 = vsel %vm1730_vm11, %v1732_v59, %v1728_v57  ;;  %v1802_v4 = vsub.f32 1.0, %v1801_v3  ;;  %v1811_v41 = vand.u32 2147483648, %v4634_v63  ;;  %v1916_v27 = vmul.f32 %v1915_v31, %v4387_v5  ;;  %v4934_v57 = vld [vmem:[#allocation36_spill] sm:$0xff] }
 0x244   : > { %v1734_v23 = vmul.f32 %v1733_v35, %v4330_v46  ;;  %v1875_v2 = vadd.f32 0.112945676, %v1874_v17  ;;  %v2003_v15 = vadd.f32 1.0, %v2631_v53  ;;  %vm1806_vm12 = vweird.f32 %v2920_v0  ;;  %v2178_v35 = vpop.f32.mrf.mxu2 }
 0x245   : > { %v1803_v20 = vmul.f32 %v2920_v0, %v1802_v4  ;;  %v1953_v10 = vadd.f32 0.014752088, %v1952_v43  ;;  %v1904_v30 = vadd.f32 0.05243302, %v4614_v47  ;;  %vm1805_vm13 = vweird.f32 %v4634_v63 }
 0x246   : > { %v1917_v36 = vadd.f32 0.4994258, %v1916_v27  ;;  %v1876_v52 = vmul.f32 %v1875_v2, %v4303_v25  ;;  %v2033_v19 = vmul.f32 %v2001_v9, %v4931_v56  ;;  %v2035_v46 = vmul.f32 %v2003_v15, %v4335_v8  ;;  %vm1807_vm14 = vmor %vm1805_vm13, %vm1806_vm12 }
 0x247   : > { %v1804_v39 = vadd.f32 %v2920_v0, %v1803_v20  ;;  %v1954_v34 = vmul.f32 %v1953_v10, %v4407_v32  ;;  %v2630_v60 = vclamps-f32 %v1734_v23, 1.0  ;;  %v1812_v40 = vor.u32 1.1754944e-38, %v1811_v41 }
 0x248   : > { %v2922_v13 = vpop.eup %2921  ;;  %v1918_v62 = vmul.f32 %v1917_v36, %v4387_v5  ;;  %v1877_v48 = vadd.f32 0.4994258, %v1876_v52  ;;  %v2069_v47 = vpack.c.bf16 %v2035_v46, %v2033_v19  ;;  %vm1810_vm15 = vcmp.eq.f32.partialorder %v1809_v11, 8.507059e+37  ;;  %v2041_v46 = vld [vmem:[#allocation2 + $0x30] sm:$0xff] }
 0x249   : > { %v1808_v16 = vsel %vm1807_vm14, %v2920_v0, %v1804_v39  ;;  %v1841_v63 = vmul.f32 %v2922_v13, %v4659_v51  ;;  %v1905_v14 = vmul.f32 %v1904_v30, %v4387_v5  ;;  %v1827_v54 = vmul.f32 %v4591_v1, %v4287_v26 }
 0x24a   : > { %v1813_v38 = vsel %vm1810_vm15, %v1812_v40, %v1808_v16  ;;  %v4678_v33 = vadd.f32 1.0, %v1918_v62  ;;  %v1878_v8 = vmul.f32 %v1877_v48, %v4303_v25  ;;  %2207 = vmatmul.bf16.gmra.mxu2 %v2069_v47  ;;  %v1955_v24 = vadd.f32 0.112945676, %v1954_v34 }
 0x24b   : > { %v1814_v7 = vmul.f32 %v1813_v38, %v4588_v50  ;;  %v1842_v45 = vsub.f32 1.0, %v1841_v63  ;;  %v1944_v55 = vadd.f32 0.05243302, %v4617_v21  ;;  %v2002_v42 = vadd.f32 1.0, %v2630_v60  ;;  %v2042_v38 = vld [vmem:[#allocation2] sm:$0xff] }
 0x24c   : > { %vm1846_vm0 = vweird.f32 %v2922_v13  ;;  %2923 = vrcp.f32 %v4678_v33  ;;  %v4686_v37 = vadd.f32 1.0, %v1878_v8  ;;  %v1956_v12 = vmul.f32 %v1955_v24, %v4407_v32 }
 0x24d   : > { %v2632_v17 = vclamps-f32 %v1814_v7, 1.0  ;;  %v1843_v0 = vmul.f32 %v2922_v13, %v1842_v45  ;;  %v1866_v31 = vadd.f32 0.18741608, %v4600_v6  ;;  %v1906_v26 = vadd.f32 0.18741608, %v1905_v14  ;;  %v2180_v14 = vpop.f32.mrf.mxu2 }
 0x24e   : > { %vm1845_vm1 = vweird.f32 %v4659_v51  ;;  %v1851_v50 = vand.u32 2147483648, %v4659_v51  ;;  %v1849_v21 = vand.u32 2147483647, %v4659_v51  ;;  %2925 = vrcp.f32 %v4686_v37  ;;  %v2227_v51 = vpop.f32.mrf.mxu3 }
 0x24f   : > { %v2004_v1 = vadd.f32 1.0, %v2632_v17  ;;  %v1844_v18 = vadd.f32 %v2922_v13, %v1843_v0  ;;  %v1945_v59 = vmul.f32 %v1944_v55, %v4407_v32  ;;  %vm4696_vm2 = vmor %vm1845_vm1, %vm1846_vm0  ;;  %v1957_v43 = vadd.f32 0.4994258, %v1956_v12 }
 0x250   : > { %v1828_v6 = vadd.f32 1.1283791, %v1827_v54  ;;  %v2034_v11 = vmul.f32 %v2002_v42, %v4934_v57  ;;  %v1907_v23 = vmul.f32 %v1906_v26, %v4387_v5  ;;  %v1852_v41 = vor.u32 1.1754944e-38, %v1851_v50  ;;  %v4935_v50 = vld [vmem:[#allocation23_spill] sm:$0xff] }
 0x251   : > { %v2036_v53 = vmul.f32 %v2004_v1, %v4338_v29  ;;  %v1848_v9 = vsel %vm4696_vm2, %v2922_v13, %v1844_v18  ;;  %v1958_v27 = vmul.f32 %v1957_v43, %v4407_v32  ;;  %v1867_v2 = vmul.f32 %v1866_v31, %v4303_v25 }
 0x252   : > { %v2924_v4 = vpop.eup %2923  ;;  %vm1850_vm3 = vcmp.eq.f32.partialorder %v1849_v21, 8.507059e+37  ;;  %v1946_v10 = vadd.f32 0.18741608, %v1945_v59  ;;  %v2228_v36 = vadd.f32 %v2227_v51, %v2178_v35  ;;  %v1829_v56 = vmul.f32 %v1828_v6, %v4255_v61 }
 0x253   : > { %v2070_v15 = vpack.c.bf16 %v2036_v53, %v2034_v11  ;;  %v1921_v20 = vmul.f32 %v2924_v4, %v4678_v33  ;;  %v1853_v30 = vsel %vm1850_vm3, %v1852_v41, %v1848_v9  ;;  %v4708_v29 = vadd.f32 1.0, %v1958_v27 }
 0x254   : > { %v2926_v52 = vpop.eup %2925  ;;  %v1931_v5 = vand.u32 2147483648, %v4678_v33  ;;  %v1908_v39 = vadd.f32 1.1283791, %v1907_v23  ;;  %v1854_v34 = vmul.f32 %v1853_v30, %v1829_v56  ;;  %vm1926_vm4 = vweird.f32 %v2924_v4 }
 0x255   : > { %2256 = vmatmul.bf16.gmra.mxu3 %v2070_v15  ;;  %v1922_v19 = vsub.f32 1.0, %v1921_v20  ;;  %v1881_v25 = vmul.f32 %v2926_v52, %v4686_v37  ;;  %2927 = vrcp.f32 %v4708_v29  ;;  %v1929_v60 = vand.u32 2147483647, %v4678_v33  ;;  %v2183_v51 = vpop.f32.mrf.mxu2 }
 0x256   : > { %v1868_v40 = vadd.f32 1.1283791, %v1867_v2  ;;  %v1947_v62 = vmul.f32 %v1946_v10, %v4407_v32  ;;  %v2267_v61 = vadd.f32 %v2228_v36, %v2041_v46  ;;  %vm1925_vm5 = vweird.f32 %v4678_v33  ;;  %v2229_v8 = vpop.f32.mrf.mxu3 }
 0x257   : > { %v1923_v13 = vmul.f32 %v2924_v4, %v1922_v19  ;;  %v1882_v48 = vsub.f32 1.0, %v1881_v25  ;;  %v1932_v16 = vor.u32 1.1754944e-38, %v1931_v5  ;;  %v1891_v63 = vand.u32 2147483648, %v4686_v37  ;;  %vm1927_vm6 = vmor %vm1925_vm5, %vm1926_vm4 }
 0x258   : > { %vm1886_vm7 = vweird.f32 %v2926_v52  ;;  %v1889_v7 = vand.u32 2147483647, %v4686_v37  ;;  %2283 = vst [vmem:[#allocation2 + $0x30] sm:$0xff] %v2267_v61  ;;  %v2230_v45 = vadd.f32 %v2229_v8, %v2180_v14  ;;  %v1909_v32 = vmul.f32 %v1908_v39, %v4363_v22  ;;  %v2044_v39 = vld [vmem:[#allocation2 + $0x18] sm:$0xff] }
 0x259   : > { %v1924_v47 = vadd.f32 %v2924_v4, %v1923_v13  ;;  %v1883_v54 = vmul.f32 %v2926_v52, %v1882_v48  ;;  %v2633_v24 = vclamps-f32 %v1854_v34, 1.0  ;;  %vm1930_vm8 = vcmp.eq.f32.partialorder %v1929_v60, 8.507059e+37 }
 0x25a   : > { %vm1885_vm9 = vweird.f32 %v4686_v37  ;;  %v2268_v0 = vadd.f32 %v2230_v45, %v2042_v38  ;;  %v1892_v31 = vor.u32 1.1754944e-38, %v1891_v63  ;;  %v661_v1 = vmul.f32 0.5, %v4935_v50 }
 0x25b   : > { %v1928_v55 = vsel %vm1927_vm6, %v2924_v4, %v1924_v47  ;;  %v2928_v42 = vpop.eup %2927  ;;  %v1884_v17 = vadd.f32 %v2926_v52, %v1883_v54  ;;  %vm1887_vm10 = vmor %vm1885_vm9, %vm1886_vm7  ;;  %v1869_v18 = vmul.f32 %v1868_v40, %v4273_v44  ;;  %vm1890_vm11 = vcmp.eq.f32.partialorder %v1889_v7, 8.507059e+37  ;;  %v2043_v44 = vld [vmem:[#allocation2 + $0x58] sm:$0xff]  ;;  %v2046_v54 = vld [vmem:[#allocation2 + $0x68] sm:$0xff] }
 0x25c   : > { %v1933_v33 = vsel %vm1930_vm8, %v1932_v16, %v1928_v55  ;;  %v1961_v26 = vmul.f32 %v2928_v42, %v4708_v29  ;;  %2284 = vst [vmem:[#allocation2] sm:$0xff] %v2268_v0  ;;  %v2005_v59 = vadd.f32 1.0, %v2633_v24  ;;  %v663_v6 = vmul.f32 0.5, %v4351_v28  ;;  %v2045_v16 = vld [vmem:[#allocation2 + $0x50] sm:$0xff]  ;;  %v2047_v24 = vld [vmem:[#allocation2 + $0x8] sm:$0xff] }
 0x25d   : > { %v1934_v12 = vmul.f32 %v1933_v33, %v1909_v32  ;;  %v1888_v21 = vsel %vm1887_vm10, %v2926_v52, %v1884_v17  ;;  %v1948_v37 = vadd.f32 1.1283791, %v1947_v62  ;;  %v1969_v57 = vand.u32 2147483647, %v4708_v29  ;;  %v2185_v46 = vpop.f32.mrf.mxu2  ;;  %v2048_v0 = vld [vmem:[#allocation2 + $0x48] sm:$0xff] }
 0x25e   : > { %v1893_v3 = vsel %vm1890_vm11, %v1892_v31, %v1888_v21  ;;  %v1962_v43 = vsub.f32 1.0, %v1961_v26  ;;  %v1971_v11 = vand.u32 2147483648, %v4708_v29  ;;  %vm1966_vm12 = vweird.f32 %v2928_v42  ;;  %v2232_v4 = vpop.f32.mrf.mxu3 }
 0x25f   : > { %v2635_v22 = vclamps-f32 %v1934_v12, 1.0  ;;  %v1894_v9 = vmul.f32 %v1893_v3, %v1869_v18  ;;  %v2233_v23 = vadd.f32 %v2232_v4, %v2183_v51  ;;  %v2037_v41 = vmul.f32 %v2005_v59, %v661_v1  ;;  %v2049_v1 = vld [vmem:[#allocation2 + $0x40] sm:$0xff] }
 0x260   : > { %v1963_v35 = vmul.f32 %v2928_v42, %v1962_v43  ;;  %vm1965_vm13 = vweird.f32 %v4708_v29  ;;  %v1949_v28 = vmul.f32 %v1948_v37, %v4372_v49  ;;  %v1972_v15 = vor.u32 1.1754944e-38, %v1971_v11  ;;  %v4936_v29 = vld [vmem:[#allocation25_spill] sm:$0xff]  ;;  %v2050_v3 = vld [vmem:[#allocation2 + $0x20] sm:$0xff] }
 0x261   : > { %v2007_v53 = vadd.f32 1.0, %v2635_v22  ;;  %vm1967_vm14 = vmor %vm1965_vm13, %vm1966_vm12  ;;  %v2269_v20 = vadd.f32 %v2233_v23, %v2043_v44  ;;  %v2634_v30 = vclamps-f32 %v1894_v9, 1.0  ;;  %vm1970_vm15 = vcmp.eq.f32.partialorder %v1969_v57, 8.507059e+37  ;;  %v2051_v11 = vld [vmem:[#allocation2 + $0x10] sm:$0xff]  ;;  %v2052_v44 = vld [vmem:[#allocation2 + $0x38] sm:$0xff] }
 0x262   : > { %v1964_v2 = vadd.f32 %v2928_v42, %v1963_v35  ;;  %v662_v13 = vmul.f32 0.5, %v4936_v29  ;;  %v664_v49 = vmul.f32 0.5, %v4358_v58  ;;  %v2056_v29 = vld [vmem:[#allocation2 + $0x28] sm:$0xff] }
 0x263   : > { %v2039_v27 = vmul.f32 %v2007_v53, %v663_v6  ;;  %2285 = vst [vmem:[#allocation2 + $0x58] sm:$0xff] %v2269_v20  ;;  %v2006_v5 = vadd.f32 1.0, %v2634_v30  ;;  %v2054_v30 = vld [vmem:[#allocation2 + $0x70] sm:$0xff] }
 0x264   : > { %v1968_v36 = vsel %vm1967_vm14, %v2928_v42, %v1964_v2  ;;  %v2053_v2 = vld [vmem:[#allocation2 + $0x60] sm:$0xff] }
 0x265   : > { %v2071_v10 = vpack.c.bf16 %v2039_v27, %v2037_v41  ;;  %v1973_v52 = vsel %vm1970_vm15, %v1972_v15, %v1968_v36  ;;  %v2038_v62 = vmul.f32 %v2006_v5, %v662_v13  ;;  %v2188_v47 = vpop.f32.mrf.mxu2  ;;  %v2055_v5 = vld [vmem:[#allocation2 + $0x78] sm:$0xff] }
 0x266   : > { %v1974_v56 = vmul.f32 %v1973_v52, %v1949_v28  ;;  %v2234_v25 = vpop.f32.mrf.mxu3 }
 0x267   : > { %2212 = vmatmul.bf16.gmra.mxu2 %v2071_v10  ;;  %v2235_v34 = vadd.f32 %v2234_v25, %v2185_v46 }
 0x268   : > { %v2636_v19 = vclamps-f32 %v1974_v56, 1.0 }
 0x269   : > { %v2270_v40 = vadd.f32 %v2235_v34, %v2044_v39 }
 0x26a   : > { %v2008_v60 = vadd.f32 1.0, %v2636_v19 }
 0x26b   : > { %2286 = vst [vmem:[#allocation2 + $0x18] sm:$0xff] %v2270_v40 }
 0x26c   : > { %v2040_v48 = vmul.f32 %v2008_v60, %v664_v49 }
 0x26d   : > { %v2190_v8 = vpop.f32.mrf.mxu2 }
 0x26e   : > { %v2072_v61 = vpack.c.bf16 %v2040_v48, %v2038_v62  ;;  %v2237_v63 = vpop.f32.mrf.mxu3 }
 0x26f   : > { %v2238_v14 = vadd.f32 %v2237_v63, %v2188_v47 }
 0x270   : > { %2261 = vmatmul.bf16.gmra.mxu3 %v2072_v61 }
 0x271   : > { %v2271_v38 = vadd.f32 %v2238_v14, %v2045_v16 }
 0x273   : > { %2287 = vst [vmem:[#allocation2 + $0x50] sm:$0xff] %v2271_v38 }
 0x275   : > { %v2193_v58 = vpop.f32.mrf.mxu2 }
 0x276   : > { %v2239_v7 = vpop.f32.mrf.mxu3 }
 0x277   : > { %v2240_v45 = vadd.f32 %v2239_v7, %v2190_v8 }
 0x279   : > { %v2272_v32 = vadd.f32 %v2240_v45, %v2046_v54 }
 0x27b   : > { %2288 = vst [vmem:[#allocation2 + $0x68] sm:$0xff] %v2272_v32 }
 0x27d   : > { %v2195_v17 = vpop.f32.mrf.mxu2 }
 0x27e   : > { %v2242_v55 = vpop.f32.mrf.mxu3 }
 0x27f   : > { %v2243_v42 = vadd.f32 %v2242_v55, %v2193_v58 }
 0x281   : > { %v2273_v33 = vadd.f32 %v2243_v42, %v2047_v24 }
 0x283   : > { %2289 = vst [vmem:[#allocation2 + $0x8] sm:$0xff] %v2273_v33 }
 0x286   : > { %v2244_v12 = vpop.f32.mrf.mxu3 }
 0x287   : > { %v2245_v31 = vadd.f32 %v2244_v12, %v2195_v17 }
 0x289   : > { %v2274_v26 = vadd.f32 %v2245_v31, %v2048_v0 }
 0x28b   : > { %2290 = vst [vmem:[#allocation2 + $0x48] sm:$0xff] %v2274_v26 }
 0x290   : > { %v2198_v50 = vpop.f32.mrf.mxu2 }
 0x298   : > { %v2200_v59 = vpop.f32.mrf.mxu2 }
 0x2a4   : > { %v2247_v18 = vpop.f32.mrf.mxu3 }
 0x2a5   : > { %v2248_v21 = vadd.f32 %v2247_v18, %v2198_v50 }
 0x2a7   : > { %v2275_v22 = vadd.f32 %v2248_v21, %v2049_v1 }
 0x2a9   : > { %2291 = vst [vmem:[#allocation2 + $0x40] sm:$0xff] %v2275_v22 }
 0x2ac   : > { %v2249_v43 = vpop.f32.mrf.mxu3 }
 0x2ad   : > { %v2250_v6 = vadd.f32 %v2249_v43, %v2200_v59 }
 0x2af   : > { %v2276_v37 = vadd.f32 %v2250_v6, %v2050_v3 }
 0x2b0   : > { %v2203_v57 = vpop.f32.mrf.mxu2 }
 0x2b1   : > { %2292 = vst [vmem:[#allocation2 + $0x20] sm:$0xff] %v2276_v37 }
 0x2b8   : > { %v2205_v51 = vpop.f32.mrf.mxu2 }
 0x2b9   : > { %v2252_v53 = vpop.f32.mrf.mxu3 }
 0x2ba   : > { %v2253_v9 = vadd.f32 %v2252_v53, %v2203_v57 }
 0x2bc   : > { %v2277_v35 = vadd.f32 %v2253_v9, %v2051_v11 }
 0x2be   : > { %2293 = vst [vmem:[#allocation2 + $0x10] sm:$0xff] %v2277_v35 }
 0x2c1   : > { %v2254_v4 = vpop.f32.mrf.mxu3 }
 0x2c2   : > { %v2255_v23 = vadd.f32 %v2254_v4, %v2205_v51 }
 0x2c4   : > { %v2278_v41 = vadd.f32 %v2255_v23, %v2052_v44 }
 0x2c6   : > { %2294 = vst [vmem:[#allocation2 + $0x38] sm:$0xff] %v2278_v41 }
 0x2cd   : > { %v2208_v27 = vpop.f32.mrf.mxu2 }
 0x2d5   : > { %v2210_v10 = vpop.f32.mrf.mxu2 }
 0x2d8   : > { %v2257_v28 = vpop.f32.mrf.mxu3 }
 0x2d9   : > { %v2258_v15 = vadd.f32 %v2257_v28, %v2208_v27 }
 0x2db   : > { %v2279_v20 = vadd.f32 %v2258_v15, %v2053_v2 }
 0x2dd   : > { %2295 = vst [vmem:[#allocation2 + $0x60] sm:$0xff] %v2279_v20 }
 0x2e0   : > { %v2259_v36 = vpop.f32.mrf.mxu3 }
 0x2e1   : > { %v2260_v52 = vadd.f32 %v2259_v36, %v2210_v10 }
 0x2e3   : > { %v2280_v56 = vadd.f32 %v2260_v52, %v2054_v30 }
 0x2e5   : > { %2296 = vst [vmem:[#allocation2 + $0x70] sm:$0xff] %v2280_v56 }
 0x2ea   : > { %v2213_v19 = vpop.f32.mrf.mxu2 }
 0x2f2   : > { %v2215_v34 = vpop.f32.mrf.mxu2 }
 0x2f3   : > { %v2262_v46 = vpop.f32.mrf.mxu3 }
 0x2f4   : > { %v2263_v39 = vadd.f32 %v2262_v46, %v2213_v19 }
 0x2f6   : > { %v2281_v25 = vadd.f32 %v2263_v39, %v2055_v5 }
 0x2f8   : > { %2297 = vst [vmem:[#allocation2 + $0x78] sm:$0xff] %v2281_v25 }
 0x2fb   : > { %v2264_v13 = vpop.f32.mrf.mxu3 }
 0x2fc   : > { %v2265_v49 = vadd.f32 %v2264_v13, %v2215_v34  ;;  %2302 = sbr.rel (%p2701_p1) target bundleno = 788 (0x314), region = 64 }
 0x2fe   : > { %v2282_v60 = vadd.f32 %v2265_v49, %v2056_v29 }
 0x300   : > { %2298 = vst [vmem:[#allocation2 + $0x28] sm:$0xff] %v2282_v60 }
 0x301   : > { %v2303_v40 = vld [vmem:[#allocation2 + $0x30] sm:$0xff]  ;;  %v2929_v62 = vld [vmem:[%s4799_s4] ss:$0 sm:$0xff]  ;;  %v2305_v61 = vld [vmem:[#allocation2 + $0x58] sm:$0xff] }
 0x302   : > { %v2304_v48 = vld [vmem:[#allocation2] sm:$0xff]  ;;  %v2306_v47 = vld [vmem:[#allocation2 + $0x18] sm:$0xff]  ;;  %v2323_v16 = vadd.f32 %v2929_v62, %v2303_v40  ;;  %v2325_v14 = vadd.f32 %v2929_v62, %v2305_v61  ;;  %v2307_v38 = vld [vmem:[#allocation2 + $0x50] sm:$0xff] }
 0x303   : > { %v2324_v63 = vadd.f32 %v2929_v62, %v2304_v48  ;;  %v2308_v8 = vld [vmem:[#allocation2 + $0x68] sm:$0xff]  ;;  %v2326_v54 = vadd.f32 %v2929_v62, %v2306_v47  ;;  %v2327_v45 = vadd.f32 %v2929_v62, %v2307_v38  ;;  %v2311_v24 = vld [vmem:[#allocation2 + $0x40] sm:$0xff]  ;;  %v2313_v17 = vld [vmem:[#allocation2 + $0x10] sm:$0xff] }
 0x304   : > { %v2309_v7 = vld [vmem:[#allocation2 + $0x8] sm:$0xff]  ;;  %2339 = vst [vmem:[%s3353_s23] sm:$0xff] %v2323_v16  ;;  %v2328_v58 = vadd.f32 %v2929_v62, %v2308_v8  ;;  %v2312_v42 = vld [vmem:[#allocation2 + $0x20] sm:$0xff]  ;;  %v2331_v0 = vadd.f32 %v2929_v62, %v2311_v24  ;;  %v2314_v12 = vld [vmem:[#allocation2 + $0x38] sm:$0xff]  ;;  %v2333_v50 = vadd.f32 %v2929_v62, %v2313_v17 }
 0x305   : > { %v2310_v32 = vld [vmem:[#allocation2 + $0x48] sm:$0xff]  ;;  %2340 = vst [vmem:[%s3353_s23 + $0x8] sm:$0xff] %v2324_v63  ;;  %v2329_v55 = vadd.f32 %v2929_v62, %v2309_v7  ;;  %v2332_v31 = vadd.f32 %v2929_v62, %v2312_v42  ;;  %v2315_v26 = vld [vmem:[#allocation2 + $0x60] sm:$0xff]  ;;  %v2316_v1 = vld [vmem:[#allocation2 + $0x70] sm:$0xff]  ;;  %v2334_v18 = vadd.f32 %v2929_v62, %v2314_v12 }
 0x306   : > { %2341 = vst [vmem:[%s3353_s23 + $0x10] sm:$0xff] %v2325_v14  ;;  %v2330_v33 = vadd.f32 %v2929_v62, %v2310_v32  ;;  %v2317_v21 = vld [vmem:[#allocation2 + $0x78] sm:$0xff]  ;;  %v2335_v22 = vadd.f32 %v2929_v62, %v2315_v26  ;;  %v2336_v3 = vadd.f32 %v2929_v62, %v2316_v1 }
 0x307   : > { %2342 = vst [vmem:[%s3353_s23 + $0x18] sm:$0xff] %v2326_v54  ;;  %v2318_v59 = vld [vmem:[#allocation2 + $0x28] sm:$0xff]  ;;  %v2337_v43 = vadd.f32 %v2929_v62, %v2317_v21 }
 0x308   : > { %2343 = vst [vmem:[%s3353_s23 + $0x20] sm:$0xff] %v2327_v45  ;;  %v2338_v6 = vadd.f32 %v2929_v62, %v2318_v59 }
 0x309   : > { %2344 = vst [vmem:[%s3353_s23 + $0x28] sm:$0xff] %v2328_v58 }
 0x30a   : > { %2345 = vst [vmem:[%s3353_s23 + $0x30] sm:$0xff] %v2329_v55 }
 0x30b   : > { %2346 = vst [vmem:[%s3353_s23 + $0x38] sm:$0xff] %v2330_v33 }
 0x30c   : > { %2347 = vst [vmem:[%s3353_s23 + $0x40] sm:$0xff] %v2331_v0 }
 0x30d   : > { %2348 = vst [vmem:[%s3353_s23 + $0x48] sm:$0xff] %v2332_v31 }
 0x30e   : > { %2349 = vst [vmem:[%s3353_s23 + $0x50] sm:$0xff] %v2333_v50 }
 0x30f   : > { %2350 = vst [vmem:[%s3353_s23 + $0x58] sm:$0xff] %v2334_v18 }
 0x310   : > { %2351 = vst [vmem:[%s3353_s23 + $0x60] sm:$0xff] %v2335_v22 }
 0x311   : > { %2352 = vst [vmem:[%s3353_s23 + $0x68] sm:$0xff] %v2336_v3 }
 0x312   : > { %2353 = vst [vmem:[%s3353_s23 + $0x70] sm:$0xff] %v2337_v43 }
 0x313   : > { %2354 = vst [vmem:[%s3353_s23 + $0x78] sm:$0xff] %v2338_v6 }
 0x314 PF: > { %s2748_s21 = sshll.u32 %s3144_s22, 7  ;;  %s2368_s27 = sshll.u32 %s3353_s23, 4  ;;  %s2369_s27 = int_to_ptr.vmem [resolvable:$true] %s2368_s27 }
 0x315   : > { %s2367_s9 = scalar_lea.hbm %s4800_s5, %s2748_s21  ;;  %s2356_s3 = scalar_lea.sflag [#allocation5], %s3334_s7 }
 0x316   : > { %s2370_s8 = sshll.u32 %s2367_s9, 4  ;;  %s3070_s22 = scalar_lea.hbm %s4800_s5, 256  ;;  %s2371_s8 = int_to_ptr.hbm [resolvable:$true] %s2370_s8 }
 0x317   : > { %s3064_s28 = sshra.s32 %s2371_s8, 4  ;;  %s3065_s28 = int_to_ptr.hbm [resolvable:$true] %s3064_s28 }
 0x318   : > { %s3066_s30 = scalar_lea.hbm %s3065_s28, 128  ;;  %p3071_p12 = scmp.lt.s32.totalorder %s3065_s28, %s4800_s5 }
 0x319   : > { %p3067_p4 = scmp.ne.s32.totalorder %s3065_s28, %s3066_s30  ;;  %p3072_p13 = scmp.lt.s32.totalorder %s3070_s22, %s3066_s30 }
 0x31b   : > { %p3068_p10 = pnand %p3067_p4, %p3303_p0  ;;  %p3073_p3 = por %p3072_p13, %p3071_p12 }
 0x31d   : > { %p3069_p11 = pneg %p3068_p10 }
 0x31f   : > { %p3074_p5 = pnand %p3073_p3, %p3069_p11 }
 0x321   : > { %3077 = shalt.err (!%p3074_p5)
}
 0x322   : > { %s3166_s7 = smov 128   ;;  %s3167_s23 = smov 8  }
 0x323   : > { %2763 = dma.vmem_to_hbm [thread:$0]  (%p3303_p0), %s2369_s27, 2048, %s2371_s8, %s2356_s3, %s3166_s7, %s3166_s7, %s3167_s23  }
 0x324 PF: > { %p2790_p7 = scmp.ge.s32.totalorder %s3156_s25, 2  ;;  %s2385_s13 = sand.u32 1, %s3128_s18  }
 0x325   : > { %s2386_s29 = scalar_lea.sflag [#allocation5], %s2385_s13 }
 0x326   : > { %p2780_p9 = pnand %p2790_p7, %p3257_p6 }
 0x328   : > { %p2781_p2 = pneg %p2780_p9 }
 0x32a   : > { %3123 = dma.done.wait (%p2781_p2), %s2386_s29, 2048  }
 0x32b   : > { %3125 = vsyncadd (%p2781_p2), %s2386_s29, 4294965248  ;;  %s23_s25 = sadd.s32 1, %s3156_s25   ;;  %s4938_s21 = sld [smem:[#allocation16_spill]] }
 0x32c   : > { %p20_p8 = scmp.ge.s32.totalorder %s23_s25, 6   ;;  %s4939_s23 = sld [smem:[#allocation18_spill]] }
 0x32d   : > { %s4940_s18 = smov %s3132_s19  ;;  %s4941_s19 = smov %s3136_s20 }
 0x32e   : > { %s4942_s20 = smov %s3322_s2  ;;  %s4943_s22 = smov %s3152_s24 }
 0x32f   : > { %s4944_s24 = smov %s4950_s26  ;;  %22 = sbr.rel (!%p20_p8) target bundleno = 13 (0xd), region = 108 }
 0x334   :  { %2392 = vsyncpa [#allocation4], 1 }
 0x335   :  { %2394 = vsyncpa [#allocation4 + $0x1], 1 }
 0x336   :  { %2395 = vsyncpa [#allocation7], 1 }
 0x337   :  { %2396 = vsyncpa [#allocation10], 1 }
 0x338   :  { %2397 = vsyncpa [#allocation5], 1 }
 0x339   :  { %2399 = vsyncpa [#allocation5 + $0x1], 1 }

</bundles_post_ra>
